<compile_context>
chip_gen: v7x
topology: tpu7x:2x2x1
jax: 0.10.0
libtpu: 0.0.40
codegen_flags: <defaults>
</compile_context>

<pallas_src>
import functools

import jax
import jax.numpy as jnp
from jax.experimental import pallas as pl
from jax.experimental.pallas import tpu as pltpu


# ----------------------------------------------------------------------------
# VMEM planning helpers
# ----------------------------------------------------------------------------
_FALLBACK_VMEM_CAP = 64 * 1024 * 1024          # v7x per-core physical (smallest)


def _vmem_capacity_bytes():
    try:
        return int(pltpu.get_tpu_info().vmem_capacity_bytes)
    except Exception:
        return _FALLBACK_VMEM_CAP


def _round_up(x, m):
    return -(-x // m) * m


# ----------------------------------------------------------------------------
# Conv2d + bias + ReLU kernel (kh taps accumulated in-kernel, no HBM im2col)
# ----------------------------------------------------------------------------
def _conv_row_kernel(x_ref, w_ref, b_ref, o_ref, *, ksize, stride, Hq, OH, OW):
    # x_ref : (tile_n, stride*Hq*OW, ksize*Cin)   phase-split + kw-window layout
    # w_ref : (ksize, ksize*Cin, Cout)            one (kw,cin)-slab per kh tap
    # o_ref : (tile_n, OH*OW, Cout)
    tile_n = o_ref.shape[0]
    cout = o_ref.shape[-1]
    bias = b_ref[...]                                          # (1, Cout) f32
    for ln in range(tile_n):
        acc = jnp.zeros((OH * OW, cout), jnp.float32)
        for kh in range(ksize):
            qh, rh = kh // stride, kh % stride
            row0 = (rh * Hq + qh) * OW
            tap = x_ref[ln, row0:row0 + OH * OW, :]            # (OH*OW, k*Cin)
            acc = acc + jnp.dot(tap, w_ref[kh],
                                preferred_element_type=jnp.float32)
        o_ref[ln] = jnp.maximum(acc + bias, 0.0).astype(o_ref.dtype)


def pallas_conv2d_relu(x_nhwc, w_taps, b, ksize, stride, out_dtype):
    """Valid-padding Conv2d + bias + ReLU (nn.Conv2d defaults), NHWC.

    The kw/Cin window gather (k/stride-fold, tiny) is done once by XLA in the
    wrapper; the kh taps are accumulated inside the kernel from a
    VMEM-resident block, so no (N*OH*OW, k*k*Cin) patch matrix hits HBM."""
    N, H, W, Cin = x_nhwc.shape
    OH = (H - ksize) // stride + 1
    OW = (W - ksize) // stride + 1
    Cout = w_taps.shape[-1]
    kCin = ksize * Cin
    Hq = -(-H // stride)
    Hp = Hq * stride
    itemsize = jnp.dtype(x_nhwc.dtype).itemsize
    out_itemsize = jnp.dtype(out_dtype).itemsize

    if Hp != H:
        x_nhwc = jnp.pad(x_nhwc, ((0, 0), (0, Hp - H), (0, 0), (0, 0)))

    # kw-window gather along W (lanes become (kw, cin) -> lane-dense k*Cin).
    cols = [x_nhwc[:, :, kw:kw + stride * (OW - 1) + 1:stride, :]
            for kw in range(ksize)]
    xw = jnp.stack(cols, axis=3).reshape(N, Hp, OW, kCin)
    # Phase-split H by the stride so every kh tap is a contiguous row range.
    xw = xw.reshape(N, Hq, stride, OW, kCin).transpose(0, 2, 1, 3, 4)
    xw = xw.reshape(N, stride * Hq * OW, kCin)

    # --- batch tiling (bounded unroll, VMEM aware) ---------------------------
    cap = _vmem_capacity_bytes()
    budget = max(min(cap - (8 << 20), 32 << 20), 4 << 20)
    sub = 8 if itemsize >= 4 else 16
    in_img = _round_up(stride * Hq * OW, sub) * _round_up(kCin, 128) * itemsize
    out_img = _round_up(OH * OW, sub) * _round_up(Cout, 128) * out_itemsize
    acc_img = OH * OW * _round_up(Cout, 128) * 4
    w_bytes = ksize * kCin * Cout * itemsize + _round_up(Cout, 128) * 4
    per_img = 2 * in_img + 2 * out_img + 2 * acc_img
    tile_n = int(max(1, min(N, 8, (budget - w_bytes) // max(per_img, 1))))
    n_pad = _round_up(N, tile_n)
    if n_pad != N:
        xw = jnp.pad(xw, ((0, n_pad - N), (0, 0), (0, 0)))
    need = w_bytes + per_img * tile_n + (4 << 20)
    vmem_limit = int(min(max(need, 16 << 20), cap))

    out = pl.pallas_call(
        functools.partial(_conv_row_kernel, ksize=ksize, stride=stride,
                          Hq=Hq, OH=OH, OW=OW),
        out_shape=jax.ShapeDtypeStruct((n_pad, OH * OW, Cout), out_dtype),
        grid=(n_pad // tile_n,),
        in_specs=[
            pl.BlockSpec((tile_n, stride * Hq * OW, kCin), lambda i: (i, 0, 0)),
            pl.BlockSpec((ksize, kCin, Cout), lambda i: (0, 0, 0),
                         pipeline_mode=pl.Buffered(1)),      # resident weight
            pl.BlockSpec((1, Cout), lambda i: (0, 0),
                         pipeline_mode=pl.Buffered(1)),      # resident bias
        ],
        out_specs=pl.BlockSpec((tile_n, OH * OW, Cout), lambda i: (i, 0, 0)),
        compiler_params=pltpu.CompilerParams(
            dimension_semantics=("parallel",),
            vmem_limit_bytes=vmem_limit),
    )(xw, w_taps, b.reshape(1, Cout))

    out = out[:N] if n_pad != N else out
    return out.reshape(N, OH, OW, Cout)


# ----------------------------------------------------------------------------
# Fused dueling head: (hidden value|adv layer) -> (block-diag v2|a2) -> combine
# ----------------------------------------------------------------------------
def _dueling_head_kernel(x_ref, w1_ref, b1_ref, w2_ref, b2_ref, q_ref, acc_ref,
                         *, inv_a):
    k = pl.program_id(1)

    @pl.when(k == 0)
    def _init():
        acc_ref[...] = jnp.zeros_like(acc_ref)

    acc_ref[...] += jnp.dot(x_ref[...], w1_ref[...],
                            preferred_element_type=jnp.float32)

    @pl.when(k == pl.num_programs(1) - 1)
    def _finish():
        h = jnp.maximum(acc_ref[...] + b1_ref[...], 0.0)       # fused v|a hidden
        va = jnp.dot(h.astype(w2_ref.dtype), w2_ref[...],
                     preferred_element_type=jnp.float32) + b2_ref[...]
        v = va[:, 0:1]                                         # value column
        adv_mean = (jnp.sum(va, axis=1, keepdims=True) - v) * inv_a
        q_ref[...] = (v + (va - adv_mean)).astype(q_ref.dtype)


def pallas_dueling_head(feats, w1, b1, w2, b2, n_actions, use_bf16=False):
    M, K = feats.shape
    N1 = w1.shape[1]                 # 1024 = value-hidden | adv-hidden
    NP = w2.shape[1]                 # 128-lane padded (col0=value, 1..A=adv)
    cdt = jnp.bfloat16 if use_bf16 else jnp.float32
    feats = feats.astype(cdt)
    w1 = w1.astype(cdt)
    w2 = w2.astype(cdt)
    itemsize = jnp.dtype(cdt).itemsize

    cap = _vmem_capacity_bytes()
    budget = max(cap - (8 << 20), 8 << 20)

    # K ("arbitrary") axis: keep the hidden weight resident (Buffered(1)) when
    # it fits, otherwise stream K-slabs (v7x / Atari-scale safety).
    w1_bytes = K * N1 * itemsize
    if w1_bytes <= budget // 2:
        tile_k = K
    else:
        tile_k = max(512, ((budget // 2) // (2 * N1 * itemsize) // 512) * 512)
    k_pad = _round_up(K, tile_k)
    k_tiles = k_pad // tile_k

    # Row ("parallel") axis.
    w1_resident = 1 if k_tiles == 1 else 2
    fixed = (w1_resident * tile_k * N1 * itemsize
             + N1 * NP * itemsize + (N1 + NP) * 4)
    per_row = 2 * tile_k * itemsize + N1 * 4 + 2 * NP * 4
    avail = max(budget - fixed, 8 * per_row)
    tile_m = max(8, min(512, (avail // per_row // 8) * 8))
    if M <= 8:
        tile_m, m_pad = M, M
    else:
        m_pad = _round_up(M, 8)
        tile_m = min(tile_m, m_pad)
        if m_pad // tile_m < 2 and m_pad >= 16:      # keep both v7x TCs busy
            tile_m = _round_up(-(-m_pad // 2), 8)
        m_pad = _round_up(m_pad, tile_m)
    m_tiles = m_pad // tile_m

    if k_pad != K:
        feats = jnp.pad(feats, ((0, 0), (0, k_pad - K)))
        w1 = jnp.pad(w1, ((0, k_pad - K), (0, 0)))
    if m_pad != M:
        feats = jnp.pad(feats, ((0, m_pad - M), (0, 0)))

    need = fixed + per_row * tile_m + (4 << 20)
    vmem_limit = int(min(max(need, 16 << 20), cap))

    if k_tiles == 1:
        w1_spec = pl.BlockSpec((tile_k, N1), lambda i, k: (k, 0),
                               pipeline_mode=pl.Buffered(1))
    else:
        w1_spec = pl.BlockSpec((tile_k, N1), lambda i, k: (k, 0))

    q_pad = pl.pallas_call(
        functools.partial(_dueling_head_kernel, inv_a=1.0 / float(n_actions)),
        out_shape=jax.ShapeDtypeStruct((m_pad, NP), jnp.float32),
        grid=(m_tiles, k_tiles),
        in_specs=[
            pl.BlockSpec((tile_m, tile_k), lambda i, k: (i, k)),
            w1_spec,
            pl.BlockSpec((1, N1), lambda i, k: (0, 0),
                         pipeline_mode=pl.Buffered(1)),
            pl.BlockSpec((N1, NP), lambda i, k: (0, 0),
                         pipeline_mode=pl.Buffered(1)),
            pl.BlockSpec((1, NP), lambda i, k: (0, 0),
                         pipeline_mode=pl.Buffered(1)),
        ],
        out_specs=pl.BlockSpec((tile_m, NP), lambda i, k: (i, 0)),
        scratch_shapes=[pltpu.VMEM((tile_m, N1), jnp.float32)],
        compiler_params=pltpu.CompilerParams(
            dimension_semantics=("parallel", "arbitrary"),
            vmem_limit_bytes=vmem_limit),
    )(feats, w1, b1.reshape(1, N1), w2, b2.reshape(1, NP))

    return q_pad[:M, 1:1 + n_actions]


# ----------------------------------------------------------------------------
# Parameter setup (deterministic, PyTorch-default-style uniform init)
# ----------------------------------------------------------------------------
def _uniform(key, shape, bound):
    return jax.random.uniform(key, shape, jnp.float32, -bound, bound)


def _conv_out(size, k, s):
    return (size - k) // s + 1


def _nhwc_flatten_perm(h, w, c):
    """Row permutation mapping PyTorch's NCHW-flatten feature order to the
    NHWC-flatten order produced by our channel-last conv stack."""
    hh = jnp.arange(h).reshape(h, 1, 1)
    ww = jnp.arange(w).reshape(1, w, 1)
    cc = jnp.arange(c).reshape(1, 1, c)
    return ((cc * h + hh) * w + ww).reshape(-1)


def init_params(key, input_channels, height, width, n_actions):
    h1, w1 = _conv_out(height, 8, 4), _conv_out(width, 8, 4)
    h2, w2 = _conv_out(h1, 4, 2), _conv_out(w1, 4, 2)
    h3, w3 = _conv_out(h2, 3, 1), _conv_out(w2, 3, 1)
    cnn_output_size = 64 * h3 * w3

    ks = jax.random.split(key, 14)
    p = {}

    def conv_init(kw_key, kb_key, cout, cin, k):
        fan_in = cin * k * k
        bound = 1.0 / float(fan_in) ** 0.5
        w_oihw = _uniform(kw_key, (cout, cin, k, k), bound)
        # torch (Cout,Cin,KH,KW) -> (KH,KW,Cin,Cout) -> (KH, KW*Cin, Cout):
        # one (kw,cin)-ordered slab per kh tap, matching the in-wrapper
        # kw-window gather.  Done once at init.
        w_taps = jnp.transpose(w_oihw, (2, 3, 1, 0)).reshape(k, k * cin, cout)
        return w_taps, _uniform(kb_key, (cout,), bound)

    def lin_init(kw_key, kb_key, fin, fout):
        bound = 1.0 / float(fin) ** 0.5
        return (_uniform(kw_key, (fin, fout), bound),
                _uniform(kb_key, (fout,), bound))

    p["conv1_w"], p["conv1_b"] = conv_init(ks[0], ks[1], 32, input_channels, 8)
    p["conv2_w"], p["conv2_b"] = conv_init(ks[2], ks[3], 64, 32, 4)
    p["conv3_w"], p["conv3_b"] = conv_init(ks[4], ks[5], 64, 64, 3)

    v1_w, v1_b = lin_init(ks[6], ks[7], cnn_output_size, 512)
    a1_w, a1_b = lin_init(ks[10], ks[11], cnn_output_size, 512)
    v2_w, v2_b = lin_init(ks[8], ks[9], 512, 1)
    a2_w, a2_b = lin_init(ks[12], ks[13], 512, n_actions)

    # Fuse the value/advantage hidden layers into one lane-dense (cnn, 1024)
    # matmul; rows permuted once from torch's NCHW-flatten order to NHWC order.
    perm = _nhwc_flatten_perm(h3, w3, 64)
    p["head1_w"] = jnp.concatenate([v1_w[perm], a1_w[perm]], axis=1)
    p["head1_b"] = jnp.concatenate([v1_b, a1_b])

    # Second-layer heads as one block-diagonal, lane-padded (1024, 128) matmul:
    # col 0 = value, cols 1..A = advantage, remaining lanes zero (sliced off).
    ncols = max(128, _round_up(1 + n_actions, 128))
    w2m = jnp.zeros((1024, ncols), jnp.float32)
    w2m = w2m.at[:512, 0:1].set(v2_w)
    w2m = w2m.at[512:, 1:1 + n_actions].set(a2_w)
    b2v = jnp.zeros((ncols,), jnp.float32)
    b2v = b2v.at[0].set(v2_b[0]).at[1:1 + n_actions].set(a2_b)
    p["head2_w"], p["head2_b"] = w2m, b2v
    # TODO(synk): feature / forward_net / inverse_net params (icm_predict path)
    # are not part of forward() and are therefore omitted.
    return p


# ----------------------------------------------------------------------------
# Forward pass (== ConvQNet.forward)
# ----------------------------------------------------------------------------
def conv_qnet_forward(params, x_nchw, n_actions, use_bf16=False):
    act_dt = jnp.bfloat16 if use_bf16 else jnp.float32
    x = jnp.transpose(x_nchw, (0, 2, 3, 1)).astype(act_dt)      # NCHW -> NHWC
    x = pallas_conv2d_relu(x, params["conv1_w"].astype(act_dt),
                           params["conv1_b"], 8, 4, act_dt)
    x = pallas_conv2d_relu(x, params["conv2_w"].astype(act_dt),
                           params["conv2_b"], 4, 2, act_dt)
    x = pallas_conv2d_relu(x, params["conv3_w"].astype(act_dt),
                           params["conv3_b"], 3, 1, act_dt)
    feats = x.reshape(x.shape[0], -1)     # NHWC flatten (head1 rows permuted at init)
    return pallas_dueling_head(feats, params["head1_w"], params["head1_b"],
                               params["head2_w"], params["head2_b"],
                               n_actions, use_bf16=use_bf16)


# ----------------------------------------------------------------------------
# Plain-XLA reference (same stored params) for a correctness cross-check
# ----------------------------------------------------------------------------
def _reference_forward(params, x_nchw, n_actions):
    x = jnp.transpose(x_nchw, (0, 2, 3, 1)).astype(jnp.float32)
    for i, (k, s) in enumerate(((8, 4), (4, 2), (3, 1)), start=1):
        w = params[f"conv{i}_w"]
        kk, kc, cout = w.shape
        w4 = w.reshape(kk, kk, kc // kk, cout)                  # (KH,KW,Cin,Cout)
        x = jax.lax.conv_general_dilated(
            x, w4, window_strides=(s, s), padding="VALID",
            dimension_numbers=("NHWC", "HWIO", "NHWC"),
            precision=jax.lax.Precision.HIGHEST)
        x = jnp.maximum(x + params[f"conv{i}_b"], 0.0)
    feats = x.reshape(x.shape[0], -1)
    h = jnp.maximum(
        jnp.dot(feats, params["head1_w"],
                precision=jax.lax.Precision.HIGHEST) + params["head1_b"], 0.0)
    va = jnp.dot(h, params["head2_w"],
                 precision=jax.lax.Precision.HIGHEST) + params["head2_b"]
    v = va[:, 0:1]
    a = va[:, 1:1 + n_actions]
    return v + (a - a.mean(axis=1, keepdims=True))


# ----------------------------------------------------------------------------
if __name__ == "__main__":
    # Smallest spatial size the conv stack (8/4 -> 4/2 -> 3/1) accepts is 36.
    batch, input_channels, height, width, n_actions = 2, 4, 36, 36, 6

    key = jax.random.PRNGKey(0)
    pkey, xkey = jax.random.split(key)
    params = init_params(pkey, input_channels, height, width, n_actions)
    x = jax.random.normal(xkey, (batch, input_channels, height, width), jnp.float32)

    # use_bf16=False keeps f32 semantics; flip to True on any gen for a
    # memory-bandwidth win after validating tolerance.
    fwd = jax.jit(conv_qnet_forward, static_argnames=("n_actions", "use_bf16"))
    q_values = jax.block_until_ready(fwd(params, x, n_actions=n_actions))
    assert q_values.shape == (batch, n_actions)
    assert bool(jnp.all(jnp.isfinite(q_values)))

    # Cross-check the Pallas path against plain XLA with the same parameters.
    q_ref = jax.jit(_reference_forward, static_argnames=("n_actions",))(
        params, x, n_actions=n_actions)
    assert bool(jnp.allclose(q_values, q_ref, rtol=2e-2, atol=2e-2)), (
        float(jnp.max(jnp.abs(q_values - q_ref))))
    print("KERNEL_OK")
</pallas_src>

<mosaic_0001>
module attributes {stable_mosaic.version = 11 : i64} {
  func.func @_conv_row_kernel(%arg0: i32, %arg1: memref<2x288x32xf32, #tpu.memory_space<vmem>>, %arg2: memref<8x32x32xf32, #tpu.memory_space<vmem>>, %arg3: memref<1x32xf32, #tpu.memory_space<vmem>>, %arg4: memref<2x64x32xf32, #tpu.memory_space<vmem>>) attributes {dimension_semantics = [#tpu.dimension_semantics<parallel>], iteration_bounds = array<i64: 1>, scalar_prefetch = 0 : i64, scratch_operands = 0 : i64, tpu.core_type = #tpu.core_type<tc>, window_params = [{transform_indices = @transform_0, window_bounds = array<i64: 2, 288, 32>}, {pipeline_mode = #tpu.pipeline_mode<synchronous>, transform_indices = @transform_1, window_bounds = array<i64: 8, 32, 32>}, {pipeline_mode = #tpu.pipeline_mode<synchronous>, transform_indices = @transform_2, window_bounds = array<i64: 1, 32>}, {transform_indices = @transform_3, window_bounds = array<i64: 2, 64, 32>}]} {
    %c0 = arith.constant 0 : index
    %c0_0 = arith.constant 0 : index
    %0 = vector.load %arg3[%c0, %c0_0] : memref<1x32xf32, #tpu.memory_space<vmem>>, vector<1x32xf32>
    %cst = arith.constant 0.000000e+00 : f32
    %1 = vector.broadcast %cst : f32 to vector<64x32xf32>
    %c0_1 = arith.constant 0 : index
    %c0_2 = arith.constant 0 : index
    %c0_3 = arith.constant 0 : index
    %2 = vector.load %arg1[%c0_1, %c0_2, %c0_3] : memref<2x288x32xf32, #tpu.memory_space<vmem>>, vector<1x64x32xf32>
    %3 = vector.shape_cast %2 : vector<1x64x32xf32> to vector<64x32xf32>
    %c0_4 = arith.constant 0 : index
    %c0_5 = arith.constant 0 : index
    %c0_6 = arith.constant 0 : index
    %4 = vector.load %arg2[%c0_4, %c0_5, %c0_6] : memref<8x32x32xf32, #tpu.memory_space<vmem>>, vector<1x32x32xf32>
    %5 = vector.shape_cast %4 : vector<1x32x32xf32> to vector<32x32xf32>
    %cst_7 = arith.constant dense<0.000000e+00> : vector<64x32xf32>
    %6 = tpu.matmul %3, %5, %cst_7 {dimension_numbers = #tpu.dot_dimension_numbers<[1], [0], [0], [1], [0, 0, 1, 1], [], []>} : vector<64x32xf32>, vector<32x32xf32>, vector<64x32xf32> -> vector<64x32xf32>
    %7 = arith.addf %1, %6 : vector<64x32xf32>
    %c0_8 = arith.constant 0 : index
    %c72 = arith.constant 72 : index
    %c0_9 = arith.constant 0 : index
    %8 = vector.load %arg1[%c0_8, %c72, %c0_9] : memref<2x288x32xf32, #tpu.memory_space<vmem>>, vector<1x64x32xf32>
    %9 = vector.shape_cast %8 : vector<1x64x32xf32> to vector<64x32xf32>
    %c1 = arith.constant 1 : index
    %c0_10 = arith.constant 0 : index
    %c0_11 = arith.constant 0 : index
    %10 = vector.load %arg2[%c1, %c0_10, %c0_11] : memref<8x32x32xf32, #tpu.memory_space<vmem>>, vector<1x32x32xf32>
    %11 = vector.shape_cast %10 : vector<1x32x32xf32> to vector<32x32xf32>
    %cst_12 = arith.constant dense<0.000000e+00> : vector<64x32xf32>
    %12 = tpu.matmul %9, %11, %cst_12 {dimension_numbers = #tpu.dot_dimension_numbers<[1], [0], [0], [1], [0, 0, 1, 1], [], []>} : vector<64x32xf32>, vector<32x32xf32>, vector<64x32xf32> -> vector<64x32xf32>
    %13 = arith.addf %7, %12 : vector<64x32xf32>
    %c0_13 = arith.constant 0 : index
    %c144 = arith.constant 144 : index
    %c0_14 = arith.constant 0 : index
    %14 = vector.load %arg1[%c0_13, %c144, %c0_14] : memref<2x288x32xf32, #tpu.memory_space<vmem>>, vector<1x64x32xf32>
    %15 = vector.shape_cast %14 : vector<1x64x32xf32> to vector<64x32xf32>
    %c2 = arith.constant 2 : index
    %c0_15 = arith.constant 0 : index
    %c0_16 = arith.constant 0 : index
    %16 = vector.load %arg2[%c2, %c0_15, %c0_16] : memref<8x32x32xf32, #tpu.memory_space<vmem>>, vector<1x32x32xf32>
    %17 = vector.shape_cast %16 : vector<1x32x32xf32> to vector<32x32xf32>
    %cst_17 = arith.constant dense<0.000000e+00> : vector<64x32xf32>
    %18 = tpu.matmul %15, %17, %cst_17 {dimension_numbers = #tpu.dot_dimension_numbers<[1], [0], [0], [1], [0, 0, 1, 1], [], []>} : vector<64x32xf32>, vector<32x32xf32>, vector<64x32xf32> -> vector<64x32xf32>
    %19 = arith.addf %13, %18 : vector<64x32xf32>
    %c0_18 = arith.constant 0 : index
    %c216 = arith.constant 216 : index
    %c0_19 = arith.constant 0 : index
    %20 = vector.load %arg1[%c0_18, %c216, %c0_19] : memref<2x288x32xf32, #tpu.memory_space<vmem>>, vector<1x64x32xf32>
    %21 = vector.shape_cast %20 : vector<1x64x32xf32> to vector<64x32xf32>
    %c3 = arith.constant 3 : index
    %c0_20 = arith.constant 0 : index
    %c0_21 = arith.constant 0 : index
    %22 = vector.load %arg2[%c3, %c0_20, %c0_21] : memref<8x32x32xf32, #tpu.memory_space<vmem>>, vector<1x32x32xf32>
    %23 = vector.shape_cast %22 : vector<1x32x32xf32> to vector<32x32xf32>
    %cst_22 = arith.constant dense<0.000000e+00> : vector<64x32xf32>
    %24 = tpu.matmul %21, %23, %cst_22 {dimension_numbers = #tpu.dot_dimension_numbers<[1], [0], [0], [1], [0, 0, 1, 1], [], []>} : vector<64x32xf32>, vector<32x32xf32>, vector<64x32xf32> -> vector<64x32xf32>
    %25 = arith.addf %19, %24 : vector<64x32xf32>
    %c0_23 = arith.constant 0 : index
    %c8 = arith.constant 8 : index
    %c0_24 = arith.constant 0 : index
    %26 = vector.load %arg1[%c0_23, %c8, %c0_24] : memref<2x288x32xf32, #tpu.memory_space<vmem>>, vector<1x64x32xf32>
    %27 = vector.shape_cast %26 : vector<1x64x32xf32> to vector<64x32xf32>
    %c4 = arith.constant 4 : index
    %c0_25 = arith.constant 0 : index
    %c0_26 = arith.constant 0 : index
    %28 = vector.load %arg2[%c4, %c0_25, %c0_26] : memref<8x32x32xf32, #tpu.memory_space<vmem>>, vector<1x32x32xf32>
    %29 = vector.shape_cast %28 : vector<1x32x32xf32> to vector<32x32xf32>
    %cst_27 = arith.constant dense<0.000000e+00> : vector<64x32xf32>
    %30 = tpu.matmul %27, %29, %cst_27 {dimension_numbers = #tpu.dot_dimension_numbers<[1], [0], [0], [1], [0, 0, 1, 1], [], []>} : vector<64x32xf32>, vector<32x32xf32>, vector<64x32xf32> -> vector<64x32xf32>
    %31 = arith.addf %25, %30 : vector<64x32xf32>
    %c0_28 = arith.constant 0 : index
    %c80 = arith.constant 80 : index
    %c0_29 = arith.constant 0 : index
    %32 = vector.load %arg1[%c0_28, %c80, %c0_29] : memref<2x288x32xf32, #tpu.memory_space<vmem>>, vector<1x64x32xf32>
    %33 = vector.shape_cast %32 : vector<1x64x32xf32> to vector<64x32xf32>
    %c5 = arith.constant 5 : index
    %c0_30 = arith.constant 0 : index
    %c0_31 = arith.constant 0 : index
    %34 = vector.load %arg2[%c5, %c0_30, %c0_31] : memref<8x32x32xf32, #tpu.memory_space<vmem>>, vector<1x32x32xf32>
    %35 = vector.shape_cast %34 : vector<1x32x32xf32> to vector<32x32xf32>
    %cst_32 = arith.constant dense<0.000000e+00> : vector<64x32xf32>
    %36 = tpu.matmul %33, %35, %cst_32 {dimension_numbers = #tpu.dot_dimension_numbers<[1], [0], [0], [1], [0, 0, 1, 1], [], []>} : vector<64x32xf32>, vector<32x32xf32>, vector<64x32xf32> -> vector<64x32xf32>
    %37 = arith.addf %31, %36 : vector<64x32xf32>
    %c0_33 = arith.constant 0 : index
    %c152 = arith.constant 152 : index
    %c0_34 = arith.constant 0 : index
    %38 = vector.load %arg1[%c0_33, %c152, %c0_34] : memref<2x288x32xf32, #tpu.memory_space<vmem>>, vector<1x64x32xf32>
    %39 = vector.shape_cast %38 : vector<1x64x32xf32> to vector<64x32xf32>
    %c6 = arith.constant 6 : index
    %c0_35 = arith.constant 0 : index
    %c0_36 = arith.constant 0 : index
    %40 = vector.load %arg2[%c6, %c0_35, %c0_36] : memref<8x32x32xf32, #tpu.memory_space<vmem>>, vector<1x32x32xf32>
    %41 = vector.shape_cast %40 : vector<1x32x32xf32> to vector<32x32xf32>
    %cst_37 = arith.constant dense<0.000000e+00> : vector<64x32xf32>
    %42 = tpu.matmul %39, %41, %cst_37 {dimension_numbers = #tpu.dot_dimension_numbers<[1], [0], [0], [1], [0, 0, 1, 1], [], []>} : vector<64x32xf32>, vector<32x32xf32>, vector<64x32xf32> -> vector<64x32xf32>
    %43 = arith.addf %37, %42 : vector<64x32xf32>
    %c0_38 = arith.constant 0 : index
    %c224 = arith.constant 224 : index
    %c0_39 = arith.constant 0 : index
    %44 = vector.load %arg1[%c0_38, %c224, %c0_39] : memref<2x288x32xf32, #tpu.memory_space<vmem>>, vector<1x64x32xf32>
    %45 = vector.shape_cast %44 : vector<1x64x32xf32> to vector<64x32xf32>
    %c7 = arith.constant 7 : index
    %c0_40 = arith.constant 0 : index
    %c0_41 = arith.constant 0 : index
    %46 = vector.load %arg2[%c7, %c0_40, %c0_41] : memref<8x32x32xf32, #tpu.memory_space<vmem>>, vector<1x32x32xf32>
    %47 = vector.shape_cast %46 : vector<1x32x32xf32> to vector<32x32xf32>
    %cst_42 = arith.constant dense<0.000000e+00> : vector<64x32xf32>
    %48 = tpu.matmul %45, %47, %cst_42 {dimension_numbers = #tpu.dot_dimension_numbers<[1], [0], [0], [1], [0, 0, 1, 1], [], []>} : vector<64x32xf32>, vector<32x32xf32>, vector<64x32xf32> -> vector<64x32xf32>
    %49 = arith.addf %43, %48 : vector<64x32xf32>
    %50 = vector.broadcast %0 : vector<1x32xf32> to vector<64x32xf32>
    %51 = arith.addf %49, %50 : vector<64x32xf32>
    %cst_43 = arith.constant 0.000000e+00 : f32
    %52 = vector.broadcast %cst_43 : f32 to vector<64x32xf32>
    %53 = arith.maximumf %51, %52 : vector<64x32xf32>
    %c0_44 = arith.constant 0 : index
    %c0_45 = arith.constant 0 : index
    %c0_46 = arith.constant 0 : index
    %54 = vector.load %arg4[%c0_44, %c0_45, %c0_46] : memref<2x64x32xf32, #tpu.memory_space<vmem>>, vector<1x64x32xf32>
    %55 = vector.shape_cast %54 : vector<1x64x32xf32> to vector<64x32xf32>
    %56 = vector.shape_cast %53 : vector<64x32xf32> to vector<1x64x32xf32>
    tpu.vector_store %arg4[%c0_44, %c0_45, %c0_46], %56 {strides = array<i32>} : memref<2x64x32xf32, #tpu.memory_space<vmem>>, vector<1x64x32xf32>,
    %cst_47 = arith.constant 0.000000e+00 : f32
    %57 = vector.broadcast %cst_47 : f32 to vector<64x32xf32>
    %c1_48 = arith.constant 1 : index
    %c0_49 = arith.constant 0 : index
    %c0_50 = arith.constant 0 : index
    %58 = vector.load %arg1[%c1_48, %c0_49, %c0_50] : memref<2x288x32xf32, #tpu.memory_space<vmem>>, vector<1x64x32xf32>
    %59 = vector.shape_cast %58 : vector<1x64x32xf32> to vector<64x32xf32>
    %c0_51 = arith.constant 0 : index
    %c0_52 = arith.constant 0 : index
    %c0_53 = arith.constant 0 : index
    %60 = vector.load %arg2[%c0_51, %c0_52, %c0_53] : memref<8x32x32xf32, #tpu.memory_space<vmem>>, vector<1x32x32xf32>
    %61 = vector.shape_cast %60 : vector<1x32x32xf32> to vector<32x32xf32>
    %cst_54 = arith.constant dense<0.000000e+00> : vector<64x32xf32>
    %62 = tpu.matmul %59, %61, %cst_54 {dimension_numbers = #tpu.dot_dimension_numbers<[1], [0], [0], [1], [0, 0, 1, 1], [], []>} : vector<64x32xf32>, vector<32x32xf32>, vector<64x32xf32> -> vector<64x32xf32>
    %63 = arith.addf %57, %62 : vector<64x32xf32>
    %c1_55 = arith.constant 1 : index
    %c72_56 = arith.constant 72 : index
    %c0_57 = arith.constant 0 : index
    %64 = vector.load %arg1[%c1_55, %c72_56, %c0_57] : memref<2x288x32xf32, #tpu.memory_space<vmem>>, vector<1x64x32xf32>
    %65 = vector.shape_cast %64 : vector<1x64x32xf32> to vector<64x32xf32>
    %c1_58 = arith.constant 1 : index
    %c0_59 = arith.constant 0 : index
    %c0_60 = arith.constant 0 : index
    %66 = vector.load %arg2[%c1_58, %c0_59, %c0_60] : memref<8x32x32xf32, #tpu.memory_space<vmem>>, vector<1x32x32xf32>
    %67 = vector.shape_cast %66 : vector<1x32x32xf32> to vector<32x32xf32>
    %cst_61 = arith.constant dense<0.000000e+00> : vector<64x32xf32>
    %68 = tpu.matmul %65, %67, %cst_61 {dimension_numbers = #tpu.dot_dimension_numbers<[1], [0], [0], [1], [0, 0, 1, 1], [], []>} : vector<64x32xf32>, vector<32x32xf32>, vector<64x32xf32> -> vector<64x32xf32>
    %69 = arith.addf %63, %68 : vector<64x32xf32>
    %c1_62 = arith.constant 1 : index
    %c144_63 = arith.constant 144 : index
    %c0_64 = arith.constant 0 : index
    %70 = vector.load %arg1[%c1_62, %c144_63, %c0_64] : memref<2x288x32xf32, #tpu.memory_space<vmem>>, vector<1x64x32xf32>
    %71 = vector.shape_cast %70 : vector<1x64x32xf32> to vector<64x32xf32>
    %c2_65 = arith.constant 2 : index
    %c0_66 = arith.constant 0 : index
    %c0_67 = arith.constant 0 : index
    %72 = vector.load %arg2[%c2_65, %c0_66, %c0_67] : memref<8x32x32xf32, #tpu.memory_space<vmem>>, vector<1x32x32xf32>
    %73 = vector.shape_cast %72 : vector<1x32x32xf32> to vector<32x32xf32>
    %cst_68 = arith.constant dense<0.000000e+00> : vector<64x32xf32>
    %74 = tpu.matmul %71, %73, %cst_68 {dimension_numbers = #tpu.dot_dimension_numbers<[1], [0], [0], [1], [0, 0, 1, 1], [], []>} : vector<64x32xf32>, vector<32x32xf32>, vector<64x32xf32> -> vector<64x32xf32>
    %75 = arith.addf %69, %74 : vector<64x32xf32>
    %c1_69 = arith.constant 1 : index
    %c216_70 = arith.constant 216 : index
    %c0_71 = arith.constant 0 : index
    %76 = vector.load %arg1[%c1_69, %c216_70, %c0_71] : memref<2x288x32xf32, #tpu.memory_space<vmem>>, vector<1x64x32xf32>
    %77 = vector.shape_cast %76 : vector<1x64x32xf32> to vector<64x32xf32>
    %c3_72 = arith.constant 3 : index
    %c0_73 = arith.constant 0 : index
    %c0_74 = arith.constant 0 : index
    %78 = vector.load %arg2[%c3_72, %c0_73, %c0_74] : memref<8x32x32xf32, #tpu.memory_space<vmem>>, vector<1x32x32xf32>
    %79 = vector.shape_cast %78 : vector<1x32x32xf32> to vector<32x32xf32>
    %cst_75 = arith.constant dense<0.000000e+00> : vector<64x32xf32>
    %80 = tpu.matmul %77, %79, %cst_75 {dimension_numbers = #tpu.dot_dimension_numbers<[1], [0], [0], [1], [0, 0, 1, 1], [], []>} : vector<64x32xf32>, vector<32x32xf32>, vector<64x32xf32> -> vector<64x32xf32>
    %81 = arith.addf %75, %80 : vector<64x32xf32>
    %c1_76 = arith.constant 1 : index
    %c8_77 = arith.constant 8 : index
    %c0_78 = arith.constant 0 : index
    %82 = vector.load %arg1[%c1_76, %c8_77, %c0_78] : memref<2x288x32xf32, #tpu.memory_space<vmem>>, vector<1x64x32xf32>
    %83 = vector.shape_cast %82 : vector<1x64x32xf32> to vector<64x32xf32>
    %c4_79 = arith.constant 4 : index
    %c0_80 = arith.constant 0 : index
    %c0_81 = arith.constant 0 : index
    %84 = vector.load %arg2[%c4_79, %c0_80, %c0_81] : memref<8x32x32xf32, #tpu.memory_space<vmem>>, vector<1x32x32xf32>
    %85 = vector.shape_cast %84 : vector<1x32x32xf32> to vector<32x32xf32>
    %cst_82 = arith.constant dense<0.000000e+00> : vector<64x32xf32>
    %86 = tpu.matmul %83, %85, %cst_82 {dimension_numbers = #tpu.dot_dimension_numbers<[1], [0], [0], [1], [0, 0, 1, 1], [], []>} : vector<64x32xf32>, vector<32x32xf32>, vector<64x32xf32> -> vector<64x32xf32>
    %87 = arith.addf %81, %86 : vector<64x32xf32>
    %c1_83 = arith.constant 1 : index
    %c80_84 = arith.constant 80 : index
    %c0_85 = arith.constant 0 : index
    %88 = vector.load %arg1[%c1_83, %c80_84, %c0_85] : memref<2x288x32xf32, #tpu.memory_space<vmem>>, vector<1x64x32xf32>
    %89 = vector.shape_cast %88 : vector<1x64x32xf32> to vector<64x32xf32>
    %c5_86 = arith.constant 5 : index
    %c0_87 = arith.constant 0 : index
    %c0_88 = arith.constant 0 : index
    %90 = vector.load %arg2[%c5_86, %c0_87, %c0_88] : memref<8x32x32xf32, #tpu.memory_space<vmem>>, vector<1x32x32xf32>
    %91 = vector.shape_cast %90 : vector<1x32x32xf32> to vector<32x32xf32>
    %cst_89 = arith.constant dense<0.000000e+00> : vector<64x32xf32>
    %92 = tpu.matmul %89, %91, %cst_89 {dimension_numbers = #tpu.dot_dimension_numbers<[1], [0], [0], [1], [0, 0, 1, 1], [], []>} : vector<64x32xf32>, vector<32x32xf32>, vector<64x32xf32> -> vector<64x32xf32>
    %93 = arith.addf %87, %92 : vector<64x32xf32>
    %c1_90 = arith.constant 1 : index
    %c152_91 = arith.constant 152 : index
    %c0_92 = arith.constant 0 : index
    %94 = vector.load %arg1[%c1_90, %c152_91, %c0_92] : memref<2x288x32xf32, #tpu.memory_space<vmem>>, vector<1x64x32xf32>
    %95 = vector.shape_cast %94 : vector<1x64x32xf32> to vector<64x32xf32>
    %c6_93 = arith.constant 6 : index
    %c0_94 = arith.constant 0 : index
    %c0_95 = arith.constant 0 : index
    %96 = vector.load %arg2[%c6_93, %c0_94, %c0_95] : memref<8x32x32xf32, #tpu.memory_space<vmem>>, vector<1x32x32xf32>
    %97 = vector.shape_cast %96 : vector<1x32x32xf32> to vector<32x32xf32>
    %cst_96 = arith.constant dense<0.000000e+00> : vector<64x32xf32>
    %98 = tpu.matmul %95, %97, %cst_96 {dimension_numbers = #tpu.dot_dimension_numbers<[1], [0], [0], [1], [0, 0, 1, 1], [], []>} : vector<64x32xf32>, vector<32x32xf32>, vector<64x32xf32> -> vector<64x32xf32>
    %99 = arith.addf %93, %98 : vector<64x32xf32>
    %c1_97 = arith.constant 1 : index
    %c224_98 = arith.constant 224 : index
    %c0_99 = arith.constant 0 : index
    %100 = vector.load %arg1[%c1_97, %c224_98, %c0_99] : memref<2x288x32xf32, #tpu.memory_space<vmem>>, vector<1x64x32xf32>
    %101 = vector.shape_cast %100 : vector<1x64x32xf32> to vector<64x32xf32>
    %c7_100 = arith.constant 7 : index
    %c0_101 = arith.constant 0 : index
    %c0_102 = arith.constant 0 : index
    %102 = vector.load %arg2[%c7_100, %c0_101, %c0_102] : memref<8x32x32xf32, #tpu.memory_space<vmem>>, vector<1x32x32xf32>
    %103 = vector.shape_cast %102 : vector<1x32x32xf32> to vector<32x32xf32>
    %cst_103 = arith.constant dense<0.000000e+00> : vector<64x32xf32>
    %104 = tpu.matmul %101, %103, %cst_103 {dimension_numbers = #tpu.dot_dimension_numbers<[1], [0], [0], [1], [0, 0, 1, 1], [], []>} : vector<64x32xf32>, vector<32x32xf32>, vector<64x32xf32> -> vector<64x32xf32>
    %105 = arith.addf %99, %104 : vector<64x32xf32>
    %106 = vector.broadcast %0 : vector<1x32xf32> to vector<64x32xf32>
    %107 = arith.addf %105, %106 : vector<64x32xf32>
    %cst_104 = arith.constant 0.000000e+00 : f32
    %108 = vector.broadcast %cst_104 : f32 to vector<64x32xf32>
    %109 = arith.maximumf %107, %108 : vector<64x32xf32>
    %c1_105 = arith.constant 1 : index
    %c0_106 = arith.constant 0 : index
    %c0_107 = arith.constant 0 : index
    %110 = vector.load %arg4[%c1_105, %c0_106, %c0_107] : memref<2x64x32xf32, #tpu.memory_space<vmem>>, vector<1x64x32xf32>
    %111 = vector.shape_cast %110 : vector<1x64x32xf32> to vector<64x32xf32>
    %112 = vector.shape_cast %109 : vector<64x32xf32> to vector<1x64x32xf32>
    tpu.vector_store %arg4[%c1_105, %c0_106, %c0_107], %112 {strides = array<i32>} : memref<2x64x32xf32, #tpu.memory_space<vmem>>, vector<1x64x32xf32>,
    return
  }
  func.func @transform_0(%arg0: i32) -> (i32, i32, i32) {
    %c0_i32 = arith.constant 0 : i32
    %c0_i32_0 = arith.constant 0 : i32
    %c0_i32_1 = arith.constant 0 : i32
    return %arg0, %c0_i32, %c0_i32_0 : i32, i32, i32
  }
  func.func @transform_1(%arg0: i32) -> (i32, i32, i32) {
    %c0_i32 = arith.constant 0 : i32
    %c0_i32_0 = arith.constant 0 : i32
    %c0_i32_1 = arith.constant 0 : i32
    %c0_i32_2 = arith.constant 0 : i32
    return %c0_i32, %c0_i32_0, %c0_i32_1 : i32, i32, i32
  }
  func.func @transform_2(%arg0: i32) -> (i32, i32) {
    %c0_i32 = arith.constant 0 : i32
    %c0_i32_0 = arith.constant 0 : i32
    %c0_i32_1 = arith.constant 0 : i32
    return %c0_i32, %c0_i32_0 : i32, i32
  }
  func.func @transform_3(%arg0: i32) -> (i32, i32, i32) {
    %c0_i32 = arith.constant 0 : i32
    %c0_i32_0 = arith.constant 0 : i32
    %c0_i32_1 = arith.constant 0 : i32
    return %arg0, %c0_i32, %c0_i32_0 : i32, i32, i32
  }
}

module attributes {stable_mosaic.version = 11 : i64} {
  func.func @_conv_row_kernel(%arg0: i32, %arg1: memref<2x24x128xf32, #tpu.memory_space<vmem>>, %arg2: memref<4x128x64xf32, #tpu.memory_space<vmem>>, %arg3: memref<1x64xf32, #tpu.memory_space<vmem>>, %arg4: memref<2x9x64xf32, #tpu.memory_space<vmem>>) attributes {dimension_semantics = [#tpu.dimension_semantics<parallel>], iteration_bounds = array<i64: 1>, scalar_prefetch = 0 : i64, scratch_operands = 0 : i64, tpu.core_type = #tpu.core_type<tc>, window_params = [{transform_indices = @transform_0, window_bounds = array<i64: 2, 24, 128>}, {pipeline_mode = #tpu.pipeline_mode<synchronous>, transform_indices = @transform_1, window_bounds = array<i64: 4, 128, 64>}, {pipeline_mode = #tpu.pipeline_mode<synchronous>, transform_indices = @transform_2, window_bounds = array<i64: 1, 64>}, {transform_indices = @transform_3, window_bounds = array<i64: 2, 9, 64>}]} {
    %c0 = arith.constant 0 : index
    %c0_0 = arith.constant 0 : index
    %0 = vector.load %arg3[%c0, %c0_0] : memref<1x64xf32, #tpu.memory_space<vmem>>, vector<1x64xf32>
    %cst = arith.constant 0.000000e+00 : f32
    %1 = vector.broadcast %cst : f32 to vector<9x64xf32>
    %c0_1 = arith.constant 0 : index
    %c0_2 = arith.constant 0 : index
    %c0_3 = arith.constant 0 : index
    %2 = vector.load %arg1[%c0_1, %c0_2, %c0_3] : memref<2x24x128xf32, #tpu.memory_space<vmem>>, vector<1x9x128xf32>
    %3 = vector.shape_cast %2 : vector<1x9x128xf32> to vector<9x128xf32>
    %c0_4 = arith.constant 0 : index
    %c0_5 = arith.constant 0 : index
    %c0_6 = arith.constant 0 : index
    %4 = vector.load %arg2[%c0_4, %c0_5, %c0_6] : memref<4x128x64xf32, #tpu.memory_space<vmem>>, vector<1x128x64xf32>
    %5 = vector.shape_cast %4 : vector<1x128x64xf32> to vector<128x64xf32>
    %cst_7 = arith.constant dense<0.000000e+00> : vector<9x64xf32>
    %6 = tpu.matmul %3, %5, %cst_7 {dimension_numbers = #tpu.dot_dimension_numbers<[1], [0], [0], [1], [0, 0, 1, 1], [], []>} : vector<9x128xf32>, vector<128x64xf32>, vector<9x64xf32> -> vector<9x64xf32>
    %7 = arith.addf %1, %6 : vector<9x64xf32>
    %c0_8 = arith.constant 0 : index
    %c12 = arith.constant 12 : index
    %c0_9 = arith.constant 0 : index
    %8 = vector.load %arg1[%c0_8, %c12, %c0_9] : memref<2x24x128xf32, #tpu.memory_space<vmem>>, vector<1x9x128xf32>
    %9 = vector.shape_cast %8 : vector<1x9x128xf32> to vector<9x128xf32>
    %c1 = arith.constant 1 : index
    %c0_10 = arith.constant 0 : index
    %c0_11 = arith.constant 0 : index
    %10 = vector.load %arg2[%c1, %c0_10, %c0_11] : memref<4x128x64xf32, #tpu.memory_space<vmem>>, vector<1x128x64xf32>
    %11 = vector.shape_cast %10 : vector<1x128x64xf32> to vector<128x64xf32>
    %cst_12 = arith.constant dense<0.000000e+00> : vector<9x64xf32>
    %12 = tpu.matmul %9, %11, %cst_12 {dimension_numbers = #tpu.dot_dimension_numbers<[1], [0], [0], [1], [0, 0, 1, 1], [], []>} : vector<9x128xf32>, vector<128x64xf32>, vector<9x64xf32> -> vector<9x64xf32>
    %13 = arith.addf %7, %12 : vector<9x64xf32>
    %c0_13 = arith.constant 0 : index
    %c3 = arith.constant 3 : index
    %c0_14 = arith.constant 0 : index
    %14 = vector.load %arg1[%c0_13, %c3, %c0_14] : memref<2x24x128xf32, #tpu.memory_space<vmem>>, vector<1x9x128xf32>
    %15 = vector.shape_cast %14 : vector<1x9x128xf32> to vector<9x128xf32>
    %c2 = arith.constant 2 : index
    %c0_15 = arith.constant 0 : index
    %c0_16 = arith.constant 0 : index
    %16 = vector.load %arg2[%c2, %c0_15, %c0_16] : memref<4x128x64xf32, #tpu.memory_space<vmem>>, vector<1x128x64xf32>
    %17 = vector.shape_cast %16 : vector<1x128x64xf32> to vector<128x64xf32>
    %cst_17 = arith.constant dense<0.000000e+00> : vector<9x64xf32>
    %18 = tpu.matmul %15, %17, %cst_17 {dimension_numbers = #tpu.dot_dimension_numbers<[1], [0], [0], [1], [0, 0, 1, 1], [], []>} : vector<9x128xf32>, vector<128x64xf32>, vector<9x64xf32> -> vector<9x64xf32>
    %19 = arith.addf %13, %18 : vector<9x64xf32>
    %c0_18 = arith.constant 0 : index
    %c15 = arith.constant 15 : index
    %c0_19 = arith.constant 0 : index
    %20 = vector.load %arg1[%c0_18, %c15, %c0_19] : memref<2x24x128xf32, #tpu.memory_space<vmem>>, vector<1x9x128xf32>
    %21 = vector.shape_cast %20 : vector<1x9x128xf32> to vector<9x128xf32>
    %c3_20 = arith.constant 3 : index
    %c0_21 = arith.constant 0 : index
    %c0_22 = arith.constant 0 : index
    %22 = vector.load %arg2[%c3_20, %c0_21, %c0_22] : memref<4x128x64xf32, #tpu.memory_space<vmem>>, vector<1x128x64xf32>
    %23 = vector.shape_cast %22 : vector<1x128x64xf32> to vector<128x64xf32>
    %cst_23 = arith.constant dense<0.000000e+00> : vector<9x64xf32>
    %24 = tpu.matmul %21, %23, %cst_23 {dimension_numbers = #tpu.dot_dimension_numbers<[1], [0], [0], [1], [0, 0, 1, 1], [], []>} : vector<9x128xf32>, vector<128x64xf32>, vector<9x64xf32> -> vector<9x64xf32>
    %25 = arith.addf %19, %24 : vector<9x64xf32>
    %26 = vector.broadcast %0 : vector<1x64xf32> to vector<9x64xf32>
    %27 = arith.addf %25, %26 : vector<9x64xf32>
    %cst_24 = arith.constant 0.000000e+00 : f32
    %28 = vector.broadcast %cst_24 : f32 to vector<9x64xf32>
    %29 = arith.maximumf %27, %28 : vector<9x64xf32>
    %c0_25 = arith.constant 0 : index
    %c0_26 = arith.constant 0 : index
    %c0_27 = arith.constant 0 : index
    %30 = vector.load %arg4[%c0_25, %c0_26, %c0_27] : memref<2x9x64xf32, #tpu.memory_space<vmem>>, vector<1x9x64xf32>
    %31 = vector.shape_cast %30 : vector<1x9x64xf32> to vector<9x64xf32>
    %32 = vector.shape_cast %29 : vector<9x64xf32> to vector<1x9x64xf32>
    tpu.vector_store %arg4[%c0_25, %c0_26, %c0_27], %32 {strides = array<i32>} : memref<2x9x64xf32, #tpu.memory_space<vmem>>, vector<1x9x64xf32>,
    %cst_28 = arith.constant 0.000000e+00 : f32
    %33 = vector.broadcast %cst_28 : f32 to vector<9x64xf32>
    %c1_29 = arith.constant 1 : index
    %c0_30 = arith.constant 0 : index
    %c0_31 = arith.constant 0 : index
    %34 = vector.load %arg1[%c1_29, %c0_30, %c0_31] : memref<2x24x128xf32, #tpu.memory_space<vmem>>, vector<1x9x128xf32>
    %35 = vector.shape_cast %34 : vector<1x9x128xf32> to vector<9x128xf32>
    %c0_32 = arith.constant 0 : index
    %c0_33 = arith.constant 0 : index
    %c0_34 = arith.constant 0 : index
    %36 = vector.load %arg2[%c0_32, %c0_33, %c0_34] : memref<4x128x64xf32, #tpu.memory_space<vmem>>, vector<1x128x64xf32>
    %37 = vector.shape_cast %36 : vector<1x128x64xf32> to vector<128x64xf32>
    %cst_35 = arith.constant dense<0.000000e+00> : vector<9x64xf32>
    %38 = tpu.matmul %35, %37, %cst_35 {dimension_numbers = #tpu.dot_dimension_numbers<[1], [0], [0], [1], [0, 0, 1, 1], [], []>} : vector<9x128xf32>, vector<128x64xf32>, vector<9x64xf32> -> vector<9x64xf32>
    %39 = arith.addf %33, %38 : vector<9x64xf32>
    %c1_36 = arith.constant 1 : index
    %c12_37 = arith.constant 12 : index
    %c0_38 = arith.constant 0 : index
    %40 = vector.load %arg1[%c1_36, %c12_37, %c0_38] : memref<2x24x128xf32, #tpu.memory_space<vmem>>, vector<1x9x128xf32>
    %41 = vector.shape_cast %40 : vector<1x9x128xf32> to vector<9x128xf32>
    %c1_39 = arith.constant 1 : index
    %c0_40 = arith.constant 0 : index
    %c0_41 = arith.constant 0 : index
    %42 = vector.load %arg2[%c1_39, %c0_40, %c0_41] : memref<4x128x64xf32, #tpu.memory_space<vmem>>, vector<1x128x64xf32>
    %43 = vector.shape_cast %42 : vector<1x128x64xf32> to vector<128x64xf32>
    %cst_42 = arith.constant dense<0.000000e+00> : vector<9x64xf32>
    %44 = tpu.matmul %41, %43, %cst_42 {dimension_numbers = #tpu.dot_dimension_numbers<[1], [0], [0], [1], [0, 0, 1, 1], [], []>} : vector<9x128xf32>, vector<128x64xf32>, vector<9x64xf32> -> vector<9x64xf32>
    %45 = arith.addf %39, %44 : vector<9x64xf32>
    %c1_43 = arith.constant 1 : index
    %c3_44 = arith.constant 3 : index
    %c0_45 = arith.constant 0 : index
    %46 = vector.load %arg1[%c1_43, %c3_44, %c0_45] : memref<2x24x128xf32, #tpu.memory_space<vmem>>, vector<1x9x128xf32>
    %47 = vector.shape_cast %46 : vector<1x9x128xf32> to vector<9x128xf32>
    %c2_46 = arith.constant 2 : index
    %c0_47 = arith.constant 0 : index
    %c0_48 = arith.constant 0 : index
    %48 = vector.load %arg2[%c2_46, %c0_47, %c0_48] : memref<4x128x64xf32, #tpu.memory_space<vmem>>, vector<1x128x64xf32>
    %49 = vector.shape_cast %48 : vector<1x128x64xf32> to vector<128x64xf32>
    %cst_49 = arith.constant dense<0.000000e+00> : vector<9x64xf32>
    %50 = tpu.matmul %47, %49, %cst_49 {dimension_numbers = #tpu.dot_dimension_numbers<[1], [0], [0], [1], [0, 0, 1, 1], [], []>} : vector<9x128xf32>, vector<128x64xf32>, vector<9x64xf32> -> vector<9x64xf32>
    %51 = arith.addf %45, %50 : vector<9x64xf32>
    %c1_50 = arith.constant 1 : index
    %c15_51 = arith.constant 15 : index
    %c0_52 = arith.constant 0 : index
    %52 = vector.load %arg1[%c1_50, %c15_51, %c0_52] : memref<2x24x128xf32, #tpu.memory_space<vmem>>, vector<1x9x128xf32>
    %53 = vector.shape_cast %52 : vector<1x9x128xf32> to vector<9x128xf32>
    %c3_53 = arith.constant 3 : index
    %c0_54 = arith.constant 0 : index
    %c0_55 = arith.constant 0 : index
    %54 = vector.load %arg2[%c3_53, %c0_54, %c0_55] : memref<4x128x64xf32, #tpu.memory_space<vmem>>, vector<1x128x64xf32>
    %55 = vector.shape_cast %54 : vector<1x128x64xf32> to vector<128x64xf32>
    %cst_56 = arith.constant dense<0.000000e+00> : vector<9x64xf32>
    %56 = tpu.matmul %53, %55, %cst_56 {dimension_numbers = #tpu.dot_dimension_numbers<[1], [0], [0], [1], [0, 0, 1, 1], [], []>} : vector<9x128xf32>, vector<128x64xf32>, vector<9x64xf32> -> vector<9x64xf32>
    %57 = arith.addf %51, %56 : vector<9x64xf32>
    %58 = vector.broadcast %0 : vector<1x64xf32> to vector<9x64xf32>
    %59 = arith.addf %57, %58 : vector<9x64xf32>
    %cst_57 = arith.constant 0.000000e+00 : f32
    %60 = vector.broadcast %cst_57 : f32 to vector<9x64xf32>
    %61 = arith.maximumf %59, %60 : vector<9x64xf32>
    %c1_58 = arith.constant 1 : index
    %c0_59 = arith.constant 0 : index
    %c0_60 = arith.constant 0 : index
    %62 = vector.load %arg4[%c1_58, %c0_59, %c0_60] : memref<2x9x64xf32, #tpu.memory_space<vmem>>, vector<1x9x64xf32>
    %63 = vector.shape_cast %62 : vector<1x9x64xf32> to vector<9x64xf32>
    %64 = vector.shape_cast %61 : vector<9x64xf32> to vector<1x9x64xf32>
    tpu.vector_store %arg4[%c1_58, %c0_59, %c0_60], %64 {strides = array<i32>} : memref<2x9x64xf32, #tpu.memory_space<vmem>>, vector<1x9x64xf32>,
    return
  }
  func.func @transform_0(%arg0: i32) -> (i32, i32, i32) {
    %c0_i32 = arith.constant 0 : i32
    %c0_i32_0 = arith.constant 0 : i32
    %c0_i32_1 = arith.constant 0 : i32
    return %arg0, %c0_i32, %c0_i32_0 : i32, i32, i32
  }
  func.func @transform_1(%arg0: i32) -> (i32, i32, i32) {
    %c0_i32 = arith.constant 0 : i32
    %c0_i32_0 = arith.constant 0 : i32
    %c0_i32_1 = arith.constant 0 : i32
    %c0_i32_2 = arith.constant 0 : i32
    return %c0_i32, %c0_i32_0, %c0_i32_1 : i32, i32, i32
  }
  func.func @transform_2(%arg0: i32) -> (i32, i32) {
    %c0_i32 = arith.constant 0 : i32
    %c0_i32_0 = arith.constant 0 : i32
    %c0_i32_1 = arith.constant 0 : i32
    return %c0_i32, %c0_i32_0 : i32, i32
  }
  func.func @transform_3(%arg0: i32) -> (i32, i32, i32) {
    %c0_i32 = arith.constant 0 : i32
    %c0_i32_0 = arith.constant 0 : i32
    %c0_i32_1 = arith.constant 0 : i32
    return %arg0, %c0_i32, %c0_i32_0 : i32, i32, i32
  }
}

module attributes {stable_mosaic.version = 11 : i64} {
  func.func @_conv_row_kernel(%arg0: i32, %arg1: memref<2x3x192xf32, #tpu.memory_space<vmem>>, %arg2: memref<3x192x64xf32, #tpu.memory_space<vmem>>, %arg3: memref<1x64xf32, #tpu.memory_space<vmem>>, %arg4: memref<2x1x64xf32, #tpu.memory_space<vmem>>) attributes {dimension_semantics = [#tpu.dimension_semantics<parallel>], iteration_bounds = array<i64: 1>, scalar_prefetch = 0 : i64, scratch_operands = 0 : i64, tpu.core_type = #tpu.core_type<tc>, window_params = [{transform_indices = @transform_0, window_bounds = array<i64: 2, 3, 192>}, {pipeline_mode = #tpu.pipeline_mode<synchronous>, transform_indices = @transform_1, window_bounds = array<i64: 3, 192, 64>}, {pipeline_mode = #tpu.pipeline_mode<synchronous>, transform_indices = @transform_2, window_bounds = array<i64: 1, 64>}, {transform_indices = @transform_3, window_bounds = array<i64: 2, 1, 64>}]} {
    %c0 = arith.constant 0 : index
    %c0_0 = arith.constant 0 : index
    %0 = vector.load %arg3[%c0, %c0_0] : memref<1x64xf32, #tpu.memory_space<vmem>>, vector<1x64xf32>
    %cst = arith.constant 0.000000e+00 : f32
    %1 = vector.broadcast %cst : f32 to vector<1x64xf32>
    %c0_1 = arith.constant 0 : index
    %c0_2 = arith.constant 0 : index
    %c0_3 = arith.constant 0 : index
    %2 = vector.load %arg1[%c0_1, %c0_2, %c0_3] : memref<2x3x192xf32, #tpu.memory_space<vmem>>, vector<1x1x192xf32>
    %3 = vector.shape_cast %2 : vector<1x1x192xf32> to vector<1x192xf32>
    %c0_4 = arith.constant 0 : index
    %c0_5 = arith.constant 0 : index
    %c0_6 = arith.constant 0 : index
    %4 = vector.load %arg2[%c0_4, %c0_5, %c0_6] : memref<3x192x64xf32, #tpu.memory_space<vmem>>, vector<1x192x64xf32>
    %5 = vector.shape_cast %4 : vector<1x192x64xf32> to vector<192x64xf32>
    %cst_7 = arith.constant dense<0.000000e+00> : vector<1x64xf32>
    %6 = tpu.matmul %3, %5, %cst_7 {dimension_numbers = #tpu.dot_dimension_numbers<[1], [0], [0], [1], [0, 0, 1, 1], [], []>} : vector<1x192xf32>, vector<192x64xf32>, vector<1x64xf32> -> vector<1x64xf32>
    %7 = arith.addf %1, %6 : vector<1x64xf32>
    %c0_8 = arith.constant 0 : index
    %c1 = arith.constant 1 : index
    %c0_9 = arith.constant 0 : index
    %8 = vector.load %arg1[%c0_8, %c1, %c0_9] : memref<2x3x192xf32, #tpu.memory_space<vmem>>, vector<1x1x192xf32>
    %9 = vector.shape_cast %8 : vector<1x1x192xf32> to vector<1x192xf32>
    %c1_10 = arith.constant 1 : index
    %c0_11 = arith.constant 0 : index
    %c0_12 = arith.constant 0 : index
    %10 = vector.load %arg2[%c1_10, %c0_11, %c0_12] : memref<3x192x64xf32, #tpu.memory_space<vmem>>, vector<1x192x64xf32>
    %11 = vector.shape_cast %10 : vector<1x192x64xf32> to vector<192x64xf32>
    %cst_13 = arith.constant dense<0.000000e+00> : vector<1x64xf32>
    %12 = tpu.matmul %9, %11, %cst_13 {dimension_numbers = #tpu.dot_dimension_numbers<[1], [0], [0], [1], [0, 0, 1, 1], [], []>} : vector<1x192xf32>, vector<192x64xf32>, vector<1x64xf32> -> vector<1x64xf32>
    %13 = arith.addf %7, %12 : vector<1x64xf32>
    %c0_14 = arith.constant 0 : index
    %c2 = arith.constant 2 : index
    %c0_15 = arith.constant 0 : index
    %14 = vector.load %arg1[%c0_14, %c2, %c0_15] : memref<2x3x192xf32, #tpu.memory_space<vmem>>, vector<1x1x192xf32>
    %15 = vector.shape_cast %14 : vector<1x1x192xf32> to vector<1x192xf32>
    %c2_16 = arith.constant 2 : index
    %c0_17 = arith.constant 0 : index
    %c0_18 = arith.constant 0 : index
    %16 = vector.load %arg2[%c2_16, %c0_17, %c0_18] : memref<3x192x64xf32, #tpu.memory_space<vmem>>, vector<1x192x64xf32>
    %17 = vector.shape_cast %16 : vector<1x192x64xf32> to vector<192x64xf32>
    %cst_19 = arith.constant dense<0.000000e+00> : vector<1x64xf32>
    %18 = tpu.matmul %15, %17, %cst_19 {dimension_numbers = #tpu.dot_dimension_numbers<[1], [0], [0], [1], [0, 0, 1, 1], [], []>} : vector<1x192xf32>, vector<192x64xf32>, vector<1x64xf32> -> vector<1x64xf32>
    %19 = arith.addf %13, %18 : vector<1x64xf32>
    %20 = arith.addf %19, %0 : vector<1x64xf32>
    %cst_20 = arith.constant 0.000000e+00 : f32
    %21 = vector.broadcast %cst_20 : f32 to vector<1x64xf32>
    %22 = arith.maximumf %20, %21 : vector<1x64xf32>
    %c0_21 = arith.constant 0 : index
    %c0_22 = arith.constant 0 : index
    %c0_23 = arith.constant 0 : index
    %23 = vector.load %arg4[%c0_21, %c0_22, %c0_23] : memref<2x1x64xf32, #tpu.memory_space<vmem>>, vector<1x1x64xf32>
    %24 = vector.shape_cast %23 : vector<1x1x64xf32> to vector<1x64xf32>
    %25 = vector.shape_cast %22 : vector<1x64xf32> to vector<1x1x64xf32>
    tpu.vector_store %arg4[%c0_21, %c0_22, %c0_23], %25 {strides = array<i32>} : memref<2x1x64xf32, #tpu.memory_space<vmem>>, vector<1x1x64xf32>,
    %cst_24 = arith.constant 0.000000e+00 : f32
    %26 = vector.broadcast %cst_24 : f32 to vector<1x64xf32>
    %c1_25 = arith.constant 1 : index
    %c0_26 = arith.constant 0 : index
    %c0_27 = arith.constant 0 : index
    %27 = vector.load %arg1[%c1_25, %c0_26, %c0_27] : memref<2x3x192xf32, #tpu.memory_space<vmem>>, vector<1x1x192xf32>
    %28 = vector.shape_cast %27 : vector<1x1x192xf32> to vector<1x192xf32>
    %c0_28 = arith.constant 0 : index
    %c0_29 = arith.constant 0 : index
    %c0_30 = arith.constant 0 : index
    %29 = vector.load %arg2[%c0_28, %c0_29, %c0_30] : memref<3x192x64xf32, #tpu.memory_space<vmem>>, vector<1x192x64xf32>
    %30 = vector.shape_cast %29 : vector<1x192x64xf32> to vector<192x64xf32>
    %cst_31 = arith.constant dense<0.000000e+00> : vector<1x64xf32>
    %31 = tpu.matmul %28, %30, %cst_31 {dimension_numbers = #tpu.dot_dimension_numbers<[1], [0], [0], [1], [0, 0, 1, 1], [], []>} : vector<1x192xf32>, vector<192x64xf32>, vector<1x64xf32> -> vector<1x64xf32>
    %32 = arith.addf %26, %31 : vector<1x64xf32>
    %c1_32 = arith.constant 1 : index
    %c1_33 = arith.constant 1 : index
    %c0_34 = arith.constant 0 : index
    %33 = vector.load %arg1[%c1_32, %c1_33, %c0_34] : memref<2x3x192xf32, #tpu.memory_space<vmem>>, vector<1x1x192xf32>
    %34 = vector.shape_cast %33 : vector<1x1x192xf32> to vector<1x192xf32>
    %c1_35 = arith.constant 1 : index
    %c0_36 = arith.constant 0 : index
    %c0_37 = arith.constant 0 : index
    %35 = vector.load %arg2[%c1_35, %c0_36, %c0_37] : memref<3x192x64xf32, #tpu.memory_space<vmem>>, vector<1x192x64xf32>
    %36 = vector.shape_cast %35 : vector<1x192x64xf32> to vector<192x64xf32>
    %cst_38 = arith.constant dense<0.000000e+00> : vector<1x64xf32>
    %37 = tpu.matmul %34, %36, %cst_38 {dimension_numbers = #tpu.dot_dimension_numbers<[1], [0], [0], [1], [0, 0, 1, 1], [], []>} : vector<1x192xf32>, vector<192x64xf32>, vector<1x64xf32> -> vector<1x64xf32>
    %38 = arith.addf %32, %37 : vector<1x64xf32>
    %c1_39 = arith.constant 1 : index
    %c2_40 = arith.constant 2 : index
    %c0_41 = arith.constant 0 : index
    %39 = vector.load %arg1[%c1_39, %c2_40, %c0_41] : memref<2x3x192xf32, #tpu.memory_space<vmem>>, vector<1x1x192xf32>
    %40 = vector.shape_cast %39 : vector<1x1x192xf32> to vector<1x192xf32>
    %c2_42 = arith.constant 2 : index
    %c0_43 = arith.constant 0 : index
    %c0_44 = arith.constant 0 : index
    %41 = vector.load %arg2[%c2_42, %c0_43, %c0_44] : memref<3x192x64xf32, #tpu.memory_space<vmem>>, vector<1x192x64xf32>
    %42 = vector.shape_cast %41 : vector<1x192x64xf32> to vector<192x64xf32>
    %cst_45 = arith.constant dense<0.000000e+00> : vector<1x64xf32>
    %43 = tpu.matmul %40, %42, %cst_45 {dimension_numbers = #tpu.dot_dimension_numbers<[1], [0], [0], [1], [0, 0, 1, 1], [], []>} : vector<1x192xf32>, vector<192x64xf32>, vector<1x64xf32> -> vector<1x64xf32>
    %44 = arith.addf %38, %43 : vector<1x64xf32>
    %45 = arith.addf %44, %0 : vector<1x64xf32>
    %cst_46 = arith.constant 0.000000e+00 : f32
    %46 = vector.broadcast %cst_46 : f32 to vector<1x64xf32>
    %47 = arith.maximumf %45, %46 : vector<1x64xf32>
    %c1_47 = arith.constant 1 : index
    %c0_48 = arith.constant 0 : index
    %c0_49 = arith.constant 0 : index
    %48 = vector.load %arg4[%c1_47, %c0_48, %c0_49] : memref<2x1x64xf32, #tpu.memory_space<vmem>>, vector<1x1x64xf32>
    %49 = vector.shape_cast %48 : vector<1x1x64xf32> to vector<1x64xf32>
    %50 = vector.shape_cast %47 : vector<1x64xf32> to vector<1x1x64xf32>
    tpu.vector_store %arg4[%c1_47, %c0_48, %c0_49], %50 {strides = array<i32>} : memref<2x1x64xf32, #tpu.memory_space<vmem>>, vector<1x1x64xf32>,
    return
  }
  func.func @transform_0(%arg0: i32) -> (i32, i32, i32) {
    %c0_i32 = arith.constant 0 : i32
    %c0_i32_0 = arith.constant 0 : i32
    %c0_i32_1 = arith.constant 0 : i32
    return %arg0, %c0_i32, %c0_i32_0 : i32, i32, i32
  }
  func.func @transform_1(%arg0: i32) -> (i32, i32, i32) {
    %c0_i32 = arith.constant 0 : i32
    %c0_i32_0 = arith.constant 0 : i32
    %c0_i32_1 = arith.constant 0 : i32
    %c0_i32_2 = arith.constant 0 : i32
    return %c0_i32, %c0_i32_0, %c0_i32_1 : i32, i32, i32
  }
  func.func @transform_2(%arg0: i32) -> (i32, i32) {
    %c0_i32 = arith.constant 0 : i32
    %c0_i32_0 = arith.constant 0 : i32
    %c0_i32_1 = arith.constant 0 : i32
    return %c0_i32, %c0_i32_0 : i32, i32
  }
  func.func @transform_3(%arg0: i32) -> (i32, i32, i32) {
    %c0_i32 = arith.constant 0 : i32
    %c0_i32_0 = arith.constant 0 : i32
    %c0_i32_1 = arith.constant 0 : i32
    return %arg0, %c0_i32, %c0_i32_0 : i32, i32, i32
  }
}

module attributes {stable_mosaic.version = 11 : i64} {
  func.func @_dueling_head_kernel(%arg0: i32, %arg1: i32, %arg2: memref<2x64xf32, #tpu.memory_space<vmem>>, %arg3: memref<64x1024xf32, #tpu.memory_space<vmem>>, %arg4: memref<1x1024xf32, #tpu.memory_space<vmem>>, %arg5: memref<1024x128xf32, #tpu.memory_space<vmem>>, %arg6: memref<1x128xf32, #tpu.memory_space<vmem>>, %arg7: memref<2x128xf32, #tpu.memory_space<vmem>>, %arg8: memref<2x1024xf32, #tpu.memory_space<vmem>>) attributes {dimension_semantics = [#tpu.dimension_semantics<parallel>, #tpu.dimension_semantics<arbitrary>], iteration_bounds = array<i64: 1, 1>, scalar_prefetch = 0 : i64, scratch_operands = 1 : i64, tpu.core_type = #tpu.core_type<tc>, window_params = [{transform_indices = @transform_0, window_bounds = array<i64: 2, 64>}, {pipeline_mode = #tpu.pipeline_mode<synchronous>, transform_indices = @transform_1, window_bounds = array<i64: 64, 1024>}, {pipeline_mode = #tpu.pipeline_mode<synchronous>, transform_indices = @transform_2, window_bounds = array<i64: 1, 1024>}, {pipeline_mode = #tpu.pipeline_mode<synchronous>, transform_indices = @transform_3, window_bounds = array<i64: 1024, 128>}, {pipeline_mode = #tpu.pipeline_mode<synchronous>, transform_indices = @transform_4, window_bounds = array<i64: 1, 128>}, {transform_indices = @transform_5, window_bounds = array<i64: 2, 128>}]} {
    %c0_i32 = arith.constant 0 : i32
    %0 = arith.cmpi eq, %arg1, %c0_i32 : i32
    %1 = arith.extui %0 : i1 to i32
    %c0_i32_0 = arith.constant 0 : i32
    %2 = arith.cmpi ne, %1, %c0_i32_0 : i32
    scf.if %2 {
      %cst_10 = arith.constant 0.000000e+00 : f32
      %12 = vector.broadcast %cst_10 : f32 to vector<2x1024xf32>
      %c0_11 = arith.constant 0 : index
      %c0_12 = arith.constant 0 : index
      %13 = vector.load %arg8[%c0_11, %c0_12] : memref<2x1024xf32, #tpu.memory_space<vmem>>, vector<2x1024xf32>
      tpu.vector_store %arg8[%c0_11, %c0_12], %12 {strides = array<i32>} : memref<2x1024xf32, #tpu.memory_space<vmem>>, vector<2x1024xf32>,
    } else {
    }
    %c0 = arith.constant 0 : index
    %c0_1 = arith.constant 0 : index
    %3 = vector.load %arg8[%c0, %c0_1] : memref<2x1024xf32, #tpu.memory_space<vmem>>, vector<2x1024xf32>
    %c0_2 = arith.constant 0 : index
    %c0_3 = arith.constant 0 : index
    %4 = vector.load %arg2[%c0_2, %c0_3] : memref<2x64xf32, #tpu.memory_space<vmem>>, vector<2x64xf32>
    %c0_4 = arith.constant 0 : index
    %c0_5 = arith.constant 0 : index
    %5 = vector.load %arg3[%c0_4, %c0_5] : memref<64x1024xf32, #tpu.memory_space<vmem>>, vector<64x1024xf32>
    %cst = arith.constant dense<0.000000e+00> : vector<2x1024xf32>
    %6 = tpu.matmul %4, %5, %cst {dimension_numbers = #tpu.dot_dimension_numbers<[1], [0], [0], [1], [0, 0, 1, 1], [], []>} : vector<2x64xf32>, vector<64x1024xf32>, vector<2x1024xf32> -> vector<2x1024xf32>
    %7 = arith.addf %3, %6 : vector<2x1024xf32>
    %c0_6 = arith.constant 0 : index
    %c0_7 = arith.constant 0 : index
    %8 = vector.load %arg8[%c0_6, %c0_7] : memref<2x1024xf32, #tpu.memory_space<vmem>>, vector<2x1024xf32>
    tpu.vector_store %arg8[%c0_6, %c0_7], %7 {strides = array<i32>} : memref<2x1024xf32, #tpu.memory_space<vmem>>, vector<2x1024xf32>,
    %c0_i32_8 = arith.constant 0 : i32
    %9 = arith.cmpi eq, %arg1, %c0_i32_8 : i32
    %10 = arith.extui %9 : i1 to i32
    %c0_i32_9 = arith.constant 0 : i32
    %11 = arith.cmpi ne, %10, %c0_i32_9 : i32
    scf.if %11 {
      %c0_10 = arith.constant 0 : index
      %c0_11 = arith.constant 0 : index
      %12 = vector.load %arg8[%c0_10, %c0_11] : memref<2x1024xf32, #tpu.memory_space<vmem>>, vector<2x1024xf32>
      %c0_12 = arith.constant 0 : index
      %c0_13 = arith.constant 0 : index
      %13 = vector.load %arg4[%c0_12, %c0_13] : memref<1x1024xf32, #tpu.memory_space<vmem>>, vector<1x1024xf32>
      %14 = vector.broadcast %13 : vector<1x1024xf32> to vector<2x1024xf32>
      %15 = arith.addf %12, %14 : vector<2x1024xf32>
      %cst_14 = arith.constant 0.000000e+00 : f32
      %16 = vector.broadcast %cst_14 : f32 to vector<2x1024xf32>
      %17 = arith.maximumf %15, %16 : vector<2x1024xf32>
      %c0_15 = arith.constant 0 : index
      %c0_16 = arith.constant 0 : index
      %18 = vector.load %arg5[%c0_15, %c0_16] : memref<1024x128xf32, #tpu.memory_space<vmem>>, vector<1024x128xf32>
      %cst_17 = arith.constant dense<0.000000e+00> : vector<2x128xf32>
      %19 = tpu.matmul %17, %18, %cst_17 {dimension_numbers = #tpu.dot_dimension_numbers<[1], [0], [0], [1], [0, 0, 1, 1], [], []>} : vector<2x1024xf32>, vector<1024x128xf32>, vector<2x128xf32> -> vector<2x128xf32>
      %c0_18 = arith.constant 0 : index
      %c0_19 = arith.constant 0 : index
      %20 = vector.load %arg6[%c0_18, %c0_19] : memref<1x128xf32, #tpu.memory_space<vmem>>, vector<1x128xf32>
      %21 = vector.broadcast %20 : vector<1x128xf32> to vector<2x128xf32>
      %22 = arith.addf %19, %21 : vector<2x128xf32>
      %23 = vector.extract_strided_slice %22 {offsets = [0, 0], sizes = [2, 1], strides = [1, 1]} : vector<2x128xf32> to vector<2x1xf32>
      %cst_20 = arith.constant dense<0.000000e+00> : vector<2xf32>
      %24 = vector.multi_reduction <add>, %22, %cst_20 [1] : vector<2x128xf32> to vector<2xf32>
      %25 = vector.shape_cast %24 : vector<2xf32> to vector<2x1xf32>
      %26 = arith.subf %25, %23 : vector<2x1xf32>
      %cst_21 = arith.constant 0.166666672 : f32
      %27 = vector.broadcast %cst_21 : f32 to vector<2x1xf32>
      %28 = arith.mulf %26, %27 : vector<2x1xf32>
      %29 = vector.broadcast %28 : vector<2x1xf32> to vector<2x128xf32>
      %30 = arith.subf %22, %29 : vector<2x128xf32>
      %31 = vector.broadcast %23 : vector<2x1xf32> to vector<2x128xf32>
      %32 = arith.addf %31, %30 : vector<2x128xf32>
      %c0_22 = arith.constant 0 : index
      %c0_23 = arith.constant 0 : index
      %33 = vector.load %arg7[%c0_22, %c0_23] : memref<2x128xf32, #tpu.memory_space<vmem>>, vector<2x128xf32>
      tpu.vector_store %arg7[%c0_22, %c0_23], %32 {strides = array<i32>} : memref<2x128xf32, #tpu.memory_space<vmem>>, vector<2x128xf32>,
    } else {
    }
    return
  }
  func.func @transform_0(%arg0: i32, %arg1: i32) -> (i32, i32) {
    %c0_i32 = arith.constant 0 : i32
    return %arg0, %arg1 : i32, i32
  }
  func.func @transform_1(%arg0: i32, %arg1: i32) -> (i32, i32) {
    %c0_i32 = arith.constant 0 : i32
    %c0_i32_0 = arith.constant 0 : i32
    return %arg1, %c0_i32 : i32, i32
  }
  func.func @transform_2(%arg0: i32, %arg1: i32) -> (i32, i32) {
    %c0_i32 = arith.constant 0 : i32
    %c0_i32_0 = arith.constant 0 : i32
    %c0_i32_1 = arith.constant 0 : i32
    return %c0_i32, %c0_i32_0 : i32, i32
  }
  func.func @transform_3(%arg0: i32, %arg1: i32) -> (i32, i32) {
    %c0_i32 = arith.constant 0 : i32
    %c0_i32_0 = arith.constant 0 : i32
    %c0_i32_1 = arith.constant 0 : i32
    return %c0_i32, %c0_i32_0 : i32, i32
  }
  func.func @transform_4(%arg0: i32, %arg1: i32) -> (i32, i32) {
    %c0_i32 = arith.constant 0 : i32
    %c0_i32_0 = arith.constant 0 : i32
    %c0_i32_1 = arith.constant 0 : i32
    return %c0_i32, %c0_i32_0 : i32, i32
  }
  func.func @transform_5(%arg0: i32, %arg1: i32) -> (i32, i32) {
    %c0_i32 = arith.constant 0 : i32
    %c0_i32_0 = arith.constant 0 : i32
    return %arg0, %c0_i32 : i32, i32
  }
}

</mosaic_0001>

<bundles_post_ra>
// kernel: conv_qnet_forward.4
= control target key start
LH: loop header
LB: loop body
LE: loop exit
PB: predicated region body
PF: predicated region fallthrough
CT: control target
= control target key end

     0   :  { %vm40_vm0 = vcmask 261120   ;;  %s4195_s1 = inlined_call_operand.vmem [shape: f32[8,32,32], index: 1, kind: input, shape index: {}]   ;;  %s4196_s0 = inlined_call_operand.vmem [shape: f32[2,288,32], index: 0, kind: input, shape index: {}]   ;;  %s4197_s2 = inlined_call_operand.vmem [shape: f32[1,32], index: 2, kind: input, shape index: {}]   ;;  %s4198_s3 = inlined_call_operand.vmem [shape: f32[2,64,32], index: 3, kind: output, shape index: {}]  }
   0x1   :  { %v2435_v0 = vld [vmem:[%s4195_s1 + $0x20] sm:$0xff]  ;;  %v2436_v1 = vld [vmem:[%s4195_s1 + $0x28] sm:$0xff]  ;;  %v2437_v2 = vld [vmem:[%s4195_s1 + $0x30] sm:$0xff] }
   0x2   :  { %v3204_v3 = vpack.c.bf16 %v2436_v1, %v2435_v0  ;;  %v2438_v4 = vld [vmem:[%s4195_s1 + $0x38] sm:$0xff]  ;;  %v27_v5 = vld [vmem:[%s4196_s0 + $0x48] sm:$0xff]  ;;  %v23_v8 = vld [vmem:[%s4195_s1] sm:$0xff] }
   0x3   :  { %v2536_v6 = vld [vmem:[%s4196_s0 + $0x168] sm:$0xff]  ;;  %v3208_v7 = vpack.c.bf16 %v2438_v4, %v2437_v2  ;;  %2892 = vmatprep.mubr.msk.f32.mxu0 %vm40_vm0, %v27_v5  ;;  %v25_v11 = vld [vmem:[%s4195_s1 + $0x10] sm:$0xff]  ;;  %v26_v12 = vld [vmem:[%s4195_s1 + $0x18] sm:$0xff] }
   0x4   :  { %3052 = vmatprep.mubr.msk.f32.mxu1 %vm40_vm0, %v2536_v6  ;;  %v24_v9 = vld [vmem:[%s4195_s1 + $0x8] sm:$0xff]  ;;  %3205 = vmatprep.subr.bf16.mxu0 %v3204_v3  ;;  %v3499_v13 = vld [vmem:[%s4196_s0 + $0x50] sm:$0xff]  ;;  %v3509_v15 = vld [vmem:[%s4196_s0 + $0x58] sm:$0xff]  ;;  %v3216_v17 = vpack.c.bf16 %v26_v12, %v25_v11 }
   0x5   :  { %3269 = vmatprep.subr.bf16.mxu1 %v3204_v3  ;;  %3207 = vmatpush3.bf16.msra.mxu0 %v3204_v3  ;;  %v3212_v10 = vpack.c.bf16 %v24_v9, %v23_v8  ;;  %v3504_v14 = vld [vmem:[%s4196_s0 + $0x170] sm:$0xff]  ;;  %v3514_v16 = vld [vmem:[%s4196_s0 + $0x178] sm:$0xff]  ;;  %v2455_v18 = vld [vmem:[%s4195_s1 + $0x40] sm:$0xff] }
   0x6   :  { %3271 = vmatpush3.bf16.msra.mxu1 %v3204_v3  ;;  %3209 = vmatprep.subr.bf16.mxu0 %v3208_v7  ;;  %v2456_v19 = vld [vmem:[%s4195_s1 + $0x48] sm:$0xff]  ;;  %v3529_v20 = vld [vmem:[%s4196_s0 + $0x60] sm:$0xff]  ;;  %v3561_v25 = vld [vmem:[%s4196_s0 + $0x70] sm:$0xff] }
   0x7   :  { %3273 = vmatprep.subr.bf16.mxu1 %v3208_v7  ;;  %v3534_v21 = vld [vmem:[%s4196_s0 + $0x180] sm:$0xff]  ;;  %v3543_v22 = vld [vmem:[%s4196_s0 + $0x68] sm:$0xff]  ;;  %v3220_v24 = vpack.c.bf16 %v2456_v19, %v2455_v18  ;;  %v3566_v26 = vld [vmem:[%s4196_s0 + $0x190] sm:$0xff] }
   0x8   :  { %v3548_v23 = vld [vmem:[%s4196_s0 + $0x188] sm:$0xff]  ;;  %v3571_v27 = vld [vmem:[%s4196_s0 + $0x78] sm:$0xff]  ;;  %v3589_v29 = vld [vmem:[%s4196_s0 + $0x80] sm:$0xff] }
   0x9   :  { %3211 = vmatpush3.bf16.msra.mxu0 %v3208_v7  ;;  %v3576_v28 = vld [vmem:[%s4196_s0 + $0x198] sm:$0xff]  ;;  %v3594_v30 = vld [vmem:[%s4196_s0 + $0x1a0] sm:$0xff]  ;;  %v2457_v33 = vld [vmem:[%s4195_s1 + $0x50] sm:$0xff] }
   0xa   :  { %3275 = vmatpush3.bf16.msra.mxu1 %v3208_v7  ;;  %3213 = vmatprep.subr.bf16.mxu0 %v3212_v10  ;;  %v15_v31 = vld [vmem:[%s4196_s0] sm:$0xff]  ;;  %v2458_v34 = vld [vmem:[%s4195_s1 + $0x58] sm:$0xff]  ;;  %v3617_v35 = vld [vmem:[%s4196_s0 + $0x8] sm:$0xff] }
   0xb   :  { %3277 = vmatprep.subr.bf16.mxu1 %v3212_v10  ;;  %v2528_v32 = vld [vmem:[%s4196_s0 + $0x120] sm:$0xff]  ;;  %v3622_v36 = vld [vmem:[%s4196_s0 + $0x128] sm:$0xff]  ;;  %v3627_v37 = vld [vmem:[%s4196_s0 + $0x10] sm:$0xff]  ;;  %v3224_v39 = vpack.c.bf16 %v2458_v34, %v2457_v33 }
   0xc   :  { %2893 = vmatmul.mubr.msk.f32.vlgmr.msra.gmra.mrb[0].mxu0 %vm40_vm0, %v3499_v13  ;;  %v3632_v38 = vld [vmem:[%s4196_s0 + $0x130] sm:$0xff]  ;;  %v2467_v40 = vld [vmem:[%s4195_s1 + $0x60] sm:$0xff]  ;;  %v2468_v41 = vld [vmem:[%s4195_s1 + $0x68] sm:$0xff] }
   0xd   :  { %3053 = vmatmul.mubr.msk.f32.vlgmr.msra.gmra.mrb[0].mxu1 %vm40_vm0, %v3504_v14  ;;  %3215 = vmatpush3.bf16.msra.mxu0 %v3212_v10  ;;  %v3647_v42 = vld [vmem:[%s4196_s0 + $0x18] sm:$0xff]  ;;  %v3661_v44 = vld [vmem:[%s4196_s0 + $0x20] sm:$0xff]  ;;  %v3228_v46 = vpack.c.bf16 %v2468_v41, %v2467_v40  ;;  %v3679_v47 = vld [vmem:[%s4196_s0 + $0x28] sm:$0xff] }
   0xe   :  { %3279 = vmatpush3.bf16.msra.mxu1 %v3212_v10  ;;  %2895 = vmatprep.mubr.msk.f32.mxu0 %vm40_vm0, %v3509_v15  ;;  %v3652_v43 = vld [vmem:[%s4196_s0 + $0x138] sm:$0xff]  ;;  %v3666_v45 = vld [vmem:[%s4196_s0 + $0x140] sm:$0xff]  ;;  %v3684_v48 = vld [vmem:[%s4196_s0 + $0x148] sm:$0xff] }
   0xf   :  { %3055 = vmatprep.mubr.msk.f32.mxu1 %vm40_vm0, %v3514_v16  ;;  %3217 = vmatprep.subr.bf16.mxu0 %v3216_v17  ;;  %v3689_v49 = vld [vmem:[%s4196_s0 + $0x30] sm:$0xff]  ;;  %v3707_v51 = vld [vmem:[%s4196_s0 + $0x38] sm:$0xff]  ;;  %v3745_v59 = vld [vmem:[%s4196_s0 + $0xa0] sm:$0xff] }
  0x10   :  { %3281 = vmatprep.subr.bf16.mxu1 %v3216_v17  ;;  %2896 = vmatmul.mubr.msk.f32.gmra.mrb[2].mxu0 %vm40_vm0, %v3529_v20  ;;  %v3694_v50 = vld [vmem:[%s4196_s0 + $0x150] sm:$0xff]  ;;  %v3712_v52 = vld [vmem:[%s4196_s0 + $0x158] sm:$0xff]  ;;  %v3750_v60 = vld [vmem:[%s4196_s0 + $0x1c0] sm:$0xff] }
  0x11   :  { %3056 = vmatmul.mubr.msk.f32.gmra.mrb[2].mxu1 %vm40_vm0, %v3534_v21  ;;  %2898 = vmatprep.mubr.msk.f32.mxu0 %vm40_vm0, %v3543_v22  ;;  %v299_v53 = vld [vmem:[%s4196_s0 + $0x90] sm:$0xff]  ;;  %v2470_v56 = vld [vmem:[%s4195_s1 + $0x78] sm:$0xff]  ;;  %v2479_v62 = vld [vmem:[%s4195_s1 + $0x80] sm:$0xff] }
  0x12   :  { %3058 = vmatprep.mubr.msk.f32.mxu1 %vm40_vm0, %v3548_v23  ;;  %3219 = vmatpush3.bf16.msra.mxu0 %v3216_v17  ;;  %v2564_v54 = vld [vmem:[%s4196_s0 + $0x1b0] sm:$0xff]  ;;  %v3735_v57 = vld [vmem:[%s4196_s0 + $0x98] sm:$0xff]  ;;  %v2480_v63 = vld [vmem:[%s4195_s1 + $0x88] sm:$0xff] }
  0x13   :  { %3283 = vmatpush3.bf16.msra.mxu1 %v3216_v17  ;;  %3221 = vmatprep.subr.bf16.mxu0 %v3220_v24  ;;  %v2469_v55 = vld [vmem:[%s4195_s1 + $0x70] sm:$0xff]  ;;  %v3740_v58 = vld [vmem:[%s4196_s0 + $0x1b8] sm:$0xff]  ;;  %v3765_v0 = vld [vmem:[%s4196_s0 + $0xa8] sm:$0xff]  ;;  %v3236_v4 = vpack.c.bf16 %v2480_v63, %v2479_v62 }
  0x14   :  { %3285 = vmatprep.subr.bf16.mxu1 %v3220_v24  ;;  %2899 = vmatmul.mubr.msk.f32.gmra.mrb[4].mxu0 %vm40_vm0, %v3561_v25  ;;  %v3232_v61 = vpack.c.bf16 %v2470_v56, %v2469_v55  ;;  %v3770_v1 = vld [vmem:[%s4196_s0 + $0x1c8] sm:$0xff]  ;;  %v3779_v2 = vld [vmem:[%s4196_s0 + $0xb0] sm:$0xff]  ;;  %v3797_v5 = vld [vmem:[%s4196_s0 + $0xb8] sm:$0xff] }
  0x15   :  { %3059 = vmatmul.mubr.msk.f32.gmra.mrb[4].mxu1 %vm40_vm0, %v3566_v26  ;;  %2901 = vmatprep.mubr.msk.f32.mxu0 %vm40_vm0, %v3571_v27  ;;  %v3784_v3 = vld [vmem:[%s4196_s0 + $0x1d0] sm:$0xff]  ;;  %v3802_v6 = vld [vmem:[%s4196_s0 + $0x1d8] sm:$0xff]  ;;  %v3807_v7 = vld [vmem:[%s4196_s0 + $0xc0] sm:$0xff] }
  0x16   :  { %3061 = vmatprep.mubr.msk.f32.mxu1 %vm40_vm0, %v3576_v28  ;;  %v3812_v8 = vld [vmem:[%s4196_s0 + $0x1e0] sm:$0xff]  ;;  %v3825_v9 = vld [vmem:[%s4196_s0 + $0xc8] sm:$0xff]  ;;  %v449_v11 = vld [vmem:[%s4196_s0 + $0xd8] sm:$0xff] }
  0x17   :  { %v3830_v10 = vld [vmem:[%s4196_s0 + $0x1e8] sm:$0xff]  ;;  %v2584_v12 = vld [vmem:[%s4196_s0 + $0x1f8] sm:$0xff]  ;;  %v2481_v17 = vld [vmem:[%s4195_s1 + $0x90] sm:$0xff] }
  0x18   :  { %2902 = vmatmul.mubr.msk.f32.gmra.mrb[6].mxu0 %vm40_vm0, %v3589_v29  ;;  %v2482_v18 = vld [vmem:[%s4195_s1 + $0x98] sm:$0xff]  ;;  %v3853_v19 = vld [vmem:[%s4196_s0 + $0xe0] sm:$0xff]  ;;  %v3883_v40 = vld [vmem:[%s4196_s0 + $0xf0] sm:$0xff] }
  0x19   :  { %3062 = vmatmul.mubr.msk.f32.gmra.mrb[6].mxu1 %vm40_vm0, %v3594_v30  ;;  %2912 = vmatprep.mubr.msk.f32.mxu0 %vm40_vm0, %v15_v31  ;;  %v3863_v31 = vld [vmem:[%s4196_s0 + $0xe8] sm:$0xff]  ;;  %v3240_v33 = vpack.c.bf16 %v2482_v18, %v2481_v17  ;;  %v2491_v34 = vld [vmem:[%s4195_s1 + $0xa0] sm:$0xff]  ;;  %v3888_v41 = vld [vmem:[%s4196_s0 + $0x210] sm:$0xff] }
  0x1a   :  { %3072 = vmatprep.mubr.msk.f32.mxu1 %vm40_vm0, %v2528_v32  ;;  %v3868_v32 = vld [vmem:[%s4196_s0 + $0x208] sm:$0xff]  ;;  %v3915_v55 = vld [vmem:[%s4196_s0 + $0x100] sm:$0xff]  ;;  %v3943_v63 = vld [vmem:[%s4196_s0 + $0x110] sm:$0xff] }
  0x1b   :  { %v3920_v56 = vld [vmem:[%s4196_s0 + $0x220] sm:$0xff]  ;;  %v3930_v62 = vld [vmem:[%s4196_s0 + $0x228] sm:$0xff] }
  0x1c   :  { %2913 = vmatmul.mubr.msk.f32.vlgmr.msra.gmra.mrb[0].mxu0 %vm40_vm0, %v3617_v35  ;;  %v2503_v18 = vld [vmem:[%s4195_s1 + $0xc0] sm:$0xff] }
  0x1d   :  { %3073 = vmatmul.mubr.msk.f32.vlgmr.msra.gmra.mrb[0].mxu1 %vm40_vm0, %v3622_v36  ;;  %3223 = vmatpush3.bf16.msra.mxu0 %v3220_v24 }
  0x1e   :  { %3287 = vmatpush3.bf16.msra.mxu1 %v3220_v24  ;;  %2915 = vmatprep.mubr.msk.f32.mxu0 %vm40_vm0, %v3627_v37  ;;  %v3858_v24 = vld [vmem:[%s4196_s0 + $0x200] sm:$0xff] }
  0x1f   :  { %3075 = vmatprep.mubr.msk.f32.mxu1 %vm40_vm0, %v3632_v38  ;;  %3225 = vmatprep.subr.bf16.mxu0 %v3224_v39 }
  0x20   :  { %3289 = vmatprep.subr.bf16.mxu1 %v3224_v39  ;;  %2916 = vmatmul.mubr.msk.f32.gmra.mrb[2].mxu0 %vm40_vm0, %v3647_v42 }
  0x21   :  { %3076 = vmatmul.mubr.msk.f32.gmra.mrb[2].mxu1 %vm40_vm0, %v3652_v43  ;;  %2918 = vmatprep.mubr.msk.f32.mxu0 %vm40_vm0, %v3661_v44 }
  0x22   :  { %3078 = vmatprep.mubr.msk.f32.mxu1 %vm40_vm0, %v3666_v45  ;;  %3227 = vmatpush3.bf16.msra.mxu0 %v3224_v39 }
  0x23   :  { %3291 = vmatpush3.bf16.msra.mxu1 %v3224_v39  ;;  %3229 = vmatprep.subr.bf16.mxu0 %v3228_v46  ;;  %v2492_v39 = vld [vmem:[%s4195_s1 + $0xa8] sm:$0xff] }
  0x24   :  { %3293 = vmatprep.subr.bf16.mxu1 %v3228_v46  ;;  %2919 = vmatmul.mubr.msk.f32.gmra.mrb[4].mxu0 %vm40_vm0, %v3679_v47 }
  0x25   :  { %3079 = vmatmul.mubr.msk.f32.gmra.mrb[4].mxu1 %vm40_vm0, %v3684_v48  ;;  %2921 = vmatprep.mubr.msk.f32.mxu0 %vm40_vm0, %v3689_v49 }
  0x26   :  { %3081 = vmatprep.mubr.msk.f32.mxu1 %vm40_vm0, %v3694_v50 }
  0x28   :  { %2922 = vmatmul.mubr.msk.f32.gmra.mrb[6].mxu0 %vm40_vm0, %v3707_v51 }
  0x29   :  { %3082 = vmatmul.mubr.msk.f32.gmra.mrb[6].mxu1 %vm40_vm0, %v3712_v52  ;;  %2932 = vmatprep.mubr.msk.f32.mxu0 %vm40_vm0, %v299_v53  ;;  %v3902_v53 = vld [vmem:[%s4196_s0 + $0x218] sm:$0xff] }
  0x2a   :  { %3092 = vmatprep.mubr.msk.f32.mxu1 %vm40_vm0, %v2564_v54  ;;  %v3244_v54 = vpack.c.bf16 %v2492_v39, %v2491_v34 }
  0x2c   :  { %2933 = vmatmul.mubr.msk.f32.vlgmr.msra.gmra.mrb[0].mxu0 %vm40_vm0, %v3735_v57 }
  0x2d   :  { %3093 = vmatmul.mubr.msk.f32.vlgmr.msra.gmra.mrb[0].mxu1 %vm40_vm0, %v3740_v58  ;;  %3231 = vmatpush3.bf16.msra.mxu0 %v3228_v46 }
  0x2e   :  { %3295 = vmatpush3.bf16.msra.mxu1 %v3228_v46  ;;  %2935 = vmatprep.mubr.msk.f32.mxu0 %vm40_vm0, %v3745_v59  ;;  %v3897_v46 = vld [vmem:[%s4196_s0 + $0xf8] sm:$0xff] }
  0x2f   :  { %3095 = vmatprep.mubr.msk.f32.mxu1 %vm40_vm0, %v3750_v60  ;;  %3233 = vmatprep.subr.bf16.mxu0 %v3232_v61 }
  0x30   :  { %3297 = vmatprep.subr.bf16.mxu1 %v3232_v61  ;;  %2936 = vmatmul.mubr.msk.f32.gmra.mrb[2].mxu0 %vm40_vm0, %v3765_v0 }
  0x31   :  { %3096 = vmatmul.mubr.msk.f32.gmra.mrb[2].mxu1 %vm40_vm0, %v3770_v1  ;;  %2938 = vmatprep.mubr.msk.f32.mxu0 %vm40_vm0, %v3779_v2 }
  0x32   :  { %3098 = vmatprep.mubr.msk.f32.mxu1 %vm40_vm0, %v3784_v3  ;;  %3235 = vmatpush3.bf16.msra.mxu0 %v3232_v61 }
  0x33   :  { %3299 = vmatpush3.bf16.msra.mxu1 %v3232_v61  ;;  %3237 = vmatprep.subr.bf16.mxu0 %v3236_v4  ;;  %v3925_v61 = vld [vmem:[%s4196_s0 + $0x108] sm:$0xff] }
  0x34   :  { %3301 = vmatprep.subr.bf16.mxu1 %v3236_v4  ;;  %2939 = vmatmul.mubr.msk.f32.gmra.mrb[4].mxu0 %vm40_vm0, %v3797_v5 }
  0x35   :  { %3099 = vmatmul.mubr.msk.f32.gmra.mrb[4].mxu1 %vm40_vm0, %v3802_v6  ;;  %2941 = vmatprep.mubr.msk.f32.mxu0 %vm40_vm0, %v3807_v7 }
  0x36   :  { %3101 = vmatprep.mubr.msk.f32.mxu1 %vm40_vm0, %v3812_v8 }
  0x38   :  { %2942 = vmatmul.mubr.msk.f32.gmra.mrb[6].mxu0 %vm40_vm0, %v3825_v9 }
  0x39   :  { %3102 = vmatmul.mubr.msk.f32.gmra.mrb[6].mxu1 %vm40_vm0, %v3830_v10  ;;  %2952 = vmatprep.mubr.msk.f32.mxu0 %vm40_vm0, %v449_v11  ;;  %v2493_v11 = vld [vmem:[%s4195_s1 + $0xb0] sm:$0xff] }
  0x3a   :  { %3112 = vmatprep.mubr.msk.f32.mxu1 %vm40_vm0, %v2584_v12  ;;  %v2494_v12 = vld [vmem:[%s4195_s1 + $0xb8] sm:$0xff] }
  0x3b   :  { %v3248_v17 = vpack.c.bf16 %v2494_v12, %v2493_v11 }
  0x3c   :  { %2953 = vmatmul.mubr.msk.f32.vlgmr.msra.gmra.mrb[0].mxu0 %vm40_vm0, %v3853_v19 }
  0x3d   :  { %3113 = vmatmul.mubr.msk.f32.vlgmr.msra.gmra.mrb[0].mxu1 %vm40_vm0, %v3858_v24  ;;  %3239 = vmatpush3.bf16.msra.mxu0 %v3236_v4 }
  0x3e   :  { %3303 = vmatpush3.bf16.msra.mxu1 %v3236_v4  ;;  %2955 = vmatprep.mubr.msk.f32.mxu0 %vm40_vm0, %v3863_v31  ;;  %v3948_v4 = vld [vmem:[%s4196_s0 + $0x230] sm:$0xff] }
  0x3f   :  { %3115 = vmatprep.mubr.msk.f32.mxu1 %vm40_vm0, %v3868_v32  ;;  %3241 = vmatprep.subr.bf16.mxu0 %v3240_v33 }
  0x40   :  { %3305 = vmatprep.subr.bf16.mxu1 %v3240_v33  ;;  %2956 = vmatmul.mubr.msk.f32.gmra.mrb[2].mxu0 %vm40_vm0, %v3883_v40 }
  0x41   :  { %3116 = vmatmul.mubr.msk.f32.gmra.mrb[2].mxu1 %vm40_vm0, %v3888_v41  ;;  %2958 = vmatprep.mubr.msk.f32.mxu0 %vm40_vm0, %v3897_v46 }
  0x42   :  { %3118 = vmatprep.mubr.msk.f32.mxu1 %vm40_vm0, %v3902_v53  ;;  %3243 = vmatpush3.bf16.msra.mxu0 %v3240_v33 }
  0x43   :  { %3307 = vmatpush3.bf16.msra.mxu1 %v3240_v33  ;;  %3245 = vmatprep.subr.bf16.mxu0 %v3244_v54  ;;  %v2504_v33 = vld [vmem:[%s4195_s1 + $0xc8] sm:$0xff] }
  0x44   :  { %3309 = vmatprep.subr.bf16.mxu1 %v3244_v54  ;;  %2959 = vmatmul.mubr.msk.f32.gmra.mrb[4].mxu0 %vm40_vm0, %v3915_v55 }
  0x45   :  { %3119 = vmatmul.mubr.msk.f32.gmra.mrb[4].mxu1 %vm40_vm0, %v3920_v56  ;;  %2961 = vmatprep.mubr.msk.f32.mxu0 %vm40_vm0, %v3925_v61 }
  0x46   :  { %3121 = vmatprep.mubr.msk.f32.mxu1 %vm40_vm0, %v3930_v62 }
  0x48   :  { %2962 = vmatmul.mubr.msk.f32.gmra.mrb[6].mxu0 %vm40_vm0, %v3943_v63 }
  0x49   :  { %3122 = vmatmul.mubr.msk.f32.gmra.mrb[6].mxu1 %vm40_vm0, %v3948_v4  ;;  %2972 = vmatprep.mubr.msk.f32.mxu0 %vm40_vm0, %v3617_v35  ;;  %v3252_v35 = vpack.c.bf16 %v2504_v33, %v2503_v18 }
  0x4a   :  { %3132 = vmatprep.mubr.msk.f32.mxu1 %vm40_vm0, %v3622_v36  ;;  %v606_v36 = vld [vmem:[%s4196_s0 + $0x40] sm:$0xff] }
  0x4c   :  { %2973 = vmatmul.mubr.msk.f32.vlgmr.msra.gmra.mrb[0].mxu0 %vm40_vm0, %v3627_v37  ;;  %v2611_v37 = vld [vmem:[%s4196_s0 + $0x160] sm:$0xff] }
  0x4d   :  { %3133 = vmatmul.mubr.msk.f32.vlgmr.msra.gmra.mrb[0].mxu1 %vm40_vm0, %v3632_v38  ;;  %3247 = vmatpush3.bf16.msra.mxu0 %v3244_v54  ;;  %v2505_v38 = vld [vmem:[%s4195_s1 + $0xd0] sm:$0xff] }
  0x4e   :  { %3311 = vmatpush3.bf16.msra.mxu1 %v3244_v54  ;;  %2975 = vmatprep.mubr.msk.f32.mxu0 %vm40_vm0, %v3647_v42  ;;  %v2506_v42 = vld [vmem:[%s4195_s1 + $0xd8] sm:$0xff] }
  0x4f   :  { %3135 = vmatprep.mubr.msk.f32.mxu1 %vm40_vm0, %v3652_v43  ;;  %3249 = vmatprep.subr.bf16.mxu0 %v3248_v17  ;;  %v3256_v43 = vpack.c.bf16 %v2506_v42, %v2505_v38 }
  0x50   :  { %3313 = vmatprep.subr.bf16.mxu1 %v3248_v17  ;;  %2976 = vmatmul.mubr.msk.f32.gmra.mrb[2].mxu0 %vm40_vm0, %v3661_v44  ;;  %v2515_v44 = vld [vmem:[%s4195_s1 + $0xe0] sm:$0xff] }
  0x51   :  { %3136 = vmatmul.mubr.msk.f32.gmra.mrb[2].mxu1 %vm40_vm0, %v3666_v45  ;;  %2978 = vmatprep.mubr.msk.f32.mxu0 %vm40_vm0, %v3679_v47  ;;  %v2516_v45 = vld [vmem:[%s4195_s1 + $0xe8] sm:$0xff] }
  0x52   :  { %3138 = vmatprep.mubr.msk.f32.mxu1 %vm40_vm0, %v3684_v48  ;;  %3251 = vmatpush3.bf16.msra.mxu0 %v3248_v17 }
  0x53   :  { %3315 = vmatpush3.bf16.msra.mxu1 %v3248_v17  ;;  %3253 = vmatprep.subr.bf16.mxu0 %v3252_v35 }
  0x54   :  { %3317 = vmatprep.subr.bf16.mxu1 %v3252_v35  ;;  %2979 = vmatmul.mubr.msk.f32.gmra.mrb[4].mxu0 %vm40_vm0, %v3689_v49 }
  0x55   :  { %3139 = vmatmul.mubr.msk.f32.gmra.mrb[4].mxu1 %vm40_vm0, %v3694_v50  ;;  %2981 = vmatprep.mubr.msk.f32.mxu0 %vm40_vm0, %v3707_v51 }
  0x56   :  { %3141 = vmatprep.mubr.msk.f32.mxu1 %vm40_vm0, %v3712_v52 }
  0x58   :  { %2982 = vmatmul.mubr.msk.f32.gmra.mrb[6].mxu0 %vm40_vm0, %v606_v36 }
  0x59   :  { %3142 = vmatmul.mubr.msk.f32.gmra.mrb[6].mxu1 %vm40_vm0, %v2611_v37  ;;  %2992 = vmatprep.mubr.msk.f32.mxu0 %vm40_vm0, %v3499_v13  ;;  %v3260_v13 = vpack.c.bf16 %v2516_v45, %v2515_v44 }
  0x5a   :  { %3152 = vmatprep.mubr.msk.f32.mxu1 %vm40_vm0, %v3504_v14  ;;  %v756_v14 = vld [vmem:[%s4196_s0 + $0x88] sm:$0xff] }
  0x5c   :  { %2993 = vmatmul.mubr.msk.f32.vlgmr.msra.gmra.mrb[0].mxu0 %vm40_vm0, %v3509_v15  ;;  %v2631_v15 = vld [vmem:[%s4196_s0 + $0x1a8] sm:$0xff] }
  0x5d   :  { %3153 = vmatmul.mubr.msk.f32.vlgmr.msra.gmra.mrb[0].mxu1 %vm40_vm0, %v3514_v16  ;;  %3255 = vmatpush3.bf16.msra.mxu0 %v3252_v35  ;;  %v2517_v16 = vld [vmem:[%s4195_s1 + $0xf0] sm:$0xff] }
  0x5e   :  { %3319 = vmatpush3.bf16.msra.mxu1 %v3252_v35  ;;  %2995 = vmatprep.mubr.msk.f32.mxu0 %vm40_vm0, %v3529_v20  ;;  %v2518_v20 = vld [vmem:[%s4195_s1 + $0xf8] sm:$0xff] }
  0x5f   :  { %3155 = vmatprep.mubr.msk.f32.mxu1 %vm40_vm0, %v3534_v21  ;;  %3257 = vmatprep.subr.bf16.mxu0 %v3256_v43  ;;  %v3264_v21 = vpack.c.bf16 %v2518_v20, %v2517_v16 }
  0x60   :  { %3321 = vmatprep.subr.bf16.mxu1 %v3256_v43  ;;  %2996 = vmatmul.mubr.msk.f32.gmra.mrb[2].mxu0 %vm40_vm0, %v3543_v22  ;;  %v906_v22 = vld [vmem:[%s4196_s0 + $0xd0] sm:$0xff] }
  0x61   :  { %3156 = vmatmul.mubr.msk.f32.gmra.mrb[2].mxu1 %vm40_vm0, %v3548_v23  ;;  %2998 = vmatprep.mubr.msk.f32.mxu0 %vm40_vm0, %v3561_v25  ;;  %v2651_v23 = vld [vmem:[%s4196_s0 + $0x1f0] sm:$0xff]  ;;  %v1056_v25 = vld [vmem:[%s4196_s0 + $0x118] sm:$0xff] }
  0x62   :  { %3158 = vmatprep.mubr.msk.f32.mxu1 %vm40_vm0, %v3566_v26  ;;  %3259 = vmatpush3.bf16.msra.mxu0 %v3256_v43  ;;  %v2671_v26 = vld [vmem:[%s4196_s0 + $0x238] sm:$0xff] }
  0x63   :  { %3323 = vmatpush3.bf16.msra.mxu1 %v3256_v43  ;;  %3261 = vmatprep.subr.bf16.mxu0 %v3260_v13 }
  0x64   :  { %3325 = vmatprep.subr.bf16.mxu1 %v3260_v13  ;;  %2999 = vmatmul.mubr.msk.f32.gmra.mrb[4].mxu0 %vm40_vm0, %v3571_v27  ;;  %v2527_v27 = vld [vmem:[%s4197_s2] ss:$0 sm:$0xff] }
  0x65   :  { %3159 = vmatmul.mubr.msk.f32.gmra.mrb[4].mxu1 %vm40_vm0, %v3576_v28  ;;  %3001 = vmatprep.mubr.msk.f32.mxu0 %vm40_vm0, %v3589_v29 }
  0x66   :  { %3161 = vmatprep.mubr.msk.f32.mxu1 %vm40_vm0, %v3594_v30 }
  0x68   :  { %3002 = vmatmul.mubr.msk.f32.gmra.mrb[6].mxu0 %vm40_vm0, %v756_v14 }
  0x69   :  { %3162 = vmatmul.mubr.msk.f32.gmra.mrb[6].mxu1 %vm40_vm0, %v2631_v15  ;;  %3012 = vmatprep.mubr.msk.f32.mxu0 %vm40_vm0, %v3735_v57 }
  0x6a   :  { %3172 = vmatprep.mubr.msk.f32.mxu1 %vm40_vm0, %v3740_v58 }
  0x6c   :  { %3013 = vmatmul.mubr.msk.f32.vlgmr.msra.gmra.mrb[0].mxu0 %vm40_vm0, %v3745_v59 }
  0x6d   :  { %3173 = vmatmul.mubr.msk.f32.vlgmr.msra.gmra.mrb[0].mxu1 %vm40_vm0, %v3750_v60  ;;  %3263 = vmatpush3.bf16.msra.mxu0 %v3260_v13 }
  0x6e   :  { %3327 = vmatpush3.bf16.msra.mxu1 %v3260_v13  ;;  %3015 = vmatprep.mubr.msk.f32.mxu0 %vm40_vm0, %v3765_v0 }
  0x6f   :  { %3175 = vmatprep.mubr.msk.f32.mxu1 %vm40_vm0, %v3770_v1  ;;  %3265 = vmatprep.subr.bf16.mxu0 %v3264_v21 }
  0x70   :  { %3329 = vmatprep.subr.bf16.mxu1 %v3264_v21  ;;  %3016 = vmatmul.mubr.msk.f32.gmra.mrb[2].mxu0 %vm40_vm0, %v3779_v2 }
  0x71   :  { %3176 = vmatmul.mubr.msk.f32.gmra.mrb[2].mxu1 %vm40_vm0, %v3784_v3  ;;  %3018 = vmatprep.mubr.msk.f32.mxu0 %vm40_vm0, %v3797_v5 }
  0x72   :  { %3178 = vmatprep.mubr.msk.f32.mxu1 %vm40_vm0, %v3802_v6  ;;  %3267 = vmatpush3.bf16.msra.mxu0 %v3264_v21 }
  0x73   :  { %3331 = vmatpush3.bf16.msra.mxu1 %v3264_v21 }
  0x74   :  { %3019 = vmatmul.mubr.msk.f32.gmra.mrb[4].mxu0 %vm40_vm0, %v3807_v7 }
  0x75   :  { %3179 = vmatmul.mubr.msk.f32.gmra.mrb[4].mxu1 %vm40_vm0, %v3812_v8  ;;  %3021 = vmatprep.mubr.msk.f32.mxu0 %vm40_vm0, %v3825_v9 }
  0x76   :  { %3181 = vmatprep.mubr.msk.f32.mxu1 %vm40_vm0, %v3830_v10 }
  0x78   :  { %3022 = vmatmul.mubr.msk.f32.gmra.mrb[6].mxu0 %vm40_vm0, %v906_v22 }
  0x79   :  { %3182 = vmatmul.mubr.msk.f32.gmra.mrb[6].mxu1 %vm40_vm0, %v2651_v23  ;;  %3032 = vmatprep.mubr.msk.f32.mxu0 %vm40_vm0, %v3853_v19 }
  0x7a   :  { %3192 = vmatprep.mubr.msk.f32.mxu1 %vm40_vm0, %v3858_v24 }
  0x7c   :  { %3033 = vmatmul.mubr.msk.f32.vlgmr.msra.gmra.mrb[0].mxu0 %vm40_vm0, %v3863_v31 }
  0x7d   :  { %3193 = vmatmul.mubr.msk.f32.vlgmr.msra.gmra.mrb[0].mxu1 %vm40_vm0, %v3868_v32  ;;  %3035 = vmatprep.mubr.msk.f32.mxu0 %vm40_vm0, %v3883_v40 }
  0x7e   :  { %3195 = vmatprep.mubr.msk.f32.mxu1 %vm40_vm0, %v3888_v41 }
  0x80   :  { %3036 = vmatmul.mubr.msk.f32.gmra.mrb[2].mxu0 %vm40_vm0, %v3897_v46 }
  0x81   :  { %3196 = vmatmul.mubr.msk.f32.gmra.mrb[2].mxu1 %vm40_vm0, %v3902_v53  ;;  %3038 = vmatprep.mubr.msk.f32.mxu0 %vm40_vm0, %v3915_v55 }
  0x82   :  { %3198 = vmatprep.mubr.msk.f32.mxu1 %vm40_vm0, %v3920_v56 }
  0x84   :  { %3039 = vmatmul.mubr.msk.f32.gmra.mrb[4].mxu0 %vm40_vm0, %v3925_v61 }
  0x85   :  { %3199 = vmatmul.mubr.msk.f32.gmra.mrb[4].mxu1 %vm40_vm0, %v3930_v62  ;;  %3041 = vmatprep.mubr.msk.f32.mxu0 %vm40_vm0, %v3943_v63 }
  0x86   :  { %3201 = vmatprep.mubr.msk.f32.mxu1 %vm40_vm0, %v3948_v4 }
  0x88   :  { %3042 = vmatmul.mubr.msk.f32.gmra.mrb[6].mxu0 %vm40_vm0, %v1056_v25 }
  0x89   :  { %3202 = vmatmul.mubr.msk.f32.gmra.mrb[6].mxu1 %vm40_vm0, %v2671_v26 }
 0x14f   :  { %v3034_v28 = vpop.f32.mrb[0].mxu0 }
 0x150   :  { %v3194_v29 = vpop.f32.mrb[0].mxu1  ;;  %v1206_v30 = vadd.f32 %v3034_v28, %v2527_v27  ;;  %v1152_v48 = vpop.f32.mrb[1].mxu0 }
 0x151   :  { %v2407_v47 = vadd.f32 %v3194_v29, %v2527_v27  ;;  %v2359_v49 = vpop.f32.mrb[1].mxu1  ;;  %v1205_v50 = vadd.f32 %v2527_v27, %v1152_v48 }
 0x152   :  { %v2406_v51 = vadd.f32 %v2527_v27, %v2359_v49  ;;  %v1214_v52 = vmax.f32 %v1206_v30, 0.0 }
 0x153   :  { %v2415_v57 = vmax.f32 %v2407_v47, 0.0  ;;  %v1213_v58 = vmax.f32 %v1205_v50, 0.0  ;;  %v3037_v60 = vpop.f32.mrb[2].mxu0 }
 0x154   :  { %v2414_v59 = vmax.f32 %v2406_v51, 0.0  ;;  %v3197_v0 = vpop.f32.mrb[2].mxu1  ;;  %1222 = vst.msk [vmem:[%s4198_s3 + $0x8] sm:$0xff] %vm40_vm0, %v1214_v52  ;;  %v1208_v1 = vadd.f32 %v3037_v60, %v2527_v27  ;;  %v1162_v3 = vpop.f32.mrb[3].mxu0 }
 0x155   :  { %2685 = vst.msk [vmem:[%s4198_s3 + $0x48] sm:$0xff] %vm40_vm0, %v2415_v57  ;;  %v2409_v2 = vadd.f32 %v3197_v0, %v2527_v27  ;;  %v2369_v5 = vpop.f32.mrb[3].mxu1  ;;  %1221 = vst.msk [vmem:[%s4198_s3] sm:$0xff] %vm40_vm0, %v1213_v58  ;;  %v1207_v6 = vadd.f32 %v2527_v27, %v1162_v3 }
 0x156   :  { %2684 = vst.msk [vmem:[%s4198_s3 + $0x40] sm:$0xff] %vm40_vm0, %v2414_v59  ;;  %v2408_v7 = vadd.f32 %v2527_v27, %v2369_v5  ;;  %v1216_v8 = vmax.f32 %v1208_v1, 0.0 }
 0x157   :  { %v2417_v9 = vmax.f32 %v2409_v2, 0.0  ;;  %v1215_v10 = vmax.f32 %v1207_v6, 0.0  ;;  %v3040_v24 = vpop.f32.mrb[4].mxu0 }
 0x158   :  { %v2416_v19 = vmax.f32 %v2408_v7, 0.0  ;;  %v3200_v31 = vpop.f32.mrb[4].mxu1  ;;  %1224 = vst.msk [vmem:[%s4198_s3 + $0x18] sm:$0xff] %vm40_vm0, %v1216_v8  ;;  %v1210_v32 = vadd.f32 %v3040_v24, %v2527_v27  ;;  %v1172_v39 = vpop.f32.mrb[5].mxu0 }
 0x159   :  { %2687 = vst.msk [vmem:[%s4198_s3 + $0x58] sm:$0xff] %vm40_vm0, %v2417_v9  ;;  %v2411_v34 = vadd.f32 %v3200_v31, %v2527_v27  ;;  %v2379_v40 = vpop.f32.mrb[5].mxu1  ;;  %1223 = vst.msk [vmem:[%s4198_s3 + $0x10] sm:$0xff] %vm40_vm0, %v1215_v10  ;;  %v1209_v41 = vadd.f32 %v2527_v27, %v1172_v39 }
 0x15a   :  { %2686 = vst.msk [vmem:[%s4198_s3 + $0x50] sm:$0xff] %vm40_vm0, %v2416_v19  ;;  %v2410_v46 = vadd.f32 %v2527_v27, %v2379_v40  ;;  %v1218_v53 = vmax.f32 %v1210_v32, 0.0 }
 0x15b   :  { %v2419_v54 = vmax.f32 %v2411_v34, 0.0  ;;  %v1217_v55 = vmax.f32 %v1209_v41, 0.0  ;;  %v3043_v61 = vpop.f32.mrb[6].mxu0 }
 0x15c   :  { %v2418_v56 = vmax.f32 %v2410_v46, 0.0  ;;  %v3203_v62 = vpop.f32.mrb[6].mxu1  ;;  %1226 = vst.msk [vmem:[%s4198_s3 + $0x28] sm:$0xff] %vm40_vm0, %v1218_v53  ;;  %v1212_v63 = vadd.f32 %v3043_v61, %v2527_v27  ;;  %v1182_v11 = vpop.f32.mrb[7].mxu0 }
 0x15d   :  { %2689 = vst.msk [vmem:[%s4198_s3 + $0x68] sm:$0xff] %vm40_vm0, %v2419_v54  ;;  %v2413_v4 = vadd.f32 %v3203_v62, %v2527_v27  ;;  %v2389_v12 = vpop.f32.mrb[7].mxu1  ;;  %1225 = vst.msk [vmem:[%s4198_s3 + $0x20] sm:$0xff] %vm40_vm0, %v1217_v55  ;;  %v1211_v17 = vadd.f32 %v2527_v27, %v1182_v11 }
 0x15e   :  { %2688 = vst.msk [vmem:[%s4198_s3 + $0x60] sm:$0xff] %vm40_vm0, %v2418_v56  ;;  %v2412_v18 = vadd.f32 %v2527_v27, %v2389_v12  ;;  %v1220_v33 = vmax.f32 %v1212_v63, 0.0 }
 0x15f   :  { %v2421_v35 = vmax.f32 %v2413_v4, 0.0  ;;  %v1219_v36 = vmax.f32 %v1211_v17, 0.0 }
 0x160   :  { %v2420_v37 = vmax.f32 %v2412_v18, 0.0  ;;  %1228 = vst.msk [vmem:[%s4198_s3 + $0x38] sm:$0xff] %vm40_vm0, %v1220_v33 }
 0x161   :  { %2691 = vst.msk [vmem:[%s4198_s3 + $0x78] sm:$0xff] %vm40_vm0, %v2421_v35  ;;  %1227 = vst.msk [vmem:[%s4198_s3 + $0x30] sm:$0xff] %vm40_vm0, %v1219_v36 }
 0x162   :  { %2690 = vst.msk [vmem:[%s4198_s3 + $0x70] sm:$0xff] %vm40_vm0, %v2420_v37 }

// kernel: conv_qnet_forward.5
= control target key start
LH: loop header
LB: loop body
LE: loop exit
PB: predicated region body
PF: predicated region fallthrough
CT: control target
= control target key end

     0   :  { %vm406_vm0 = vcmask 516096   ;;  %vm404_vm1 = vcmask 523264   ;;  %s1870_s1 = inlined_call_operand.vmem [shape: f32[4,128,64], index: 1, kind: input, shape index: {}]   ;;  %s1871_s0 = inlined_call_operand.vmem [shape: f32[2,24,128], index: 0, kind: input, shape index: {}]   ;;  %s1872_s2 = inlined_call_operand.vmem [shape: f32[1,64], index: 2, kind: input, shape index: {}]   ;;  %s1873_s3 = inlined_call_operand.vmem [shape: f32[2,9,64], index: 3, kind: output, shape index: {}]  }
   0x1   :  { %v796_v0 = vld [vmem:[%s1870_s1 + $0x80] sm:$0xff]  ;;  %v797_v1 = vld [vmem:[%s1870_s1 + $0x88] sm:$0xff]  ;;  %v798_v2 = vld [vmem:[%s1870_s1 + $0x90] sm:$0xff] }
   0x2   :  { %v1327_v3 = vpack.c.bf16 %v797_v1, %v796_v0  ;;  %v799_v4 = vld [vmem:[%s1870_s1 + $0x98] sm:$0xff]  ;;  %v800_v6 = vld [vmem:[%s1870_s1 + $0xa0] sm:$0xff]  ;;  %v801_v7 = vld [vmem:[%s1870_s1 + $0xa8] sm:$0xff] }
   0x3   :  { %v1331_v5 = vpack.c.bf16 %v799_v4, %v798_v2  ;;  %v1335_v8 = vpack.c.bf16 %v801_v7, %v800_v6  ;;  %v33_v9 = vld [vmem:[%s1871_s0 + $0xc] sm:$0xff]  ;;  %v803_v11 = vld [vmem:[%s1870_s1 + $0xb8] sm:$0xff]  ;;  %v847_v12 = vld [vmem:[%s1871_s0 + $0x24] sm:$0xff] }
   0x4   :  { %1328 = vmatprep.subr.bf16.mxu0 %v1327_v3  ;;  %1456 = vmatprep.subr.bf16.mxu1 %v1327_v3  ;;  %v802_v10 = vld [vmem:[%s1870_s1 + $0xb0] sm:$0xff]  ;;  %v804_v14 = vld [vmem:[%s1870_s1 + $0xc0] sm:$0xff]  ;;  %v805_v15 = vld [vmem:[%s1870_s1 + $0xc8] sm:$0xff] }
   0x5   :  { %1330 = vmatpush3.bf16.msra.mxu0 %v1327_v3  ;;  %1458 = vmatpush3.bf16.msra.mxu1 %v1327_v3  ;;  %v1339_v13 = vpack.c.bf16 %v803_v11, %v802_v10  ;;  %v1343_v16 = vpack.c.bf16 %v805_v15, %v804_v14  ;;  %v806_v17 = vld [vmem:[%s1870_s1 + $0xd0] sm:$0xff]  ;;  %v807_v18 = vld [vmem:[%s1870_s1 + $0xd8] sm:$0xff]  ;;  %v808_v20 = vld [vmem:[%s1870_s1 + $0xe0] sm:$0xff] }
   0x6   :  { %1332 = vmatprep.subr.bf16.mxu0 %v1331_v5  ;;  %1460 = vmatprep.subr.bf16.mxu1 %v1331_v5  ;;  %v1347_v19 = vpack.c.bf16 %v807_v18, %v806_v17  ;;  %v809_v21 = vld [vmem:[%s1870_s1 + $0xe8] sm:$0xff]  ;;  %v810_v23 = vld [vmem:[%s1870_s1 + $0xf0] sm:$0xff]  ;;  %v811_v24 = vld [vmem:[%s1870_s1 + $0xf8] sm:$0xff] }
   0x7   :  { %1079 = vmatprep.mubr.f32.mxu0 %v33_v9  ;;  %1219 = vmatprep.mubr.f32.mxu1 %v847_v12  ;;  %v1351_v22 = vpack.c.bf16 %v809_v21, %v808_v20  ;;  %v1355_v25 = vpack.c.bf16 %v811_v24, %v810_v23  ;;  %v17_v26 = vld [vmem:[%s1870_s1] sm:$0xff]  ;;  %v18_v27 = vld [vmem:[%s1870_s1 + $0x8] sm:$0xff]  ;;  %v19_v29 = vld [vmem:[%s1870_s1 + $0x10] sm:$0xff] }
   0x8   :  { %v1359_v28 = vpack.c.bf16 %v18_v27, %v17_v26  ;;  %v20_v30 = vld [vmem:[%s1870_s1 + $0x18] sm:$0xff]  ;;  %v34_v31 = vld [vmem:[%s1871_s0 + $0x14] sm:$0x1]  ;;  %v848_v32 = vld [vmem:[%s1871_s0 + $0x2c] sm:$0x1] }
   0x9   :  { %1334 = vmatpush3.bf16.msra.mxu0 %v1331_v5  ;;  %1462 = vmatpush3.bf16.msra.mxu1 %v1331_v5  ;;  %v1363_v33 = vpack.c.bf16 %v20_v30, %v19_v29  ;;  %v21_v34 = vld [vmem:[%s1870_s1 + $0x20] sm:$0xff]  ;;  %v22_v35 = vld [vmem:[%s1870_s1 + $0x28] sm:$0xff]  ;;  %v845_v37 = vld [vmem:[%s1871_s0 + $0x18] sm:$0xff] }
   0xa   :  { %1336 = vmatprep.subr.bf16.mxu0 %v1335_v8  ;;  %1464 = vmatprep.subr.bf16.mxu1 %v1335_v8  ;;  %v15_v36 = vld [vmem:[%s1871_s0] sm:$0xff]  ;;  %v1367_v38 = vpack.c.bf16 %v22_v35, %v21_v34  ;;  %v23_v39 = vld [vmem:[%s1870_s1 + $0x30] sm:$0xff]  ;;  %v24_v40 = vld [vmem:[%s1870_s1 + $0x38] sm:$0xff] }
   0xb   :  { %v1371_v41 = vpack.c.bf16 %v24_v40, %v23_v39  ;;  %v25_v42 = vld [vmem:[%s1870_s1 + $0x40] sm:$0xff]  ;;  %v26_v43 = vld [vmem:[%s1870_s1 + $0x48] sm:$0xff]  ;;  %v27_v45 = vld [vmem:[%s1870_s1 + $0x50] sm:$0xff] }
   0xc   :  { %v1375_v44 = vpack.c.bf16 %v26_v43, %v25_v42  ;;  %v28_v46 = vld [vmem:[%s1870_s1 + $0x58] sm:$0xff]  ;;  %v29_v48 = vld [vmem:[%s1870_s1 + $0x60] sm:$0xff]  ;;  %v30_v49 = vld [vmem:[%s1870_s1 + $0x68] sm:$0xff] }
   0xd   :  { %1338 = vmatpush3.bf16.msra.mxu0 %v1335_v8  ;;  %1466 = vmatpush3.bf16.msra.mxu1 %v1335_v8  ;;  %v1379_v47 = vpack.c.bf16 %v28_v46, %v27_v45  ;;  %v1383_v50 = vpack.c.bf16 %v30_v49, %v29_v48  ;;  %v31_v51 = vld [vmem:[%s1870_s1 + $0x70] sm:$0xff]  ;;  %v32_v52 = vld [vmem:[%s1870_s1 + $0x78] sm:$0xff]  ;;  %v812_v54 = vld [vmem:[%s1870_s1 + $0x100] sm:$0xff] }
   0xe   :  { %1340 = vmatprep.subr.bf16.mxu0 %v1339_v13  ;;  %1468 = vmatprep.subr.bf16.mxu1 %v1339_v13  ;;  %v1387_v53 = vpack.c.bf16 %v32_v52, %v31_v51  ;;  %v813_v55 = vld [vmem:[%s1870_s1 + $0x108] sm:$0xff]  ;;  %v814_v57 = vld [vmem:[%s1870_s1 + $0x110] sm:$0xff]  ;;  %v815_v58 = vld [vmem:[%s1870_s1 + $0x118] sm:$0xff] }
   0xf   :  { %v1391_v56 = vpack.c.bf16 %v813_v55, %v812_v54  ;;  %v16_v59 = vld [vmem:[%s1871_s0 + $0x8] sm:$0x1]  ;;  %v846_v60 = vld [vmem:[%s1871_s0 + $0x20] sm:$0x1]  ;;  %v1395_v61 = vpack.c.bf16 %v815_v58, %v814_v57  ;;  %v818_v3 = vld [vmem:[%s1870_s1 + $0x130] sm:$0xff] }
  0x10   :  { %v816_v62 = vld [vmem:[%s1870_s1 + $0x120] sm:$0xff]  ;;  %v817_v63 = vld [vmem:[%s1870_s1 + $0x128] sm:$0xff]  ;;  %v819_v4 = vld [vmem:[%s1870_s1 + $0x138] sm:$0xff] }
  0x11   :  { %1342 = vmatpush3.bf16.msra.mxu0 %v1339_v13  ;;  %1470 = vmatpush3.bf16.msra.mxu1 %v1339_v13  ;;  %v202_v0 = vld [vmem:[%s1871_s0 + $0x3] sm:$0xff]  ;;  %v865_v1 = vld [vmem:[%s1871_s0 + $0x1b] sm:$0xff]  ;;  %v1399_v2 = vpack.c.bf16 %v817_v63, %v816_v62  ;;  %v1403_v5 = vpack.c.bf16 %v819_v4, %v818_v3  ;;  %v822_v9 = vld [vmem:[%s1870_s1 + $0x150] sm:$0xff] }
  0x12   :  { %1344 = vmatprep.subr.bf16.mxu0 %v1343_v16  ;;  %1472 = vmatprep.subr.bf16.mxu1 %v1343_v16  ;;  %v820_v6 = vld [vmem:[%s1870_s1 + $0x140] sm:$0xff]  ;;  %v821_v7 = vld [vmem:[%s1870_s1 + $0x148] sm:$0xff]  ;;  %v823_v10 = vld [vmem:[%s1870_s1 + $0x158] sm:$0xff] }
  0x13   :  { %v1407_v8 = vpack.c.bf16 %v821_v7, %v820_v6  ;;  %v1411_v11 = vpack.c.bf16 %v823_v10, %v822_v9  ;;  %v824_v12 = vld [vmem:[%s1870_s1 + $0x160] sm:$0xff]  ;;  %v825_v13 = vld [vmem:[%s1870_s1 + $0x168] sm:$0xff]  ;;  %v826_v15 = vld [vmem:[%s1870_s1 + $0x170] sm:$0xff] }
  0x14   :  { %v1415_v14 = vpack.c.bf16 %v825_v13, %v824_v12  ;;  %v828_v18 = vld [vmem:[%s1870_s1 + $0x180] sm:$0xff]  ;;  %v830_v21 = vld [vmem:[%s1870_s1 + $0x190] sm:$0xff]  ;;  %v203_v23 = vld [vmem:[%s1871_s0 + $0xb] sm:$0x1] }
  0x15   :  { %1346 = vmatpush3.bf16.msra.mxu0 %v1343_v16  ;;  %1474 = vmatpush3.bf16.msra.mxu1 %v1343_v16  ;;  %v827_v16 = vld [vmem:[%s1870_s1 + $0x178] sm:$0xff]  ;;  %v866_v24 = vld [vmem:[%s1871_s0 + $0x23] sm:$0x1]  ;;  %v833_v27 = vld [vmem:[%s1870_s1 + $0x1a8] sm:$0xff] }
  0x16   :  { %1348 = vmatprep.subr.bf16.mxu0 %v1347_v19  ;;  %1476 = vmatprep.subr.bf16.mxu1 %v1347_v19  ;;  %v1419_v17 = vpack.c.bf16 %v827_v16, %v826_v15  ;;  %v832_v26 = vld [vmem:[%s1870_s1 + $0x1a0] sm:$0xff]  ;;  %v837_v35 = vld [vmem:[%s1870_s1 + $0x1c8] sm:$0xff]  ;;  %v842_v43 = vld [vmem:[%s1870_s1 + $0x1f0] sm:$0xff] }
  0x17   :  { %v883_v29 = vld [vmem:[%s1871_s0 + $0x27] sm:$0xff]  ;;  %v1431_v30 = vpack.c.bf16 %v833_v27, %v832_v26  ;;  %v299_v46 = vld [vmem:[%s1871_s0 + $0x17] sm:$0x1]  ;;  %v844_v48 = vld [vmem:[%s1872_s2] ss:$0 sm:$0xff] }
  0x18   :  { %v836_v34 = vld [vmem:[%s1870_s1 + $0x1c0] sm:$0xff] }
  0x19   :  { %1350 = vmatpush3.bf16.msra.mxu0 %v1347_v19  ;;  %1478 = vmatpush3.bf16.msra.mxu1 %v1347_v19  ;;  %v829_v19 = vld [vmem:[%s1870_s1 + $0x188] sm:$0xff]  ;;  %v840_v40 = vld [vmem:[%s1870_s1 + $0x1e0] sm:$0xff] }
  0x1a   :  { %1352 = vmatprep.subr.bf16.mxu0 %v1351_v22  ;;  %1480 = vmatprep.subr.bf16.mxu1 %v1351_v22  ;;  %v1423_v20 = vpack.c.bf16 %v829_v19, %v828_v18 }
  0x1d   :  { %1354 = vmatpush3.bf16.msra.mxu0 %v1351_v22  ;;  %1482 = vmatpush3.bf16.msra.mxu1 %v1351_v22  ;;  %v831_v22 = vld [vmem:[%s1870_s1 + $0x198] sm:$0xff] }
  0x1e   :  { %1356 = vmatprep.subr.bf16.mxu0 %v1355_v25  ;;  %1484 = vmatprep.subr.bf16.mxu1 %v1355_v25 }
  0x21   :  { %1358 = vmatpush3.bf16.msra.mxu0 %v1355_v25  ;;  %1486 = vmatpush3.bf16.msra.mxu1 %v1355_v25  ;;  %v1427_v25 = vpack.c.bf16 %v831_v22, %v830_v21 }
  0x22   :  { %1360 = vmatprep.subr.bf16.mxu0 %v1359_v28  ;;  %1488 = vmatprep.subr.bf16.mxu1 %v1359_v28 }
  0x24   :  { %1080 = vmatmul.mubr.f32.vlgmr.msra.gmra.mrb[0].mxu0 %v34_v31  ;;  %1220 = vmatmul.mubr.f32.vlgmr.msra.gmra.mrb[0].mxu1 %v848_v32  ;;  %v834_v31 = vld [vmem:[%s1870_s1 + $0x1b0] sm:$0xff]  ;;  %v835_v32 = vld [vmem:[%s1870_s1 + $0x1b8] sm:$0xff] }
  0x25   :  { %1362 = vmatpush3.bf16.msra.mxu0 %v1359_v28  ;;  %1490 = vmatpush3.bf16.msra.mxu1 %v1359_v28  ;;  %v298_v28 = vld [vmem:[%s1871_s0 + $0xf] sm:$0xff] }
  0x26   :  { %1364 = vmatprep.subr.bf16.mxu0 %v1363_v33  ;;  %1492 = vmatprep.subr.bf16.mxu1 %v1363_v33 }
  0x27   :  { %1114 = vmatprep.mubr.f32.mxu0 %v15_v36  ;;  %1254 = vmatprep.mubr.f32.mxu1 %v845_v37  ;;  %v1439_v36 = vpack.c.bf16 %v837_v35, %v836_v34  ;;  %v838_v37 = vld [vmem:[%s1870_s1 + $0x1d0] sm:$0xff] }
  0x29   :  { %1366 = vmatpush3.bf16.msra.mxu0 %v1363_v33  ;;  %1494 = vmatpush3.bf16.msra.mxu1 %v1363_v33  ;;  %v1435_v33 = vpack.c.bf16 %v835_v32, %v834_v31 }
  0x2a   :  { %1368 = vmatprep.subr.bf16.mxu0 %v1367_v38  ;;  %1496 = vmatprep.subr.bf16.mxu1 %v1367_v38 }
  0x2d   :  { %1370 = vmatpush3.bf16.msra.mxu0 %v1367_v38  ;;  %1498 = vmatpush3.bf16.msra.mxu1 %v1367_v38  ;;  %v839_v38 = vld [vmem:[%s1870_s1 + $0x1d8] sm:$0xff] }
  0x2e   :  { %1372 = vmatprep.subr.bf16.mxu0 %v1371_v41  ;;  %1500 = vmatprep.subr.bf16.mxu1 %v1371_v41  ;;  %v1443_v39 = vpack.c.bf16 %v839_v38, %v838_v37 }
  0x31   :  { %1374 = vmatpush3.bf16.msra.mxu0 %v1371_v41  ;;  %1502 = vmatpush3.bf16.msra.mxu1 %v1371_v41  ;;  %v841_v41 = vld [vmem:[%s1870_s1 + $0x1e8] sm:$0xff] }
  0x32   :  { %1376 = vmatprep.subr.bf16.mxu0 %v1375_v44  ;;  %1504 = vmatprep.subr.bf16.mxu1 %v1375_v44  ;;  %v1447_v42 = vpack.c.bf16 %v841_v41, %v840_v40 }
  0x35   :  { %1378 = vmatpush3.bf16.msra.mxu0 %v1375_v44  ;;  %1506 = vmatpush3.bf16.msra.mxu1 %v1375_v44  ;;  %v843_v44 = vld [vmem:[%s1870_s1 + $0x1f8] sm:$0xff] }
  0x36   :  { %1380 = vmatprep.subr.bf16.mxu0 %v1379_v47  ;;  %1508 = vmatprep.subr.bf16.mxu1 %v1379_v47  ;;  %v1451_v45 = vpack.c.bf16 %v843_v44, %v842_v43 }
  0x39   :  { %1382 = vmatpush3.bf16.msra.mxu0 %v1379_v47  ;;  %1510 = vmatpush3.bf16.msra.mxu1 %v1379_v47  ;;  %v884_v47 = vld [vmem:[%s1871_s0 + $0x2f] sm:$0x1] }
  0x3a   :  { %1384 = vmatprep.subr.bf16.mxu0 %v1383_v50  ;;  %1512 = vmatprep.subr.bf16.mxu1 %v1383_v50 }
  0x3d   :  { %1386 = vmatpush3.bf16.msra.mxu0 %v1383_v50  ;;  %1514 = vmatpush3.bf16.msra.mxu1 %v1383_v50 }
  0x3e   :  { %1388 = vmatprep.subr.bf16.mxu0 %v1387_v53  ;;  %1516 = vmatprep.subr.bf16.mxu1 %v1387_v53 }
  0x41   :  { %1390 = vmatpush3.bf16.msra.mxu0 %v1387_v53  ;;  %1518 = vmatpush3.bf16.msra.mxu1 %v1387_v53 }
  0x42   :  { %1392 = vmatprep.subr.bf16.mxu0 %v1391_v56  ;;  %1520 = vmatprep.subr.bf16.mxu1 %v1391_v56 }
  0x44   :  { %1115 = vmatmul.mubr.f32.vlgmr.msra.gmra.mrb[0].mxu0 %v16_v59  ;;  %1255 = vmatmul.mubr.f32.vlgmr.msra.gmra.mrb[0].mxu1 %v846_v60 }
  0x45   :  { %1394 = vmatpush3.bf16.msra.mxu0 %v1391_v56  ;;  %1522 = vmatpush3.bf16.msra.mxu1 %v1391_v56 }
  0x46   :  { %1396 = vmatprep.subr.bf16.mxu0 %v1395_v61  ;;  %1524 = vmatprep.subr.bf16.mxu1 %v1395_v61 }
  0x47   :  { %1149 = vmatprep.mubr.f32.mxu0 %v202_v0  ;;  %1289 = vmatprep.mubr.f32.mxu1 %v865_v1 }
  0x49   :  { %1398 = vmatpush3.bf16.msra.mxu0 %v1395_v61  ;;  %1526 = vmatpush3.bf16.msra.mxu1 %v1395_v61 }
  0x4a   :  { %1400 = vmatprep.subr.bf16.mxu0 %v1399_v2  ;;  %1528 = vmatprep.subr.bf16.mxu1 %v1399_v2 }
  0x4d   :  { %1402 = vmatpush3.bf16.msra.mxu0 %v1399_v2  ;;  %1530 = vmatpush3.bf16.msra.mxu1 %v1399_v2 }
  0x4e   :  { %1404 = vmatprep.subr.bf16.mxu0 %v1403_v5  ;;  %1532 = vmatprep.subr.bf16.mxu1 %v1403_v5 }
  0x51   :  { %1406 = vmatpush3.bf16.msra.mxu0 %v1403_v5  ;;  %1534 = vmatpush3.bf16.msra.mxu1 %v1403_v5 }
  0x52   :  { %1408 = vmatprep.subr.bf16.mxu0 %v1407_v8  ;;  %1536 = vmatprep.subr.bf16.mxu1 %v1407_v8 }
  0x55   :  { %1410 = vmatpush3.bf16.msra.mxu0 %v1407_v8  ;;  %1538 = vmatpush3.bf16.msra.mxu1 %v1407_v8 }
  0x56   :  { %1412 = vmatprep.subr.bf16.mxu0 %v1411_v11  ;;  %1540 = vmatprep.subr.bf16.mxu1 %v1411_v11 }
  0x59   :  { %1414 = vmatpush3.bf16.msra.mxu0 %v1411_v11  ;;  %1542 = vmatpush3.bf16.msra.mxu1 %v1411_v11 }
  0x5a   :  { %1416 = vmatprep.subr.bf16.mxu0 %v1415_v14  ;;  %1544 = vmatprep.subr.bf16.mxu1 %v1415_v14 }
  0x5d   :  { %1418 = vmatpush3.bf16.msra.mxu0 %v1415_v14  ;;  %1546 = vmatpush3.bf16.msra.mxu1 %v1415_v14 }
  0x5e   :  { %1420 = vmatprep.subr.bf16.mxu0 %v1419_v17  ;;  %1548 = vmatprep.subr.bf16.mxu1 %v1419_v17 }
  0x61   :  { %1422 = vmatpush3.bf16.msra.mxu0 %v1419_v17  ;;  %1550 = vmatpush3.bf16.msra.mxu1 %v1419_v17 }
  0x62   :  { %1424 = vmatprep.subr.bf16.mxu0 %v1423_v20  ;;  %1552 = vmatprep.subr.bf16.mxu1 %v1423_v20 }
  0x64   :  { %1150 = vmatmul.mubr.f32.vlgmr.msra.gmra.mrb[0].mxu0 %v203_v23  ;;  %1290 = vmatmul.mubr.f32.vlgmr.msra.gmra.mrb[0].mxu1 %v866_v24 }
  0x65   :  { %1426 = vmatpush3.bf16.msra.mxu0 %v1423_v20  ;;  %1554 = vmatpush3.bf16.msra.mxu1 %v1423_v20 }
  0x66   :  { %1428 = vmatprep.subr.bf16.mxu0 %v1427_v25  ;;  %1556 = vmatprep.subr.bf16.mxu1 %v1427_v25 }
  0x67   :  { %1184 = vmatprep.mubr.f32.mxu0 %v298_v28  ;;  %1324 = vmatprep.mubr.f32.mxu1 %v883_v29 }
  0x69   :  { %1430 = vmatpush3.bf16.msra.mxu0 %v1427_v25  ;;  %1558 = vmatpush3.bf16.msra.mxu1 %v1427_v25 }
  0x6a   :  { %1432 = vmatprep.subr.bf16.mxu0 %v1431_v30  ;;  %1560 = vmatprep.subr.bf16.mxu1 %v1431_v30 }
  0x6d   :  { %1434 = vmatpush3.bf16.msra.mxu0 %v1431_v30  ;;  %1562 = vmatpush3.bf16.msra.mxu1 %v1431_v30 }
  0x6e   :  { %1436 = vmatprep.subr.bf16.mxu0 %v1435_v33  ;;  %1564 = vmatprep.subr.bf16.mxu1 %v1435_v33 }
  0x71   :  { %1438 = vmatpush3.bf16.msra.mxu0 %v1435_v33  ;;  %1566 = vmatpush3.bf16.msra.mxu1 %v1435_v33 }
  0x72   :  { %1440 = vmatprep.subr.bf16.mxu0 %v1439_v36  ;;  %1568 = vmatprep.subr.bf16.mxu1 %v1439_v36 }
  0x75   :  { %1442 = vmatpush3.bf16.msra.mxu0 %v1439_v36  ;;  %1570 = vmatpush3.bf16.msra.mxu1 %v1439_v36 }
  0x76   :  { %1444 = vmatprep.subr.bf16.mxu0 %v1443_v39  ;;  %1572 = vmatprep.subr.bf16.mxu1 %v1443_v39 }
  0x79   :  { %1446 = vmatpush3.bf16.msra.mxu0 %v1443_v39  ;;  %1574 = vmatpush3.bf16.msra.mxu1 %v1443_v39 }
  0x7a   :  { %1448 = vmatprep.subr.bf16.mxu0 %v1447_v42  ;;  %1576 = vmatprep.subr.bf16.mxu1 %v1447_v42 }
  0x7d   :  { %1450 = vmatpush3.bf16.msra.mxu0 %v1447_v42  ;;  %1578 = vmatpush3.bf16.msra.mxu1 %v1447_v42 }
  0x7e   :  { %1452 = vmatprep.subr.bf16.mxu0 %v1451_v45  ;;  %1580 = vmatprep.subr.bf16.mxu1 %v1451_v45 }
  0x81   :  { %1454 = vmatpush3.bf16.msra.mxu0 %v1451_v45  ;;  %1582 = vmatpush3.bf16.msra.mxu1 %v1451_v45 }
  0x84   :  { %1185 = vmatmul.mubr.f32.vlgmr.msra.gmra.mrb[0].mxu0 %v299_v46  ;;  %1325 = vmatmul.mubr.f32.vlgmr.msra.gmra.mrb[0].mxu1 %v884_v47 }
 0x157   :  { %v1186_v49 = vpop.f32.mrb[0].mxu0  ;;  %v1326_v50 = vpop.f32.mrb[0].mxu1 }
 0x158   :  { %v401_v51 = vadd.f32 %v1186_v49, %v844_v48  ;;  %v786_v52 = vadd.f32 %v1326_v50, %v844_v48  ;;  %v383_v53 = vpop.f32.mrb[1].mxu0  ;;  %v774_v54 = vpop.f32.mrb[1].mxu1 }
 0x159   :  { %v400_v55 = vadd.f32 %v844_v48, %v383_v53  ;;  %v785_v56 = vadd.f32 %v844_v48, %v774_v54 }
 0x15a   :  { %v403_v57 = vmax.f32 %v401_v51, 0.0  ;;  %v788_v58 = vmax.f32 %v786_v52, 0.0 }
 0x15b   :  { %v402_v59 = vmax.f32 %v400_v55, 0.0  ;;  %v787_v60 = vmax.f32 %v785_v56, 0.0 }
 0x15c   :  { %407 = vst.msk [vmem:[%s1873_s3 + $0x8] sm:$0x1] %vm406_vm0, %v403_v57  ;;  %902 = vst.msk [vmem:[%s1873_s3 + $0x18] sm:$0x1] %vm406_vm0, %v788_v58 }
 0x15d   :  { %405 = vst.msk [vmem:[%s1873_s3] sm:$0xff] %vm404_vm1, %v402_v59  ;;  %901 = vst.msk [vmem:[%s1873_s3 + $0x10] sm:$0xff] %vm404_vm1, %v787_v60 }

// kernel: conv_qnet_forward.6
= control target key start
LH: loop header
LB: loop body
LE: loop exit
PB: predicated region body
PF: predicated region fallthrough
CT: control target
= control target key end

     0   :  { %v1006_v0 = vmov 0.0|0.0   ;;  %v68_v17 = vlaneseq  ;;  %vm77_vm0 = vcmask 523264   ;;  %vm344_vm1 = vcmask 516096   ;;  %s1536_s1 = inlined_call_operand.vmem [shape: f32[3,192,64], index: 1, kind: input, shape index: {}]   ;;  %s1537_s0 = inlined_call_operand.vmem [shape: f32[2,3,192], index: 0, kind: input, shape index: {}]   ;;  %s1538_s2 = inlined_call_operand.vmem [shape: f32[1,64], index: 2, kind: input, shape index: {}]   ;;  %s1539_s3 = inlined_call_operand.vmem [shape: f32[2,1,64], index: 3, kind: output, shape index: {}]  }
   0x1   :  { %789 = vmatprep.subr.bf16.mxu0 %v1006_v0  ;;  %v682_v1 = vld [vmem:[%s1536_s1 + $0xc0] sm:$0xff]  ;;  %v683_v2 = vld [vmem:[%s1536_s1 + $0xc8] sm:$0xff]  ;;  %825 = vmatprep.subr.bf16.mxu1 %v1006_v0  ;;  %v684_v6 = vld [vmem:[%s1536_s1 + $0xd0] sm:$0xff] }
   0x2   :  { %v16_v3 = vld [vmem:[%s1536_s1] sm:$0xff]  ;;  %v1038_v4 = vpack.c.bf16 %v683_v2, %v682_v1  ;;  %v17_v5 = vld [vmem:[%s1536_s1 + $0x8] sm:$0xff]  ;;  %v685_v7 = vld [vmem:[%s1536_s1 + $0xd8] sm:$0xff]  ;;  %v69_v24 = vshrl.u32 %v68_v17, 7 }
   0x3   :  { %v1049_v8 = vpack.c.bf16 %v17_v5, %v16_v3  ;;  %v18_v9 = vld [vmem:[%s1536_s1 + $0x10] sm:$0xff]  ;;  %v19_v10 = vld [vmem:[%s1536_s1 + $0x18] sm:$0xff]  ;;  %v1058_v11 = vpack.c.bf16 %v685_v7, %v684_v6  ;;  %v686_v13 = vld [vmem:[%s1536_s1 + $0xe0] sm:$0xff] }
   0x4   :  { %791 = vmatpush1.bf16.msra.mxu0 %v1038_v4  ;;  %v1062_v12 = vpack.c.bf16 %v19_v10, %v18_v9  ;;  %v687_v14 = vld [vmem:[%s1536_s1 + $0xe8] sm:$0xff]  ;;  %v20_v15 = vld [vmem:[%s1536_s1 + $0x20] sm:$0xff]  ;;  %v688_v20 = vld [vmem:[%s1536_s1 + $0xf0] sm:$0xff]  ;;  %v1117_v31 = vsub.s32 1, %v69_v24  ;;  %v1195_v54 = vsub.s32 0, %v69_v24 }
   0x5   :  { %827 = vmatpush1.bf16.msra.mxu1 %v1049_v8  ;;  %792 = vmatprep.subr.bf16.mxu0 %v1006_v0  ;;  %v21_v16 = vld [vmem:[%s1536_s1 + $0x28] sm:$0xff]  ;;  %v1078_v18 = vpack.c.bf16 %v687_v14, %v686_v13  ;;  %v689_v21 = vld [vmem:[%s1536_s1 + $0xf8] sm:$0xff]  ;;  %v22_v22 = vld [vmem:[%s1536_s1 + $0x30] sm:$0xff] }
   0x6   :  { %828 = vmatprep.subr.bf16.mxu1 %v1006_v0  ;;  %v1082_v19 = vpack.c.bf16 %v21_v16, %v20_v15  ;;  %v23_v23 = vld [vmem:[%s1536_s1 + $0x38] sm:$0xff]  ;;  %v1098_v25 = vpack.c.bf16 %v689_v21, %v688_v20  ;;  %v690_v27 = vld [vmem:[%s1536_s1 + $0x100] sm:$0xff]  ;;  %v691_v28 = vld [vmem:[%s1536_s1 + $0x108] sm:$0xff] }
   0x7   :  { %v1102_v26 = vpack.c.bf16 %v23_v23, %v22_v22  ;;  %v24_v29 = vld [vmem:[%s1536_s1 + $0x40] sm:$0xff]  ;;  %v25_v30 = vld [vmem:[%s1536_s1 + $0x48] sm:$0xff]  ;;  %v1120_v32 = vpack.c.bf16 %v691_v28, %v690_v27  ;;  %v692_v33 = vld [vmem:[%s1536_s1 + $0x110] sm:$0xff] }
   0x8   :  { %794 = vmatpush1.bf16.msra.mxu0 %v1058_v11  ;;  %v693_v34 = vld [vmem:[%s1536_s1 + $0x118] sm:$0xff]  ;;  %v1130_v35 = vpack.c.bf16 %v25_v30, %v24_v29  ;;  %v1135_v36 = vld [vmem:[%s1537_s0 + $0x1] ss:$4 sm:$0x3]  ;;  %v26_v38 = vld [vmem:[%s1536_s1 + $0x50] sm:$0xff] }
   0x9   :  { %830 = vmatpush1.bf16.msra.mxu1 %v1062_v12  ;;  %795 = vmatprep.subr.bf16.mxu0 %v1006_v0  ;;  %v1140_v37 = vld [vmem:[%s1537_s0] ss:$4 sm:$0x3]  ;;  %v27_v39 = vld [vmem:[%s1536_s1 + $0x58] sm:$0xff]  ;;  %v75_v40 = vrot.slane %v1135_v36, %v1117_v31  ;;  %v1154_v42 = vpack.c.bf16 %v693_v34, %v692_v33  ;;  %v695_v45 = vld [vmem:[%s1536_s1 + $0x128] sm:$0xff] }
   0xa   :  { %831 = vmatprep.subr.bf16.mxu1 %v1006_v0  ;;  %v158_v41 = vrot.slane %v1140_v37, %v1117_v31  ;;  %v1159_v43 = vpack.c.bf16 %v27_v39, %v26_v38  ;;  %v694_v44 = vld [vmem:[%s1536_s1 + $0x120] sm:$0xff]  ;;  %v29_v47 = vld [vmem:[%s1536_s1 + $0x68] sm:$0xff]  ;;  %v696_v49 = vld [vmem:[%s1536_s1 + $0x130] sm:$0xff]  ;;  %v71_v39 = vrot.slane %v1135_v36, %v1195_v54 }
   0xb   :  { %706 = vmatprep.mubr.msk.f32.mxu0 %vm77_vm0, %v75_v40  ;;  %v28_v46 = vld [vmem:[%s1536_s1 + $0x60] sm:$0xff]  ;;  %v1176_v48 = vpack.c.bf16 %v695_v45, %v694_v44  ;;  %v697_v50 = vld [vmem:[%s1536_s1 + $0x138] sm:$0xff]  ;;  %v30_v52 = vld [vmem:[%s1536_s1 + $0x70] sm:$0xff] }
   0xc   :  { %797 = vmatpush1.bf16.msra.mxu0 %v1078_v18  ;;  %707 = vmatprep.mubr.msk.f32.mxu1 %vm77_vm0, %v158_v41  ;;  %v1186_v51 = vpack.c.bf16 %v29_v47, %v28_v46  ;;  %v31_v53 = vld [vmem:[%s1536_s1 + $0x78] sm:$0xff]  ;;  %v1197_v55 = vpack.c.bf16 %v697_v50, %v696_v49  ;;  %v1202_v56 = vld [vmem:[%s1537_s0 + $0x8] ss:$4 sm:$0x3]  ;;  %v698_v63 = vld [vmem:[%s1536_s1 + $0x140] sm:$0xff]  ;;  %v154_v41 = vrot.slane %v1140_v37, %v1195_v54 }
   0xd   :  { %833 = vmatpush1.bf16.msra.mxu1 %v1082_v19  ;;  %798 = vmatprep.subr.bf16.mxu0 %v1006_v0  ;;  %v1207_v57 = vld [vmem:[%s1537_s0 + $0xa] ss:$4 sm:$0x3]  ;;  %v488_v58 = vrot.slane %v1202_v56, %v1117_v31  ;;  %v484_v59 = vrot.slane %v1202_v56, %v1195_v54  ;;  %v1220_v62 = vpack.c.bf16 %v31_v53, %v30_v52  ;;  %v32_v2 = vld [vmem:[%s1536_s1 + $0x80] sm:$0xff]  ;;  %v700_v7 = vld [vmem:[%s1536_s1 + $0x150] sm:$0xff] }
   0xe   :  { %834 = vmatprep.subr.bf16.mxu1 %v1006_v0  ;;  %v596_v60 = vrot.slane %v1207_v57, %v1117_v31  ;;  %v592_v61 = vrot.slane %v1207_v57, %v1195_v54  ;;  %v699_v1 = vld [vmem:[%s1536_s1 + $0x148] sm:$0xff]  ;;  %v701_v9 = vld [vmem:[%s1536_s1 + $0x158] sm:$0xff]  ;;  %v34_v10 = vld [vmem:[%s1536_s1 + $0x90] sm:$0xff] }
   0xf   :  { %v33_v3 = vld [vmem:[%s1536_s1 + $0x88] sm:$0xff]  ;;  %v1236_v5 = vpack.c.bf16 %v699_v1, %v698_v63  ;;  %v35_v13 = vld [vmem:[%s1536_s1 + $0x98] sm:$0xff]  ;;  %v1256_v14 = vpack.c.bf16 %v701_v9, %v700_v7  ;;  %v702_v16 = vld [vmem:[%s1536_s1 + $0x160] sm:$0xff] }
  0x10   :  { %800 = vmatpush1.bf16.msra.mxu0 %v1098_v25  ;;  %v1240_v6 = vpack.c.bf16 %v33_v3, %v32_v2  ;;  %v1260_v15 = vpack.c.bf16 %v35_v13, %v34_v10  ;;  %v703_v17 = vld [vmem:[%s1536_s1 + $0x168] sm:$0xff]  ;;  %v36_v20 = vld [vmem:[%s1536_s1 + $0xa0] sm:$0xff]  ;;  %v704_v24 = vld [vmem:[%s1536_s1 + $0x170] sm:$0xff] }
  0x11   :  { %836 = vmatpush1.bf16.msra.mxu1 %v1102_v26  ;;  %801 = vmatprep.subr.bf16.mxu0 %v1006_v0  ;;  %v37_v21 = vld [vmem:[%s1536_s1 + $0xa8] sm:$0xff]  ;;  %v1276_v22 = vpack.c.bf16 %v703_v17, %v702_v16  ;;  %v705_v27 = vld [vmem:[%s1536_s1 + $0x178] sm:$0xff]  ;;  %v38_v28 = vld [vmem:[%s1536_s1 + $0xb0] sm:$0xff] }
  0x12   :  { %837 = vmatprep.subr.bf16.mxu1 %v1006_v0  ;;  %v1280_v23 = vpack.c.bf16 %v37_v21, %v36_v20  ;;  %v39_v29 = vld [vmem:[%s1536_s1 + $0xb8] sm:$0xff]  ;;  %v1296_v30 = vpack.c.bf16 %v705_v27, %v704_v24  ;;  %v709_v34 = vld [vmem:[%s1536_s1 + $0x180] sm:$0xff]  ;;  %v710_v38 = vld [vmem:[%s1536_s1 + $0x188] sm:$0xff] }
  0x13   :  { %v1300_v33 = vpack.c.bf16 %v39_v29, %v38_v28  ;;  %v1314_v40 = vld [vmem:[%s1537_s0 + $0x2] ss:$4 sm:$0x3]  ;;  %v1319_v44 = vpack.c.bf16 %v710_v38, %v709_v34  ;;  %v1324_v45 = vld [vmem:[%s1537_s0 + $0x9] ss:$4 sm:$0x3] }
  0x14   :  { %803 = vmatpush1.bf16.msra.mxu0 %v1120_v32  ;;  %v711_v36 = vld [vmem:[%s1536_s1 + $0x190] sm:$0xff]  ;;  %v712_v46 = vld [vmem:[%s1536_s1 + $0x198] sm:$0xff]  ;;  %v267_v37 = vrot.slane %v1314_v40, %v1117_v31  ;;  %v406_v47 = vrot.slane %v1324_v45, %v1117_v31  ;;  %v713_v50 = vld [vmem:[%s1536_s1 + $0x1a0] sm:$0xff] }
  0x15   :  { %839 = vmatpush1.bf16.msra.mxu1 %v1130_v35  ;;  %804 = vmatprep.subr.bf16.mxu0 %v1006_v0  ;;  %v1340_v49 = vpack.c.bf16 %v712_v46, %v711_v36  ;;  %v714_v52 = vld [vmem:[%s1536_s1 + $0x1a8] sm:$0xff]  ;;  %v716_v63 = vld [vmem:[%s1536_s1 + $0x1b8] sm:$0xff] }
  0x16   :  { %840 = vmatprep.subr.bf16.mxu1 %v1006_v0  ;;  %v1354_v53 = vpack.c.bf16 %v714_v52, %v713_v50  ;;  %v718_v2 = vld [vmem:[%s1536_s1 + $0x1c8] sm:$0xff]  ;;  %v720_v7 = vld [vmem:[%s1536_s1 + $0x1d8] sm:$0xff] }
  0x17   :  { %v722_v10 = vld [vmem:[%s1536_s1 + $0x1e8] sm:$0xff]  ;;  %v724_v16 = vld [vmem:[%s1536_s1 + $0x1f8] sm:$0xff] }
  0x18   :  { %806 = vmatpush1.bf16.msra.mxu0 %v1154_v42  ;;  %v726_v20 = vld [vmem:[%s1536_s1 + $0x208] sm:$0xff]  ;;  %v728_v24 = vld [vmem:[%s1536_s1 + $0x218] sm:$0xff] }
  0x19   :  { %842 = vmatpush1.bf16.msra.mxu1 %v1159_v43  ;;  %807 = vmatprep.subr.bf16.mxu0 %v1006_v0  ;;  %v730_v28 = vld [vmem:[%s1536_s1 + $0x228] sm:$0xff]  ;;  %v732_v34 = vld [vmem:[%s1536_s1 + $0x238] sm:$0xff] }
  0x1a   :  { %843 = vmatprep.subr.bf16.mxu1 %v1006_v0 }
  0x1c   :  { %809 = vmatpush1.bf16.msra.mxu0 %v1176_v48 }
  0x1d   :  { %845 = vmatpush1.bf16.msra.mxu1 %v1186_v51  ;;  %810 = vmatprep.subr.bf16.mxu0 %v1006_v0 }
  0x1e   :  { %846 = vmatprep.subr.bf16.mxu1 %v1006_v0 }
  0x20   :  { %812 = vmatpush1.bf16.msra.mxu0 %v1197_v55 }
  0x21   :  { %848 = vmatpush1.bf16.msra.mxu1 %v1220_v62  ;;  %813 = vmatprep.subr.bf16.mxu0 %v1006_v0 }
  0x22   :  { %849 = vmatprep.subr.bf16.mxu1 %v1006_v0 }
  0x24   :  { %815 = vmatpush1.bf16.msra.mxu0 %v1236_v5 }
  0x25   :  { %851 = vmatpush1.bf16.msra.mxu1 %v1240_v6  ;;  %816 = vmatprep.subr.bf16.mxu0 %v1006_v0 }
  0x26   :  { %852 = vmatprep.subr.bf16.mxu1 %v1006_v0 }
  0x28   :  { %818 = vmatpush1.bf16.msra.mxu0 %v1256_v14 }
  0x29   :  { %854 = vmatpush1.bf16.msra.mxu1 %v1260_v15  ;;  %819 = vmatprep.subr.bf16.mxu0 %v1006_v0 }
  0x2a   :  { %855 = vmatprep.subr.bf16.mxu1 %v1006_v0 }
  0x2c   :  { %821 = vmatpush1.bf16.msra.mxu0 %v1276_v22 }
  0x2d   :  { %857 = vmatpush1.bf16.msra.mxu1 %v1280_v23  ;;  %822 = vmatprep.subr.bf16.mxu0 %v1006_v0 }
  0x2e   :  { %858 = vmatprep.subr.bf16.mxu1 %v1006_v0 }
  0x30   :  { %824 = vmatpush1.bf16.msra.mxu0 %v1296_v30 }
  0x31   :  { %860 = vmatpush1.bf16.msra.mxu1 %v1300_v33  ;;  %861 = vmatprep.subr.bf16.mxu0 %v1006_v0 }
  0x32   :  { %897 = vmatprep.subr.bf16.mxu1 %v1006_v0 }
  0x33   :  { %145 = vmatmul.mubr.f32.vlgmr.msra.gmra.mrb[0].mxu0 %v71_v39  ;;  %v402_v39 = vrot.slane %v1324_v45, %v1195_v54 }
  0x34   :  { %227 = vmatmul.mubr.f32.vlgmr.msra.gmra.mrb[0].mxu1 %v154_v41  ;;  %863 = vmatpush1.bf16.msra.mxu0 %v1319_v44 }
  0x35   :  { %899 = vmatpush1.bf16.msra.mxu1 %v1038_v4  ;;  %864 = vmatprep.subr.bf16.mxu0 %v1006_v0  ;;  %v715_v4 = vld [vmem:[%s1536_s1 + $0x1b0] sm:$0xff] }
  0x36   :  { %900 = vmatprep.subr.bf16.mxu1 %v1006_v0  ;;  %733 = vmatprep.mubr.msk.f32.mxu0 %vm77_vm0, %v267_v37  ;;  %v1366_v1 = vpack.c.bf16 %v716_v63, %v715_v4 }
  0x37   :  { %760 = vmatprep.mubr.msk.f32.mxu1 %vm77_vm0, %v406_v47 }
  0x38   :  { %866 = vmatpush1.bf16.msra.mxu0 %v1340_v49 }
  0x39   :  { %902 = vmatpush1.bf16.msra.mxu1 %v1058_v11  ;;  %867 = vmatprep.subr.bf16.mxu0 %v1006_v0  ;;  %v717_v11 = vld [vmem:[%s1536_s1 + $0x1c0] sm:$0xff] }
  0x3a   :  { %903 = vmatprep.subr.bf16.mxu1 %v1006_v0  ;;  %v1378_v3 = vpack.c.bf16 %v718_v2, %v717_v11 }
  0x3c   :  { %869 = vmatpush1.bf16.msra.mxu0 %v1354_v53 }
  0x3d   :  { %905 = vmatpush1.bf16.msra.mxu1 %v1078_v18  ;;  %870 = vmatprep.subr.bf16.mxu0 %v1006_v0  ;;  %v719_v18 = vld [vmem:[%s1536_s1 + $0x1d0] sm:$0xff] }
  0x3e   :  { %906 = vmatprep.subr.bf16.mxu1 %v1006_v0  ;;  %v1390_v9 = vpack.c.bf16 %v720_v7, %v719_v18 }
  0x40   :  { %872 = vmatpush1.bf16.msra.mxu0 %v1366_v1 }
  0x41   :  { %908 = vmatpush1.bf16.msra.mxu1 %v1098_v25  ;;  %873 = vmatprep.subr.bf16.mxu0 %v1006_v0  ;;  %v721_v25 = vld [vmem:[%s1536_s1 + $0x1e0] sm:$0xff] }
  0x42   :  { %909 = vmatprep.subr.bf16.mxu1 %v1006_v0  ;;  %v1402_v13 = vpack.c.bf16 %v722_v10, %v721_v25 }
  0x44   :  { %875 = vmatpush1.bf16.msra.mxu0 %v1378_v3 }
  0x45   :  { %911 = vmatpush1.bf16.msra.mxu1 %v1120_v32  ;;  %876 = vmatprep.subr.bf16.mxu0 %v1006_v0  ;;  %v723_v32 = vld [vmem:[%s1536_s1 + $0x1f0] sm:$0xff] }
  0x46   :  { %912 = vmatprep.subr.bf16.mxu1 %v1006_v0  ;;  %v1414_v17 = vpack.c.bf16 %v724_v16, %v723_v32 }
  0x48   :  { %878 = vmatpush1.bf16.msra.mxu0 %v1390_v9 }
  0x49   :  { %914 = vmatpush1.bf16.msra.mxu1 %v1154_v42  ;;  %879 = vmatprep.subr.bf16.mxu0 %v1006_v0  ;;  %v725_v42 = vld [vmem:[%s1536_s1 + $0x200] sm:$0xff] }
  0x4a   :  { %915 = vmatprep.subr.bf16.mxu1 %v1006_v0  ;;  %v1426_v21 = vpack.c.bf16 %v726_v20, %v725_v42 }
  0x4c   :  { %881 = vmatpush1.bf16.msra.mxu0 %v1402_v13 }
  0x4d   :  { %917 = vmatpush1.bf16.msra.mxu1 %v1176_v48  ;;  %882 = vmatprep.subr.bf16.mxu0 %v1006_v0  ;;  %v727_v48 = vld [vmem:[%s1536_s1 + $0x210] sm:$0xff] }
  0x4e   :  { %918 = vmatprep.subr.bf16.mxu1 %v1006_v0  ;;  %v1438_v27 = vpack.c.bf16 %v728_v24, %v727_v48 }
  0x50   :  { %884 = vmatpush1.bf16.msra.mxu0 %v1414_v17 }
  0x51   :  { %920 = vmatpush1.bf16.msra.mxu1 %v1197_v55  ;;  %885 = vmatprep.subr.bf16.mxu0 %v1006_v0  ;;  %v729_v55 = vld [vmem:[%s1536_s1 + $0x220] sm:$0xff] }
  0x52   :  { %921 = vmatprep.subr.bf16.mxu1 %v1006_v0  ;;  %v892_v29 = vpack.c.bf16 %v730_v28, %v729_v55 }
  0x54   :  { %887 = vmatpush1.bf16.msra.mxu0 %v1426_v21 }
  0x55   :  { %923 = vmatpush1.bf16.msra.mxu1 %v1236_v5  ;;  %888 = vmatprep.subr.bf16.mxu0 %v1006_v0  ;;  %v731_v5 = vld [vmem:[%s1536_s1 + $0x230] sm:$0xff] }
  0x56   :  { %924 = vmatprep.subr.bf16.mxu1 %v1006_v0  ;;  %v895_v38 = vpack.c.bf16 %v732_v34, %v731_v5 }
  0x58   :  { %890 = vmatpush1.bf16.msra.mxu0 %v1438_v27 }
  0x59   :  { %926 = vmatpush1.bf16.msra.mxu1 %v1256_v14  ;;  %891 = vmatprep.subr.bf16.mxu0 %v1006_v0  ;;  %v263_v14 = vrot.slane %v1314_v40, %v1195_v54 }
  0x5a   :  { %927 = vmatprep.subr.bf16.mxu1 %v1006_v0 }
  0x5c   :  { %893 = vmatpush1.bf16.msra.mxu0 %v892_v29 }
  0x5d   :  { %929 = vmatpush1.bf16.msra.mxu1 %v1276_v22  ;;  %894 = vmatprep.subr.bf16.mxu0 %v1006_v0 }
  0x5e   :  { %930 = vmatprep.subr.bf16.mxu1 %v1006_v0 }
  0x60   :  { %896 = vmatpush1.bf16.msra.mxu0 %v895_v38 }
  0x61   :  { %932 = vmatpush1.bf16.msra.mxu1 %v1296_v30  ;;  %933 = vmatprep.subr.bf16.mxu0 %v1006_v0 }
  0x62   :  { %969 = vmatprep.subr.bf16.mxu1 %v1006_v0 }
  0x63   :  { %336 = vmatmul.mubr.f32.vlgmr.msra.gmra.mrb[2].mxu0 %v263_v14 }
  0x64   :  { %935 = vmatpush1.bf16.msra.mxu0 %v1049_v8  ;;  %475 = vmatmul.mubr.f32.vlgmr.msra.gmra.mrb[2].mxu1 %v402_v39 }
  0x65   :  { %971 = vmatpush1.bf16.msra.mxu1 %v1319_v44  ;;  %936 = vmatprep.subr.bf16.mxu0 %v1006_v0 }
  0x66   :  { %972 = vmatprep.subr.bf16.mxu1 %v1006_v0  ;;  %761 = vmatprep.mubr.msk.f32.mxu0 %vm77_vm0, %v488_v58 }
  0x67   :  { %787 = vmatprep.mubr.msk.f32.mxu1 %vm77_vm0, %v596_v60 }
  0x68   :  { %938 = vmatpush1.bf16.msra.mxu0 %v1062_v12 }
  0x69   :  { %974 = vmatpush1.bf16.msra.mxu1 %v1340_v49  ;;  %939 = vmatprep.subr.bf16.mxu0 %v1006_v0 }
  0x6a   :  { %975 = vmatprep.subr.bf16.mxu1 %v1006_v0 }
  0x6c   :  { %941 = vmatpush1.bf16.msra.mxu0 %v1082_v19 }
  0x6d   :  { %977 = vmatpush1.bf16.msra.mxu1 %v1354_v53  ;;  %942 = vmatprep.subr.bf16.mxu0 %v1006_v0 }
  0x6e   :  { %978 = vmatprep.subr.bf16.mxu1 %v1006_v0 }
  0x70   :  { %944 = vmatpush1.bf16.msra.mxu0 %v1102_v26 }
  0x71   :  { %980 = vmatpush1.bf16.msra.mxu1 %v1366_v1  ;;  %945 = vmatprep.subr.bf16.mxu0 %v1006_v0 }
  0x72   :  { %981 = vmatprep.subr.bf16.mxu1 %v1006_v0 }
  0x74   :  { %947 = vmatpush1.bf16.msra.mxu0 %v1130_v35 }
  0x75   :  { %983 = vmatpush1.bf16.msra.mxu1 %v1378_v3  ;;  %948 = vmatprep.subr.bf16.mxu0 %v1006_v0 }
  0x76   :  { %984 = vmatprep.subr.bf16.mxu1 %v1006_v0 }
  0x78   :  { %950 = vmatpush1.bf16.msra.mxu0 %v1159_v43 }
  0x79   :  { %986 = vmatpush1.bf16.msra.mxu1 %v1390_v9  ;;  %951 = vmatprep.subr.bf16.mxu0 %v1006_v0 }
  0x7a   :  { %987 = vmatprep.subr.bf16.mxu1 %v1006_v0 }
  0x7c   :  { %953 = vmatpush1.bf16.msra.mxu0 %v1186_v51 }
  0x7d   :  { %989 = vmatpush1.bf16.msra.mxu1 %v1402_v13  ;;  %954 = vmatprep.subr.bf16.mxu0 %v1006_v0 }
  0x7e   :  { %990 = vmatprep.subr.bf16.mxu1 %v1006_v0 }
  0x80   :  { %956 = vmatpush1.bf16.msra.mxu0 %v1220_v62 }
  0x81   :  { %992 = vmatpush1.bf16.msra.mxu1 %v1414_v17  ;;  %957 = vmatprep.subr.bf16.mxu0 %v1006_v0 }
  0x82   :  { %993 = vmatprep.subr.bf16.mxu1 %v1006_v0 }
  0x84   :  { %959 = vmatpush1.bf16.msra.mxu0 %v1240_v6 }
  0x85   :  { %995 = vmatpush1.bf16.msra.mxu1 %v1426_v21  ;;  %960 = vmatprep.subr.bf16.mxu0 %v1006_v0 }
  0x86   :  { %996 = vmatprep.subr.bf16.mxu1 %v1006_v0 }
  0x88   :  { %962 = vmatpush1.bf16.msra.mxu0 %v1260_v15 }
  0x89   :  { %998 = vmatpush1.bf16.msra.mxu1 %v1438_v27  ;;  %963 = vmatprep.subr.bf16.mxu0 %v1006_v0 }
  0x8a   :  { %999 = vmatprep.subr.bf16.mxu1 %v1006_v0 }
  0x8c   :  { %965 = vmatpush1.bf16.msra.mxu0 %v1280_v23 }
  0x8d   :  { %1001 = vmatpush1.bf16.msra.mxu1 %v892_v29  ;;  %966 = vmatprep.subr.bf16.mxu0 %v1006_v0 }
  0x8e   :  { %1002 = vmatprep.subr.bf16.mxu1 %v1006_v0  ;;  %v14_v0 = vld [vmem:[%s1538_s2] sm:$0x1] }
  0x90   :  { %968 = vmatpush1.bf16.msra.mxu0 %v1300_v33 }
  0x91   :  { %1004 = vmatpush1.bf16.msra.mxu1 %v895_v38 }
  0x93   :  { %557 = vmatmul.mubr.f32.vlgmr.msra.gmra.mrb[4].mxu0 %v484_v59 }
  0x94   :  { %665 = vmatmul.mubr.f32.vlgmr.msra.gmra.mrb[4].mxu1 %v592_v61 }
 0x106   :  { %v146_v8 = vpop.f32.mrb[0].mxu0 }
 0x107   :  { %v148_v12 = vpop.f32.mrb[1].mxu0  ;;  %v228_v19 = vpop.f32.mrb[0].mxu1 }
 0x108   :  { %v229_v26 = vadd.f32 %v228_v19, %v146_v8  ;;  %v230_v31 = vpop.f32.mrb[1].mxu1 }
 0x136   :  { %v337_v35 = vpop.f32.mrb[2].mxu0 }
 0x137   :  { %v341_v43 = vadd.f32 %v337_v35, %v229_v26  ;;  %v339_v51 = vpop.f32.mrb[3].mxu0  ;;  %v476_v58 = vpop.f32.mrb[2].mxu1 }
 0x138   :  { %v478_v60 = vpop.f32.mrb[3].mxu1 }
 0x139   :  { %v342_v56 = vadd.f32 %v341_v43, %v14_v0 }
 0x13b   :  { %v343_v59 = vmax.f32 %v342_v56, 0.0 }
 0x13d   :  { %345 = vst.msk [vmem:[%s1539_s3] sm:$0x1] %vm344_vm1, %v343_v59 }
 0x166   :  { %v558_v54 = vpop.f32.mrb[4].mxu0 }
 0x167   :  { %v559_v57 = vadd.f32 %v558_v54, %v476_v58  ;;  %v560_v61 = vpop.f32.mrb[5].mxu0  ;;  %v666_v62 = vpop.f32.mrb[4].mxu1 }
 0x168   :  { %v668_v6 = vpop.f32.mrb[5].mxu1 }
 0x169   :  { %v670_v15 = vadd.f32 %v666_v62, %v559_v57 }
 0x16b   :  { %v671_v22 = vadd.f32 %v670_v15, %v14_v0 }
 0x16d   :  { %v672_v23 = vmax.f32 %v671_v22, 0.0 }
 0x16f   :  { %788 = vst.msk [vmem:[%s1539_s3 + $0x1] sm:$0x1] %vm344_vm1, %v672_v23 }

// kernel: conv_qnet_forward.7
= control target key start
LH: loop header
LB: loop body
LE: loop exit
PB: predicated region body
PF: predicated region fallthrough
CT: control target
= control target key end

     0   :  { %v1332_v3 = vmov 0.0   ;;  %vm93_vm0 = vcmask 523264   ;;  %vm967_vm1 = vcmask 1041408   ;;  %s1986_s1 = inlined_call_operand.vmem [shape: f32[64,1024], index: 1, kind: input, shape index: {}]   ;;  %s1987_s0 = inlined_call_operand.vmem [shape: f32[2,64], index: 0, kind: input, shape index: {}]   ;;  %s1988_s3 = inlined_call_operand.vmem [shape: f32[1024,128], index: 3, kind: input, shape index: {}]   ;;  %s1989_s2 = inlined_call_operand.vmem [shape: f32[1,1024], index: 2, kind: input, shape index: {}]   ;;  %s1990_s4 = inlined_call_operand.vmem [shape: f32[1,128], index: 4, kind: input, shape index: {}]   ;;  %s1991_s5 = inlined_call_operand.vmem [shape: f32[2,128], index: 5, kind: output, shape index: {}]  }
   0x1   :  { %v30_v0 = vld [vmem:[%s1986_s1 + $0x8] sm:$0xff]  ;;  %v32_v2 = vld [vmem:[%s1986_s1 + $0x18] sm:$0xff]  ;;  %161 = vmatprep.mubr.f32.mxu0 %v1332_v3  ;;  %232 = vmatprep.mubr.f32.mxu1 %v1332_v3  ;;  %v29_v6 = vld [vmem:[%s1986_s1] sm:$0xff] }
   0x2   :  { %v38_v1 = vld [vmem:[%s1986_s1 + $0x48] sm:$0xff]  ;;  %v40_v5 = vld [vmem:[%s1986_s1 + $0x58] sm:$0xff]  ;;  %v37_v7 = vld [vmem:[%s1986_s1 + $0x40] sm:$0xff] }
   0x3   :  { %v1135_v4 = vpack.c.bf16 %v38_v1, %v30_v0  ;;  %v1151_v8 = vpack.c.bf16 %v40_v5, %v32_v2  ;;  %v1137_v9 = vpack.c.bf16 %v37_v7, %v29_v6  ;;  %v31_v10 = vld [vmem:[%s1986_s1 + $0x10] sm:$0xff]  ;;  %v46_v12 = vld [vmem:[%s1986_s1 + $0x88] sm:$0xff]  ;;  %v48_v15 = vld [vmem:[%s1986_s1 + $0x98] sm:$0xff] }
   0x4   :  { %v39_v11 = vld [vmem:[%s1986_s1 + $0x50] sm:$0xff]  ;;  %v54_v14 = vld [vmem:[%s1986_s1 + $0xc8] sm:$0xff]  ;;  %v56_v16 = vld [vmem:[%s1986_s1 + $0xd8] sm:$0xff] }
   0x5   :  { %1136 = vmatprep.subr.bf16.mxu0 %v1135_v4  ;;  %v1153_v13 = vpack.c.bf16 %v39_v11, %v31_v10  ;;  %1152 = vmatprep.subr.bf16.mxu1 %v1151_v8  ;;  %v1139_v17 = vpack.c.bf16 %v54_v14, %v46_v12  ;;  %v1155_v18 = vpack.c.bf16 %v56_v16, %v48_v15  ;;  %v45_v19 = vld [vmem:[%s1986_s1 + $0x80] sm:$0xff]  ;;  %v47_v21 = vld [vmem:[%s1986_s1 + $0x90] sm:$0xff]  ;;  %v62_v24 = vld [vmem:[%s1986_s1 + $0x108] sm:$0xff] }
   0x6   :  { %1138 = vmatpush1.bf16.msra.mxu0 %v1137_v9  ;;  %v53_v20 = vld [vmem:[%s1986_s1 + $0xc0] sm:$0xff]  ;;  %v55_v23 = vld [vmem:[%s1986_s1 + $0xd0] sm:$0xff]  ;;  %v70_v25 = vld [vmem:[%s1986_s1 + $0x148] sm:$0xff] }
   0x7   :  { %1154 = vmatpush1.bf16.msra.mxu1 %v1153_v13  ;;  %v1141_v22 = vpack.c.bf16 %v53_v20, %v45_v19  ;;  %1140 = vmatprep.subr.bf16.mxu0 %v1139_v17  ;;  %v1157_v26 = vpack.c.bf16 %v55_v23, %v47_v21  ;;  %v1143_v27 = vpack.c.bf16 %v70_v25, %v62_v24  ;;  %v64_v28 = vld [vmem:[%s1986_s1 + $0x118] sm:$0xff]  ;;  %v61_v30 = vld [vmem:[%s1986_s1 + $0x100] sm:$0xff]  ;;  %v63_v33 = vld [vmem:[%s1986_s1 + $0x110] sm:$0xff] }
   0x8   :  { %1156 = vmatprep.subr.bf16.mxu1 %v1155_v18  ;;  %v72_v29 = vld [vmem:[%s1986_s1 + $0x158] sm:$0xff]  ;;  %v69_v32 = vld [vmem:[%s1986_s1 + $0x140] sm:$0xff]  ;;  %v71_v34 = vld [vmem:[%s1986_s1 + $0x150] sm:$0xff] }
   0x9   :  { %v1159_v31 = vpack.c.bf16 %v72_v29, %v64_v28  ;;  %v1145_v35 = vpack.c.bf16 %v69_v32, %v61_v30  ;;  %v78_v36 = vld [vmem:[%s1986_s1 + $0x188] sm:$0xff]  ;;  %v80_v38 = vld [vmem:[%s1986_s1 + $0x198] sm:$0xff]  ;;  %v1161_v39 = vpack.c.bf16 %v71_v34, %v63_v33  ;;  %v77_v42 = vld [vmem:[%s1986_s1 + $0x180] sm:$0xff] }
   0xa   :  { %1142 = vmatpush1.bf16.msra.mxu0 %v1141_v22  ;;  %v86_v37 = vld [vmem:[%s1986_s1 + $0x1c8] sm:$0xff]  ;;  %v88_v41 = vld [vmem:[%s1986_s1 + $0x1d8] sm:$0xff]  ;;  %v85_v43 = vld [vmem:[%s1986_s1 + $0x1c0] sm:$0xff] }
   0xb   :  { %1158 = vmatpush1.bf16.msra.mxu1 %v1157_v26  ;;  %1144 = vmatprep.subr.bf16.mxu0 %v1143_v27  ;;  %v1147_v40 = vpack.c.bf16 %v86_v37, %v78_v36  ;;  %v1163_v44 = vpack.c.bf16 %v88_v41, %v80_v38  ;;  %v79_v45 = vld [vmem:[%s1986_s1 + $0x190] sm:$0xff]  ;;  %v34_v47 = vld [vmem:[%s1986_s1 + $0x28] sm:$0xff]  ;;  %v36_v49 = vld [vmem:[%s1986_s1 + $0x38] sm:$0xff]  ;;  %v1149_v50 = vpack.c.bf16 %v85_v43, %v77_v42 }
   0xc   :  { %1160 = vmatprep.subr.bf16.mxu1 %v1159_v31  ;;  %v87_v46 = vld [vmem:[%s1986_s1 + $0x1d0] sm:$0xff]  ;;  %v42_v48 = vld [vmem:[%s1986_s1 + $0x68] sm:$0xff]  ;;  %v44_v51 = vld [vmem:[%s1986_s1 + $0x78] sm:$0xff] }
   0xd   :  { %v1165_v52 = vpack.c.bf16 %v87_v46, %v79_v45  ;;  %v1167_v53 = vpack.c.bf16 %v42_v48, %v34_v47  ;;  %v33_v54 = vld [vmem:[%s1986_s1 + $0x20] sm:$0xff]  ;;  %v35_v56 = vld [vmem:[%s1986_s1 + $0x30] sm:$0xff]  ;;  %v1183_v57 = vpack.c.bf16 %v44_v51, %v36_v49  ;;  %v50_v59 = vld [vmem:[%s1986_s1 + $0xa8] sm:$0xff] }
   0xe   :  { %1146 = vmatpush1.bf16.msra.mxu0 %v1145_v35  ;;  %v41_v55 = vld [vmem:[%s1986_s1 + $0x60] sm:$0xff]  ;;  %v43_v58 = vld [vmem:[%s1986_s1 + $0x70] sm:$0xff]  ;;  %v58_v60 = vld [vmem:[%s1986_s1 + $0xe8] sm:$0xff] }
   0xf   :  { %1162 = vmatpush1.bf16.msra.mxu1 %v1161_v39  ;;  %1148 = vmatprep.subr.bf16.mxu0 %v1147_v40  ;;  %v52_v61 = vld [vmem:[%s1986_s1 + $0xb8] sm:$0xff]  ;;  %v1502_v63 = vld [vmem:[%s1987_s0] sm:$0x3]  ;;  %v1169_v0 = vpack.c.bf16 %v41_v55, %v33_v54  ;;  %v1185_v1 = vpack.c.bf16 %v43_v58, %v35_v56  ;;  %v1171_v2 = vpack.c.bf16 %v58_v60, %v50_v59  ;;  %v51_v6 = vld [vmem:[%s1986_s1 + $0xb0] sm:$0xff] }
  0x10   :  { %1164 = vmatprep.subr.bf16.mxu1 %v1163_v44  ;;  %v60_v62 = vld [vmem:[%s1986_s1 + $0xf8] sm:$0xff]  ;;  %v49_v4 = vld [vmem:[%s1986_s1 + $0xa0] sm:$0xff]  ;;  %v59_v8 = vld [vmem:[%s1986_s1 + $0xf0] sm:$0xff] }
  0x11   :  { %v57_v5 = vld [vmem:[%s1986_s1 + $0xe0] sm:$0xff]  ;;  %v1187_v7 = vpack.c.bf16 %v60_v62, %v52_v61  ;;  %v66_v9 = vld [vmem:[%s1986_s1 + $0x128] sm:$0xff]  ;;  %v68_v11 = vld [vmem:[%s1986_s1 + $0x138] sm:$0xff]  ;;  %v1189_v14 = vpack.c.bf16 %v59_v8, %v51_v6 }
  0x12   :  { %1150 = vmatpush1.bf16.msra.mxu0 %v1149_v50  ;;  %v74_v10 = vld [vmem:[%s1986_s1 + $0x168] sm:$0xff]  ;;  %v76_v12 = vld [vmem:[%s1986_s1 + $0x178] sm:$0xff]  ;;  %v1173_v13 = vpack.c.bf16 %v57_v5, %v49_v4  ;;  %v65_v16 = vld [vmem:[%s1986_s1 + $0x120] sm:$0xff] }
  0x13   :  { %1166 = vmatpush1.bf16.msra.mxu1 %v1165_v52  ;;  %1168 = vmatprep.subr.bf16.mxu0 %v1167_v53  ;;  %v1175_v15 = vpack.c.bf16 %v74_v10, %v66_v9  ;;  %v73_v17 = vld [vmem:[%s1986_s1 + $0x160] sm:$0xff]  ;;  %v67_v18 = vld [vmem:[%s1986_s1 + $0x130] sm:$0xff]  ;;  %v1191_v19 = vpack.c.bf16 %v76_v12, %v68_v11  ;;  %v82_v21 = vld [vmem:[%s1986_s1 + $0x1a8] sm:$0xff] }
  0x14   :  { %1184 = vmatprep.subr.bf16.mxu1 %v1183_v57  ;;  %v75_v20 = vld [vmem:[%s1986_s1 + $0x170] sm:$0xff]  ;;  %v90_v22 = vld [vmem:[%s1986_s1 + $0x1e8] sm:$0xff]  ;;  %v84_v23 = vld [vmem:[%s1986_s1 + $0x1b8] sm:$0xff]  ;;  %v1177_v25 = vpack.c.bf16 %v73_v17, %v65_v16 }
  0x15   :  { %990 = vmatmul.mubr.msk.f32.vlgmr.msra.gmra.mrb[0].mxu0 %vm93_vm0, %v1502_v63  ;;  %v92_v24 = vld [vmem:[%s1986_s1 + $0x1f8] sm:$0xff]  ;;  %v1193_v26 = vpack.c.bf16 %v75_v20, %v67_v18  ;;  %v1179_v27 = vpack.c.bf16 %v90_v22, %v82_v21  ;;  %v81_v28 = vld [vmem:[%s1986_s1 + $0x1a0] sm:$0xff]  ;;  %v83_v30 = vld [vmem:[%s1986_s1 + $0x1b0] sm:$0xff] }
  0x16   :  { %991 = vmatmul.mubr.msk.f32.vlgmr.msra.gmra.mrb[0].mxu1 %vm93_vm0, %v1502_v63  ;;  %1170 = vmatpush1.bf16.msra.mxu0 %v1169_v0  ;;  %v89_v29 = vld [vmem:[%s1986_s1 + $0x1e0] sm:$0xff]  ;;  %v91_v31 = vld [vmem:[%s1986_s1 + $0x1f0] sm:$0xff]  ;;  %v525_v33 = vld [vmem:[%s1988_s3 + $0x88] sm:$0xff] }
  0x17   :  { %1186 = vmatpush1.bf16.msra.mxu1 %v1185_v1  ;;  %1172 = vmatprep.subr.bf16.mxu0 %v1171_v2  ;;  %v524_v32 = vld [vmem:[%s1988_s3 + $0x80] sm:$0xff]  ;;  %v557_v35 = vld [vmem:[%s1988_s3 + $0x188] sm:$0xff]  ;;  %v1181_v36 = vpack.c.bf16 %v89_v29, %v81_v28  ;;  %v1197_v37 = vpack.c.bf16 %v91_v31, %v83_v30  ;;  %v526_v44 = vld [vmem:[%s1988_s3 + $0x90] sm:$0xff] }
  0x18   :  { %1188 = vmatprep.subr.bf16.mxu1 %v1187_v7  ;;  %303 = vmatprep.mubr.f32.mxu0 %v1332_v3  ;;  %v556_v34 = vld [vmem:[%s1988_s3 + $0x180] sm:$0xff]  ;;  %v1199_v38 = vpack.c.bf16 %v525_v33, %v524_v32  ;;  %v509_v40 = vld [vmem:[%s1988_s3 + $0x8] sm:$0xff]  ;;  %v527_v45 = vld [vmem:[%s1988_s3 + $0x98] sm:$0xff] }
  0x19   :  { %374 = vmatprep.mubr.f32.mxu1 %v1332_v3  ;;  %v1195_v3 = vpack.c.bf16 %v92_v24, %v84_v23  ;;  %v508_v39 = vld [vmem:[%s1988_s3] sm:$0xff]  ;;  %v1231_v42 = vpack.c.bf16 %v557_v35, %v556_v34  ;;  %v541_v43 = vld [vmem:[%s1988_s3 + $0x108] sm:$0xff]  ;;  %v558_v46 = vld [vmem:[%s1988_s3 + $0x190] sm:$0xff]  ;;  %v1203_v50 = vpack.c.bf16 %v527_v45, %v526_v44 }
  0x1a   :  { %1174 = vmatpush1.bf16.msra.mxu0 %v1173_v13  ;;  %v540_v41 = vld [vmem:[%s1988_s3 + $0x100] sm:$0xff]  ;;  %v559_v47 = vld [vmem:[%s1988_s3 + $0x198] sm:$0xff]  ;;  %v1201_v48 = vpack.c.bf16 %v509_v40, %v508_v39  ;;  %v510_v51 = vld [vmem:[%s1988_s3 + $0x10] sm:$0xff] }
  0x1b   :  { %1190 = vmatpush1.bf16.msra.mxu1 %v1189_v14  ;;  %1176 = vmatprep.subr.bf16.mxu0 %v1175_v15  ;;  %v1233_v49 = vpack.c.bf16 %v541_v43, %v540_v41  ;;  %v511_v52 = vld [vmem:[%s1988_s3 + $0x18] sm:$0xff]  ;;  %v542_v53 = vld [vmem:[%s1988_s3 + $0x110] sm:$0xff]  ;;  %v1235_v54 = vpack.c.bf16 %v559_v47, %v558_v46  ;;  %v528_v56 = vld [vmem:[%s1988_s3 + $0xa0] sm:$0xff] }
  0x1c   :  { %1192 = vmatprep.subr.bf16.mxu1 %v1191_v19  ;;  %v543_v55 = vld [vmem:[%s1988_s3 + $0x118] sm:$0xff]  ;;  %v529_v57 = vld [vmem:[%s1988_s3 + $0xa8] sm:$0xff]  ;;  %v560_v58 = vld [vmem:[%s1988_s3 + $0x1a0] sm:$0xff]  ;;  %v1205_v60 = vpack.c.bf16 %v511_v52, %v510_v51 }
  0x1d   :  { %v561_v59 = vld [vmem:[%s1988_s3 + $0x1a8] sm:$0xff]  ;;  %v1237_v61 = vpack.c.bf16 %v543_v55, %v542_v53  ;;  %v1207_v62 = vpack.c.bf16 %v529_v57, %v528_v56  ;;  %v512_v0 = vld [vmem:[%s1988_s3 + $0x20] sm:$0xff]  ;;  %v530_v5 = vld [vmem:[%s1988_s3 + $0xb0] sm:$0xff] }
  0x1e   :  { %1178 = vmatpush1.bf16.msra.mxu0 %v1177_v25  ;;  %v513_v1 = vld [vmem:[%s1988_s3 + $0x28] sm:$0xff]  ;;  %v544_v2 = vld [vmem:[%s1988_s3 + $0x120] sm:$0xff]  ;;  %v531_v6 = vld [vmem:[%s1988_s3 + $0xb8] sm:$0xff] }
  0x1f   :  { %1194 = vmatpush1.bf16.msra.mxu1 %v1193_v26  ;;  %1180 = vmatprep.subr.bf16.mxu0 %v1179_v27  ;;  %v545_v4 = vld [vmem:[%s1988_s3 + $0x128] sm:$0xff]  ;;  %v562_v7 = vld [vmem:[%s1988_s3 + $0x1b0] sm:$0xff]  ;;  %v563_v8 = vld [vmem:[%s1988_s3 + $0x1b8] sm:$0xff]  ;;  %v1209_v9 = vpack.c.bf16 %v513_v1, %v512_v0  ;;  %v1211_v11 = vpack.c.bf16 %v531_v6, %v530_v5 }
  0x20   :  { %1196 = vmatprep.subr.bf16.mxu1 %v1195_v3  ;;  %v1241_v10 = vpack.c.bf16 %v545_v4, %v544_v2  ;;  %v514_v12 = vld [vmem:[%s1988_s3 + $0x30] sm:$0xff]  ;;  %v515_v13 = vld [vmem:[%s1988_s3 + $0x38] sm:$0xff]  ;;  %v1243_v14 = vpack.c.bf16 %v563_v8, %v562_v7  ;;  %v532_v19 = vld [vmem:[%s1988_s3 + $0xc0] sm:$0xff] }
  0x21   :  { %v546_v15 = vld [vmem:[%s1988_s3 + $0x130] sm:$0xff]  ;;  %v547_v16 = vld [vmem:[%s1988_s3 + $0x138] sm:$0xff]  ;;  %v1213_v17 = vpack.c.bf16 %v515_v13, %v514_v12  ;;  %v533_v20 = vld [vmem:[%s1988_s3 + $0xc8] sm:$0xff] }
  0x22   :  { %1182 = vmatpush1.bf16.msra.mxu0 %v1181_v36  ;;  %v1245_v18 = vpack.c.bf16 %v547_v16, %v546_v15  ;;  %v1215_v21 = vpack.c.bf16 %v533_v20, %v532_v19  ;;  %v516_v22 = vld [vmem:[%s1988_s3 + $0x40] sm:$0xff]  ;;  %v517_v23 = vld [vmem:[%s1988_s3 + $0x48] sm:$0xff]  ;;  %v534_v3 = vld [vmem:[%s1988_s3 + $0xd0] sm:$0xff] }
  0x23   :  { %1198 = vmatpush1.bf16.msra.mxu1 %v1197_v37  ;;  %1200 = vmatprep.subr.bf16.mxu0 %v1199_v38  ;;  %v1217_v24 = vpack.c.bf16 %v517_v23, %v516_v22  ;;  %v564_v25 = vld [vmem:[%s1988_s3 + $0x1c0] sm:$0xff]  ;;  %v565_v26 = vld [vmem:[%s1988_s3 + $0x1c8] sm:$0xff]  ;;  %v535_v31 = vld [vmem:[%s1988_s3 + $0xd8] sm:$0xff] }
  0x24   :  { %1232 = vmatprep.subr.bf16.mxu1 %v1231_v42  ;;  %v1247_v27 = vpack.c.bf16 %v565_v26, %v564_v25  ;;  %v548_v28 = vld [vmem:[%s1988_s3 + $0x140] sm:$0xff]  ;;  %v549_v29 = vld [vmem:[%s1988_s3 + $0x148] sm:$0xff]  ;;  %v1219_v32 = vpack.c.bf16 %v535_v31, %v534_v3  ;;  %v518_v33 = vld [vmem:[%s1988_s3 + $0x50] sm:$0xff] }
  0x25   :  { %992 = vmatmul.mubr.msk.f32.vlgmr.msra.gmra.mrb[2].mxu0 %vm93_vm0, %v1502_v63  ;;  %v1249_v30 = vpack.c.bf16 %v549_v29, %v548_v28  ;;  %v519_v34 = vld [vmem:[%s1988_s3 + $0x58] sm:$0xff]  ;;  %v566_v36 = vld [vmem:[%s1988_s3 + $0x1d0] sm:$0xff]  ;;  %v536_v42 = vld [vmem:[%s1988_s3 + $0xe0] sm:$0xff] }
  0x26   :  { %993 = vmatmul.mubr.msk.f32.vlgmr.msra.gmra.mrb[2].mxu1 %vm93_vm0, %v1502_v63  ;;  %1202 = vmatpush3.bf16.msra.mxu0 %v1201_v48  ;;  %v1239_v63 = vpack.c.bf16 %v561_v59, %v560_v58  ;;  %v1221_v35 = vpack.c.bf16 %v519_v34, %v518_v33  ;;  %v567_v37 = vld [vmem:[%s1988_s3 + $0x1d8] sm:$0xff]  ;;  %v550_v39 = vld [vmem:[%s1988_s3 + $0x150] sm:$0xff]  ;;  %v537_v43 = vld [vmem:[%s1988_s3 + $0xe8] sm:$0xff] }
  0x27   :  { %1234 = vmatpush3.bf16.msra.mxu1 %v1233_v49  ;;  %1204 = vmatprep.subr.bf16.mxu0 %v1203_v50  ;;  %v1251_v38 = vpack.c.bf16 %v567_v37, %v566_v36  ;;  %v551_v40 = vld [vmem:[%s1988_s3 + $0x158] sm:$0xff]  ;;  %v1223_v44 = vpack.c.bf16 %v537_v43, %v536_v42  ;;  %v520_v45 = vld [vmem:[%s1988_s3 + $0x60] sm:$0xff]  ;;  %v521_v46 = vld [vmem:[%s1988_s3 + $0x68] sm:$0xff] }
  0x28   :  { %1236 = vmatprep.subr.bf16.mxu1 %v1235_v54  ;;  %v1253_v41 = vpack.c.bf16 %v551_v40, %v550_v39  ;;  %v1225_v47 = vpack.c.bf16 %v521_v46, %v520_v45  ;;  %v568_v48 = vld [vmem:[%s1988_s3 + $0x1e0] sm:$0xff]  ;;  %v569_v49 = vld [vmem:[%s1988_s3 + $0x1e8] sm:$0xff]  ;;  %v538_v54 = vld [vmem:[%s1988_s3 + $0xf0] sm:$0xff] }
  0x29   :  { %v1255_v50 = vpack.c.bf16 %v569_v49, %v568_v48  ;;  %v552_v51 = vld [vmem:[%s1988_s3 + $0x160] sm:$0xff]  ;;  %v553_v52 = vld [vmem:[%s1988_s3 + $0x168] sm:$0xff]  ;;  %v539_v55 = vld [vmem:[%s1988_s3 + $0xf8] sm:$0xff] }
  0x2a   :  { %1206 = vmatpush3.bf16.msra.mxu0 %v1205_v60  ;;  %v1257_v53 = vpack.c.bf16 %v553_v52, %v552_v51  ;;  %v1227_v56 = vpack.c.bf16 %v539_v55, %v538_v54  ;;  %v522_v57 = vld [vmem:[%s1988_s3 + $0x70] sm:$0xff]  ;;  %v523_v58 = vld [vmem:[%s1988_s3 + $0x78] sm:$0xff]  ;;  %v589_v4 = vld [vmem:[%s1988_s3 + $0x288] sm:$0xff] }
  0x2b   :  { %1238 = vmatpush3.bf16.msra.mxu1 %v1237_v61  ;;  %1208 = vmatprep.subr.bf16.mxu0 %v1207_v62  ;;  %v570_v59 = vld [vmem:[%s1988_s3 + $0x1f0] sm:$0xff]  ;;  %v1229_v60 = vpack.c.bf16 %v523_v58, %v522_v57  ;;  %v571_v61 = vld [vmem:[%s1988_s3 + $0x1f8] sm:$0xff]  ;;  %v620_v6 = vld [vmem:[%s1988_s3 + $0x380] sm:$0xff] }
  0x2c   :  { %1240 = vmatprep.subr.bf16.mxu1 %v1239_v63  ;;  %v554_v62 = vld [vmem:[%s1988_s3 + $0x170] sm:$0xff]  ;;  %v555_v0 = vld [vmem:[%s1988_s3 + $0x178] sm:$0xff]  ;;  %v1259_v1 = vpack.c.bf16 %v571_v61, %v570_v59  ;;  %v588_v63 = vld [vmem:[%s1988_s3 + $0x280] sm:$0xff] }
  0x2d   :  { %v1261_v2 = vpack.c.bf16 %v555_v0, %v554_v62  ;;  %v1263_v5 = vpack.c.bf16 %v589_v4, %v588_v63  ;;  %v621_v7 = vld [vmem:[%s1988_s3 + $0x388] sm:$0xff]  ;;  %v590_v51 = vld [vmem:[%s1988_s3 + $0x290] sm:$0xff]  ;;  %v591_v52 = vld [vmem:[%s1988_s3 + $0x298] sm:$0xff] }
  0x2e   :  { %1210 = vmatpush3.bf16.msra.mxu0 %v1209_v9  ;;  %v1295_v8 = vpack.c.bf16 %v621_v7, %v620_v6  ;;  %v394_v9 = vlaneseq  ;;  %v573_v48 = vld [vmem:[%s1988_s3 + $0x208] sm:$0xff]  ;;  %v604_v55 = vld [vmem:[%s1988_s3 + $0x300] sm:$0xff]  ;;  %v623_v61 = vld [vmem:[%s1988_s3 + $0x398] sm:$0xff]  ;;  %v1267_v62 = vpack.c.bf16 %v591_v52, %v590_v51 }
  0x2f   :  { %1242 = vmatpush3.bf16.msra.mxu1 %v1241_v10  ;;  %1212 = vmatprep.subr.bf16.mxu0 %v1211_v11  ;;  %v1333_v11 = vmov 1983009808   ;;  %v574_v0 = vld [vmem:[%s1988_s3 + $0x210] sm:$0xff]  ;;  %v593_v6 = vld [vmem:[%s1988_s3 + $0x2a8] sm:$0xff]  ;;  %v580_v51 = vld [vmem:[%s1988_s3 + $0x240] sm:$0xff] }
  0x30   :  { %1244 = vmatprep.subr.bf16.mxu1 %v1243_v14  ;;  %v395_v10 = vshrl.u32 %v394_v9, 7  ;;  %v392_v12 = vunpack.c.l.s4 %v1333_v11  ;;  %v581_v52 = vld [vmem:[%s1988_s3 + $0x248] sm:$0xff] }
  0x32   :  { %1214 = vmatpush3.bf16.msra.mxu0 %v1213_v17  ;;  %v438_v13 = vsub.s32 0, %v395_v10  ;;  %v442_v14 = vsub.s32 1, %v395_v10  ;;  %v446_v15 = vsub.s32 2, %v395_v10  ;;  %v450_v16 = vsub.s32 3, %v395_v10  ;;  %v434_v17 = vld [vmem:[%s1989_s2] sm:$0xff] }
  0x33   :  { %1246 = vmatpush3.bf16.msra.mxu1 %v1245_v18  ;;  %1216 = vmatprep.subr.bf16.mxu0 %v1215_v21  ;;  %v393_v18 = vunpack.c.0.s8 %v392_v12  ;;  %v458_v37 = vsub.s32 5, %v395_v10  ;;  %v466_v39 = vsub.s32 7, %v395_v10  ;;  %v606_v12 = vld [vmem:[%s1988_s3 + $0x310] sm:$0xff] }
  0x34   :  { %1248 = vmatprep.subr.bf16.mxu1 %v1247_v27  ;;  %v439_v19 = vrot.slane %v434_v17, %v438_v13  ;;  %v443_v20 = vrot.slane %v434_v17, %v442_v14  ;;  %v447_v21 = vrot.slane %v434_v17, %v446_v15  ;;  %v451_v22 = vrot.slane %v434_v17, %v450_v16  ;;  %v607_v13 = vld [vmem:[%s1988_s3 + $0x318] sm:$0xff] }
  0x35   :  { %v1781_v23 = vsub.s32 %v393_v18, %v395_v10  ;;  %v459_v43 = vrot.slane %v434_v17, %v458_v37  ;;  %v467_v45 = vrot.slane %v434_v17, %v466_v39  ;;  %v625_v18 = vld [vmem:[%s1988_s3 + $0x3a8] sm:$0xff]  ;;  %v578_v37 = vld [vmem:[%s1988_s3 + $0x230] sm:$0xff] }
  0x36   :  { %1218 = vmatpush3.bf16.msra.mxu0 %v1217_v24  ;;  %v468_v24 = vcombine.low %v439_v19, %v443_v20  ;;  %v469_v25 = vcombine.low %v447_v21, %v451_v22  ;;  %v576_v21 = vld [vmem:[%s1988_s3 + $0x220] sm:$0xff]  ;;  %v577_v22 = vld [vmem:[%s1988_s3 + $0x228] sm:$0xff] }
  0x37   :  { %1250 = vmatpush3.bf16.msra.mxu1 %v1249_v30  ;;  %1220 = vmatprep.subr.bf16.mxu0 %v1219_v32 }
  0x38   :  { %1252 = vmatprep.subr.bf16.mxu1 %v1251_v38  ;;  %v476_v27 = vrot.slane %v468_v24, %v1781_v23  ;;  %v483_v28 = vrot.slane %v469_v25, %v1781_v23  ;;  %v462_v38 = vsub.s32 6, %v395_v10  ;;  %v1301_v25 = vpack.c.bf16 %v607_v13, %v606_v12  ;;  %v632_v13 = vld [vmem:[%s1988_s3 + $0x3e0] sm:$0xff] }
  0x3a   :  { %1222 = vmatpush3.bf16.msra.mxu0 %v1221_v35  ;;  %v484_v34 = vcombine.low %v476_v27, %v483_v28  ;;  %v454_v35 = vsub.s32 4, %v395_v10  ;;  %v595_v27 = vld [vmem:[%s1988_s3 + $0x2b8] sm:$0xff] }
  0x3b   :  { %1254 = vmatpush3.bf16.msra.mxu1 %v1253_v41  ;;  %1224 = vmatprep.subr.bf16.mxu0 %v1223_v44  ;;  %v463_v44 = vrot.slane %v434_v17, %v462_v38  ;;  %v579_v38 = vld [vmem:[%s1988_s3 + $0x238] sm:$0xff] }
  0x3c   :  { %1256 = vmatprep.subr.bf16.mxu1 %v1255_v50  ;;  %v455_v41 = vrot.slane %v434_v17, %v454_v35  ;;  %v624_v17 = vld [vmem:[%s1988_s3 + $0x3a0] sm:$0xff] }
  0x3d   :  { %v486_v54 = vcombine.low %v463_v44, %v467_v45  ;;  %v610_v44 = vld [vmem:[%s1988_s3 + $0x330] sm:$0xff]  ;;  %v611_v45 = vld [vmem:[%s1988_s3 + $0x338] sm:$0xff] }
  0x3e   :  { %1226 = vmatpush3.bf16.msra.mxu0 %v1225_v47  ;;  %v572_v47 = vld [vmem:[%s1988_s3 + $0x200] sm:$0xff] }
  0x3f   :  { %1258 = vmatpush3.bf16.msra.mxu1 %v1257_v53  ;;  %1228 = vmatprep.subr.bf16.mxu0 %v1227_v56  ;;  %v485_v53 = vcombine.low %v455_v41, %v459_v43  ;;  %v605_v56 = vld [vmem:[%s1988_s3 + $0x308] sm:$0xff]  ;;  %v1265_v58 = vpack.c.bf16 %v573_v48, %v572_v47  ;;  %v500_v10 = vrot.slane %v486_v54, %v1781_v23  ;;  %v596_v41 = vld [vmem:[%s1988_s3 + $0x2c0] sm:$0xff]  ;;  %v598_v54 = vld [vmem:[%s1988_s3 + $0x2d0] sm:$0xff] }
  0x40   :  { %1260 = vmatprep.subr.bf16.mxu1 %v1259_v1  ;;  %v575_v1 = vld [vmem:[%s1988_s3 + $0x218] sm:$0xff]  ;;  %v1297_v4 = vpack.c.bf16 %v605_v56, %v604_v55  ;;  %v628_v48 = vld [vmem:[%s1988_s3 + $0x3c0] sm:$0xff] }
  0x41   :  { %v493_v9 = vrot.slane %v485_v53, %v1781_v23  ;;  %v1269_v16 = vpack.c.bf16 %v575_v1, %v574_v0  ;;  %v1309_v53 = vpack.c.bf16 %v611_v45, %v610_v44  ;;  %v599_v55 = vld [vmem:[%s1988_s3 + $0x2d8] sm:$0xff] }
  0x42   :  { %1230 = vmatpush3.bf16.msra.mxu0 %v1229_v60  ;;  %v622_v60 = vld [vmem:[%s1988_s3 + $0x390] sm:$0xff]  ;;  %v631_v0 = vld [vmem:[%s1988_s3 + $0x3d8] sm:$0xff] }
  0x43   :  { %1262 = vmatpush3.bf16.msra.mxu1 %v1261_v2  ;;  %1264 = vmatprep.subr.bf16.mxu0 %v1263_v5  ;;  %v592_v5 = vld [vmem:[%s1988_s3 + $0x2a0] sm:$0xff]  ;;  %v1299_v11 = vpack.c.bf16 %v623_v61, %v622_v60  ;;  %v613_v60 = vld [vmem:[%s1988_s3 + $0x348] sm:$0xff]  ;;  %v1281_v61 = vpack.c.bf16 %v581_v52, %v580_v51 }
  0x44   :  { %1296 = vmatprep.subr.bf16.mxu1 %v1295_v8  ;;  %v1271_v20 = vpack.c.bf16 %v593_v6, %v592_v5  ;;  %v583_v5 = vld [vmem:[%s1988_s3 + $0x258] sm:$0xff] }
  0xe8   :  { %v163_v26 = vpop.f32.mrb[0].mxu0 }
  0xe9   :  { %v234_v29 = vpop.f32.mrb[0].mxu1  ;;  %v165_v30 = vpop.f32.mrb[1].mxu0 }
  0xea   :  { %v389_v3 = vcombine.low %v163_v26, %v165_v30  ;;  %v236_v31 = vpop.f32.mrb[1].mxu1  ;;  %v594_v26 = vld [vmem:[%s1988_s3 + $0x2b0] sm:$0xff]  ;;  %v1303_v30 = vpack.c.bf16 %v625_v18, %v624_v17  ;;  %v585_v17 = vld [vmem:[%s1988_s3 + $0x268] sm:$0xff] }
  0xeb   :  { %v390_v32 = vcombine.low %v234_v29, %v236_v31  ;;  %v501_v29 = vcombine.low %v493_v9, %v500_v10  ;;  %v609_v31 = vld [vmem:[%s1988_s3 + $0x328] sm:$0xff]  ;;  %v614_v10 = vld [vmem:[%s1988_s3 + $0x350] sm:$0xff] }
  0xec   :  { %v397_v33 = vrot.slane %v389_v3, %v1781_v23  ;;  %v608_v3 = vld [vmem:[%s1988_s3 + $0x320] sm:$0xff] }
  0xed   :  { %v404_v36 = vrot.slane %v390_v32, %v1781_v23  ;;  %v1273_v32 = vpack.c.bf16 %v577_v22, %v576_v21  ;;  %v1305_v39 = vpack.c.bf16 %v609_v31, %v608_v3  ;;  %v616_v22 = vld [vmem:[%s1988_s3 + $0x360] sm:$0xff] }
  0xef   :  { %v405_v40 = vcombine.low %v397_v33, %v404_v36  ;;  %v626_v33 = vld [vmem:[%s1988_s3 + $0x3b0] sm:$0xff]  ;;  %v1275_v36 = vpack.c.bf16 %v595_v27, %v594_v26  ;;  %v635_v27 = vld [vmem:[%s1988_s3 + $0x3f8] sm:$0xff] }
  0xf0   :  { %v634_v26 = vld [vmem:[%s1988_s3 + $0x3f0] sm:$0xff] }
  0xf1   :  { %v504_v42 = vadd.f32 %v484_v34, %v405_v40  ;;  %v627_v34 = vld [vmem:[%s1988_s3 + $0x3b8] sm:$0xff]  ;;  %v1323_v31 = vpack.c.bf16 %v635_v27, %v634_v26 }
  0xf2   :  { %v1307_v43 = vpack.c.bf16 %v627_v34, %v626_v33  ;;  %v619_v33 = vld [vmem:[%s1988_s3 + $0x378] sm:$0xff] }
  0xf3   :  { %v506_v46 = vmax.f32 %v504_v42, 0.0  ;;  %v597_v42 = vld [vmem:[%s1988_s3 + $0x2c8] sm:$0xff] }
  0xf5   :  { %v652_v49 = vrot.slane %v506_v46, %v1781_v23  ;;  %v645_v50 = vcombine.high %v506_v46, %v506_v46  ;;  %v1277_v46 = vpack.c.bf16 %v579_v38, %v578_v37  ;;  %v994_v38 = vld [vmem:[%s1990_s4] ss:$0 sm:$0xff] }
  0xf7   :  { %v660_v57 = vcombine.high %v652_v49, %v652_v49  ;;  %v659_v59 = vrot.slane %v645_v50, %v1781_v23  ;;  %v1279_v50 = vpack.c.bf16 %v597_v42, %v596_v41 }
  0xf8   :  { %v305_v2 = vpop.f32.mrb[2].mxu0 }
  0xf9   :  { %751 = vmatprep.mubr.f32.mxu0 %v660_v57  ;;  %v661_v63 = vcombine.high %v659_v59, %v659_v59  ;;  %v376_v7 = vpop.f32.mrb[2].mxu1  ;;  %v307_v8 = vpop.f32.mrb[3].mxu0 }
  0xfa   :  { %752 = vmatmul.mubr.f32.vlgmr.msra.gmra.mrb[4].mxu0 %v652_v49  ;;  %v406_v14 = vcombine.low %v305_v2, %v307_v8  ;;  %v378_v15 = vpop.f32.mrb[3].mxu1  ;;  %v629_v49 = vld [vmem:[%s1988_s3 + $0x3c8] sm:$0xff] }
  0xfb   :  { %1266 = vmatpush3.bf16.msra.mxu0 %v1265_v58  ;;  %821 = vmatprep.mubr.f32.mxu1 %v661_v63  ;;  %v407_v19 = vcombine.low %v376_v7, %v378_v15  ;;  %v1311_v58 = vpack.c.bf16 %v629_v49, %v628_v48  ;;  %v1283_v63 = vpack.c.bf16 %v599_v55, %v598_v54  ;;  %v600_v7 = vld [vmem:[%s1988_s3 + $0x2e0] sm:$0xff] }
  0xfc   :  { %822 = vmatmul.mubr.f32.vlgmr.msra.gmra.mrb[4].mxu1 %v659_v59  ;;  %1268 = vmatprep.subr.bf16.mxu0 %v1267_v62  ;;  %v414_v24 = vrot.slane %v406_v14, %v1781_v23  ;;  %v612_v59 = vld [vmem:[%s1988_s3 + $0x340] sm:$0xff]  ;;  %v630_v62 = vld [vmem:[%s1988_s3 + $0x3d0] sm:$0xff]  ;;  %v633_v14 = vld [vmem:[%s1988_s3 + $0x3e8] sm:$0xff] }
  0xfd   :  { %1298 = vmatpush3.bf16.msra.mxu1 %v1297_v4  ;;  %v421_v28 = vrot.slane %v407_v19, %v1781_v23  ;;  %v582_v4 = vld [vmem:[%s1988_s3 + $0x250] sm:$0xff]  ;;  %v1313_v6 = vpack.c.bf16 %v613_v60, %v612_v59  ;;  %v1315_v9 = vpack.c.bf16 %v631_v0, %v630_v62  ;;  %v1319_v21 = vpack.c.bf16 %v633_v14, %v632_v13 }
  0xfe   :  { %1300 = vmatprep.subr.bf16.mxu1 %v1299_v11  ;;  %v615_v11 = vld [vmem:[%s1988_s3 + $0x358] sm:$0xff]  ;;  %v1285_v12 = vpack.c.bf16 %v583_v5, %v582_v4  ;;  %v602_v19 = vld [vmem:[%s1988_s3 + $0x2f0] sm:$0xff] }
  0xff   :  { %1270 = vmatpush3.bf16.msra.mxu0 %v1269_v16  ;;  %v422_v35 = vcombine.low %v414_v24, %v421_v28  ;;  %v584_v16 = vld [vmem:[%s1988_s3 + $0x260] sm:$0xff]  ;;  %v1317_v18 = vpack.c.bf16 %v615_v11, %v614_v10  ;;  %v617_v24 = vld [vmem:[%s1988_s3 + $0x368] sm:$0xff] }
 0x100   :  { %1272 = vmatprep.subr.bf16.mxu0 %v1271_v20  ;;  %v603_v20 = vld [vmem:[%s1988_s3 + $0x2f8] sm:$0xff]  ;;  %v1321_v3 = vpack.c.bf16 %v617_v24, %v616_v22 }
 0x101   :  { %1302 = vmatpush3.bf16.msra.mxu1 %v1301_v25  ;;  %v505_v40 = vadd.f32 %v501_v29, %v422_v35  ;;  %v1289_v25 = vpack.c.bf16 %v585_v17, %v584_v16  ;;  %v1291_v28 = vpack.c.bf16 %v603_v20, %v602_v19  ;;  %v586_v29 = vld [vmem:[%s1988_s3 + $0x270] sm:$0xff] }
 0x102   :  { %1304 = vmatprep.subr.bf16.mxu1 %v1303_v30  ;;  %v587_v30 = vld [vmem:[%s1988_s3 + $0x278] sm:$0xff] }
 0x103   :  { %1274 = vmatpush3.bf16.msra.mxu0 %v1273_v32  ;;  %v507_v47 = vmax.f32 %v505_v40, 0.0  ;;  %v618_v32 = vld [vmem:[%s1988_s3 + $0x370] sm:$0xff]  ;;  %v1293_v34 = vpack.c.bf16 %v587_v30, %v586_v29 }
 0x104   :  { %1276 = vmatprep.subr.bf16.mxu0 %v1275_v36  ;;  %v1325_v35 = vpack.c.bf16 %v619_v33, %v618_v32  ;;  %v1334_v36 = vmov 0  }
 0x105   :  { %1306 = vmatpush3.bf16.msra.mxu1 %v1305_v39  ;;  %v1902_v56 = vrot.slane %v507_v47, %v1781_v23  ;;  %v662_v57 = vcombine.high %v507_v47, %v507_v47  ;;  %1331 = vset.pattern.permute.xlu1 %v1334_v36 }
 0x106   :  { %1308 = vmatprep.subr.bf16.mxu1 %v1307_v43  ;;  %1330 = vset.pattern.permute.xlu0 %v1334_v36 }
 0x107   :  { %1278 = vmatpush3.bf16.msra.mxu0 %v1277_v46  ;;  %v677_v1 = vcombine.high %v1902_v56, %v1902_v56  ;;  %v676_v2 = vrot.slane %v662_v57, %v1781_v23  ;;  %v601_v23 = vld [vmem:[%s1988_s3 + $0x2e8] sm:$0xff] }
 0x108   :  { %1280 = vmatprep.subr.bf16.mxu0 %v1279_v50  ;;  %v1287_v15 = vpack.c.bf16 %v601_v23, %v600_v7 }
 0x109   :  { %1310 = vmatpush3.bf16.msra.mxu1 %v1309_v53  ;;  %891 = vmatprep.mubr.f32.mxu0 %v677_v1  ;;  %v678_v8 = vcombine.high %v676_v2, %v676_v2 }
 0x10a   :  { %1312 = vmatprep.subr.bf16.mxu1 %v1311_v58 }
 0x10b   :  { %1282 = vmatpush3.bf16.msra.mxu0 %v1281_v61  ;;  %961 = vmatprep.mubr.f32.mxu1 %v678_v8 }
 0x10c   :  { %1284 = vmatprep.subr.bf16.mxu0 %v1283_v63 }
 0x10d   :  { %1314 = vmatpush3.bf16.msra.mxu1 %v1313_v6 }
 0x10e   :  { %1316 = vmatprep.subr.bf16.mxu1 %v1315_v9 }
 0x10f   :  { %1286 = vmatpush3.bf16.msra.mxu0 %v1285_v12 }
 0x110   :  { %1288 = vmatprep.subr.bf16.mxu0 %v1287_v15 }
 0x111   :  { %1318 = vmatpush3.bf16.msra.mxu1 %v1317_v18 }
 0x112   :  { %1320 = vmatprep.subr.bf16.mxu1 %v1319_v21 }
 0x113   :  { %1290 = vmatpush3.bf16.msra.mxu0 %v1289_v25 }
 0x114   :  { %1292 = vmatprep.subr.bf16.mxu0 %v1291_v28 }
 0x115   :  { %1322 = vmatpush3.bf16.msra.mxu1 %v1321_v3 }
 0x116   :  { %1324 = vmatprep.subr.bf16.mxu1 %v1323_v31 }
 0x117   :  { %1294 = vmatpush3.bf16.msra.mxu0 %v1293_v34 }
 0x119   :  { %1326 = vmatpush3.bf16.msra.mxu1 %v1325_v35 }
 0x11a   :  { %892 = vmatmul.mubr.f32.vlgmr.msra.gmra.mrb[6].mxu0 %v1902_v56 }
 0x11c   :  { %962 = vmatmul.mubr.f32.vlgmr.msra.gmra.mrb[6].mxu1 %v676_v2 }
 0x1cd   :  { %v1027_v37 = vpop.f32.mrb[4].mxu0 }
 0x1ce   :  { %v1028_v39 = vpop.f32.mrb[5].mxu0 }
 0x1cf   :  { %v1029_v40 = vadd.f32 %v1028_v39, %v1027_v37  ;;  %v1062_v41 = vpop.f32.mrb[4].mxu1 }
 0x1d0   :  { %v1063_v42 = vpop.f32.mrb[5].mxu1 }
 0x1d1   :  { %v754_v43 = vadd.f32 %v1029_v40, %v994_v38  ;;  %v1064_v44 = vadd.f32 %v1063_v42, %v1062_v41 }
 0x1d3   :  { %v824_v45 = vadd.f32 %v1064_v44, %v754_v43 }
 0x1ed   :  { %v1097_v46 = vpop.f32.mrb[6].mxu0 }
 0x1ee   :  { %v1098_v47 = vpop.f32.mrb[7].mxu0 }
 0x1ef   :  { %v1099_v48 = vadd.f32 %v1098_v47, %v1097_v46  ;;  %v1132_v49 = vpop.f32.mrb[6].mxu1 }
 0x1f0   :  { %v1133_v50 = vpop.f32.mrb[7].mxu1 }
 0x1f1   :  { %v894_v51 = vadd.f32 %v1099_v48, %v824_v45  ;;  %v1134_v52 = vadd.f32 %v1133_v50, %v1132_v49 }
 0x1f3   :  { %v964_v53 = vadd.f32 %v1134_v52, %v894_v51 }
 0x1f5   :  { %981 = vperm.xlu1 %1331, %v964_v53   ;;  %v968_v54 = vsel %vm967_vm1, %v964_v53, 0.0 }
 0x1f6   :  { %969 = vadd.xlane.f32.xlu0 %v968_v54 }
 0x274   :  { %v982_v60 = vpop.permute.xlu1 %981 }
 0x283   :  { %v970_v55 = vpop.xlane.xlu0 %969 }
 0x284   :  { %v971_v56 = vsub.f32 %v970_v55, %v964_v53 }
 0x286   :  { %v972_v57 = vmul.f32 0.16666667, %v971_v56 }
 0x288   :  { %975 = vperm.xlu0 %1330, %v972_v57  }
 0x307   :  { %v976_v58 = vpop.permute.xlu0 %975 }
 0x308   :  { %v978_v59 = vsub.f32 %v964_v53, %v976_v58 }
 0x30a   :  { %v984_v61 = vadd.f32 %v982_v60, %v978_v59 }
 0x30c   :  { %985 = vst [vmem:[%s1991_s5] sm:$0x3] %v984_v61 }

</bundles_post_ra>
